<compile_context>
chip_gen: v7x
topology: tpu7x:2x2x1
jax: 0.10.0
libtpu: 0.0.40
codegen_flags: <defaults>
</compile_context>

<pallas_src>
import functools

import jax
import jax.numpy as jnp
from jax.experimental import pallas as pl
from jax.experimental.pallas import tpu as pltpu


# ----------------------------- Pallas kernels -----------------------------

def _linear_kernel(x_ref, w_ref, b_ref, o_ref):
    # y = x @ W + b   (W pre-transposed to (K, N), stored bf16)
    x = x_ref[...].astype(jnp.bfloat16)
    o_ref[...] = (jnp.dot(x, w_ref[...], preferred_element_type=jnp.float32)
                  + b_ref[...])


def _choose_tm(m):
    for tm in (512, 256, 128):
        if m % tm == 0:
            return tm
    return m


def linear(x, w, b):
    """x: (M, K) f32, w: (K, N) bf16, b: (1, N) f32 -> (M, N) f32."""
    M, K = x.shape
    N = w.shape[1]
    tm = _choose_tm(M)
    return pl.pallas_call(
        _linear_kernel,
        out_shape=jax.ShapeDtypeStruct((M, N), jnp.float32),
        grid=(M // tm,),
        in_specs=[
            pl.BlockSpec((tm, K), lambda i: (i, 0)),
            pl.BlockSpec((K, N), lambda i: (0, 0)),
            pl.BlockSpec((1, N), lambda i: (0, 0)),
        ],
        out_specs=pl.BlockSpec((tm, N), lambda i: (i, 0)),
        compiler_params=pltpu.CompilerParams(
            dimension_semantics=("parallel",)),
    )(x, w, b)


def _combine_proj_kernel(x_ref, a_ref, wxs_ref, was_ref, wm_ref, b_ref, o_ref):
    # cat([x, a, x-a, x*a]) @ W  ==  x@(Wx+Ws) + a@(Wa-Ws) + (x*a)@Wm
    x = x_ref[...]
    a = a_ref[...]
    xb = x.astype(jnp.bfloat16)
    ab = a.astype(jnp.bfloat16)
    mb = (x * a).astype(jnp.bfloat16)
    y = jnp.dot(xb, wxs_ref[...], preferred_element_type=jnp.float32)
    y = y + jnp.dot(ab, was_ref[...], preferred_element_type=jnp.float32)
    y = y + jnp.dot(mb, wm_ref[...], preferred_element_type=jnp.float32)
    o_ref[...] = y + b_ref[...]


def combine_proj(x, a, w_xs, w_as, w_m, b):
    """Fused combine + bilstm2 input projection. x, a: (M, 2H) -> (M, 8H)."""
    M, D = x.shape
    N = w_xs.shape[1]
    tm = _choose_tm(M)
    return pl.pallas_call(
        _combine_proj_kernel,
        out_shape=jax.ShapeDtypeStruct((M, N), jnp.float32),
        grid=(M // tm,),
        in_specs=[
            pl.BlockSpec((tm, D), lambda i: (i, 0)),
            pl.BlockSpec((tm, D), lambda i: (i, 0)),
            pl.BlockSpec((D, N), lambda i: (0, 0)),
            pl.BlockSpec((D, N), lambda i: (0, 0)),
            pl.BlockSpec((D, N), lambda i: (0, 0)),
            pl.BlockSpec((1, N), lambda i: (0, 0)),
        ],
        out_specs=pl.BlockSpec((tm, N), lambda i: (i, 0)),
        compiler_params=pltpu.CompilerParams(
            dimension_semantics=("parallel",)),
    )(x, a, w_xs, w_as, w_m, b)


def _lstm_kernel(xpi_ref, xpf_ref, xpg_ref, xpo_ref, whh_ref, o_ref):
    # Batched bidirectional recurrence.  State h/c: (2B, 2H) with columns
    # [h_fwd | h_bwd]; whh_ref: (4, 2H, 2H) per-gate block-diagonal (bf16).
    # Whole time loop runs in one kernel invocation; all operands in VMEM.
    T, B2, H2 = o_ref.shape
    wi = whh_ref[0]
    wf = whh_ref[1]
    wg = whh_ref[2]
    wo = whh_ref[3]

    def step(t, carry):
        h, c = carry
        hb = h.astype(jnp.bfloat16)
        gi = xpi_ref[t] + jnp.dot(hb, wi, preferred_element_type=jnp.float32)
        gf = xpf_ref[t] + jnp.dot(hb, wf, preferred_element_type=jnp.float32)
        gg = xpg_ref[t] + jnp.dot(hb, wg, preferred_element_type=jnp.float32)
        go = xpo_ref[t] + jnp.dot(hb, wo, preferred_element_type=jnp.float32)
        c_new = jax.nn.sigmoid(gf) * c + jax.nn.sigmoid(gi) * jnp.tanh(gg)
        h_new = jax.nn.sigmoid(go) * jnp.tanh(c_new)
        o_ref[t] = h_new
        return h_new, c_new

    h0 = jnp.zeros((B2, H2), jnp.float32)
    c0 = jnp.zeros((B2, H2), jnp.float32)
    jax.lax.fori_loop(0, T, step, (h0, c0), unroll=True)


def lstm_scan(xpi, xpf, xpg, xpo, whh):
    """xp*: (T, 2B, 2H) per-gate input projections (+biases); whh: (4,2H,2H).
    Returns per-step hidden states (T, 2B, 2H), columns [fwd | bwd]."""
    T, B2, H2 = xpi.shape
    return pl.pallas_call(
        _lstm_kernel,
        out_shape=jax.ShapeDtypeStruct((T, B2, H2), jnp.float32),
    )(xpi, xpf, xpg, xpo, whh)


def _attention_kernel(x1_ref, x2_ref, m1_ref, m2_ref, o1_ref, o2_ref):
    x1 = x1_ref[...].astype(jnp.bfloat16)          # (B, L1, D)
    x2 = x2_ref[...].astype(jnp.bfloat16)          # (B, L2, D)
    m1 = m1_ref[...]                               # (B, L1, 1) additive mask
    m2 = m2_ref[...]                               # (B, 1, L2) additive mask
    # scores: contract over D (no transpose materialized)
    a = jax.lax.dot_general(x1, x2, (((2,), (2,)), ((0,), (0,))),
                            preferred_element_type=jnp.float32)  # (B, L1, L2)
    # Reference computes softmax(attention + (attention + mask2)) == softmax(2a + m2)
    w1 = jax.nn.softmax(2.0 * a + m2, axis=-1)
    # weight2 = softmax(a^T + mask1) expressed without forming a^T:
    w2 = jax.nn.softmax(a + m1, axis=1)            # softmax over L1
    # TODO(synk): reference also overwrites mask2[0][0]/mask2[1][0] with +inf
    # (a bug that yields NaN rows); not reproduced here.
    o1_ref[...] = jax.lax.dot_general(
        w1.astype(jnp.bfloat16), x2, (((2,), (1,)), ((0,), (0,))),
        preferred_element_type=jnp.float32)        # (B, L1, D)
    o2_ref[...] = jax.lax.dot_general(
        w2.astype(jnp.bfloat16), x1, (((1,), (1,)), ((0,), (0,))),
        preferred_element_type=jnp.float32)        # (B, L2, D)


def attention(x1, x2, m1_add, m2_add):
    B, L1, D = x1.shape
    _, L2, _ = x2.shape
    return pl.pallas_call(
        _attention_kernel,
        out_shape=(jax.ShapeDtypeStruct((B, L1, D), jnp.float32),
                   jax.ShapeDtypeStruct((B, L2, D), jnp.float32)),
    )(x1, x2, m1_add.reshape(B, L1, 1), m2_add.reshape(B, 1, L2))


def _pool_mlp_kernel(o1_ref, o2_ref, w1_ref, b1_ref, w2_ref, b2_ref,
                     w3_ref, b3_ref, out_ref):
    def pool(x):  # (B, T, D) -> (B, 2D)
        return jnp.concatenate([jnp.mean(x, axis=1), jnp.max(x, axis=1)],
                               axis=-1)

    x = jnp.concatenate([pool(o1_ref[...]), pool(o2_ref[...])], axis=-1)
    h = jnp.dot(x.astype(jnp.bfloat16), w1_ref[...],
                preferred_element_type=jnp.float32) + b1_ref[...]
    h = jnp.maximum(h, 0.0)
    h = jnp.dot(h.astype(jnp.bfloat16), w2_ref[...],
                preferred_element_type=jnp.float32) + b2_ref[...]
    h = jnp.maximum(h, 0.0)
    out_ref[...] = jnp.dot(h.astype(jnp.bfloat16), w3_ref[...],
                           preferred_element_type=jnp.float32) + b3_ref[...]


def pool_mlp(o1, o2, fc):
    B = o1.shape[0]
    C = fc["w3"].shape[1]
    return pl.pallas_call(
        _pool_mlp_kernel,
        out_shape=jax.ShapeDtypeStruct((B, C), jnp.float32),
    )(o1, o2, fc["w1"], fc["b1"], fc["w2"], fc["b2"], fc["w3"], fc["b3"])


# --------------------------- model composition ---------------------------

def run_bilstm_from_xp(xp_flat, b2, t, hidden, whh):
    """xp_flat: (2B*T, 8H) input projections with columns
    [fwd(i,f,g,o) | bwd(i,f,g,o)], each gate block H wide.
    Returns BiLSTM outputs (2B, T, 2H)."""
    H = hidden
    xp = xp_flat.reshape(b2, t, 2, 4, H)
    xp_f = xp[:, :, 0]                              # (2B, T, 4, H)
    xp_b = xp[:, ::-1, 1]                           # time-reversed for bwd chain
    xp_c = jnp.concatenate([xp_f, xp_b], axis=-1)   # (2B, T, 4, 2H)
    xp_g = jnp.transpose(xp_c, (2, 1, 0, 3))        # (4, T, 2B, 2H)
    h_tm = lstm_scan(xp_g[0], xp_g[1], xp_g[2], xp_g[3], whh)  # (T, 2B, 2H)
    h_f = h_tm[:, :, :H]
    h_b = h_tm[::-1, :, H:]                         # undo time reversal
    out = jnp.concatenate([h_f, h_b], axis=-1)      # (T, 2B, 2H)
    return jnp.transpose(out, (1, 0, 2))            # (2B, T, 2H)


def esim_forward(params, sen1_ids, sen2_ids, hidden):
    B, T = sen1_ids.shape
    B2 = 2 * B
    m1_add = jnp.where(sen1_ids == 0, -jnp.inf, 0.0).astype(jnp.float32)
    m2_add = jnp.where(sen2_ids == 0, -jnp.inf, 0.0).astype(jnp.float32)

    ids_all = jnp.concatenate([sen1_ids, sen2_ids], axis=0)       # (2B, T)
    x_all = jnp.take(params["embedding"], ids_all, axis=0)        # gather (glue)

    # --- BiLSTM 1: both sentences + both directions in one scan ---
    p1 = params["bilstm1"]
    xp1 = linear(x_all.reshape(B2 * T, -1), p1["w_ih"], p1["b"])  # (2B*T, 8H)
    b_all = run_bilstm_from_xp(xp1, B2, T, hidden, p1["whh"])     # (2B, T, 2H)
    b1, b2 = b_all[:B], b_all[B:]

    # --- ESIM soft attention (whole batch, one kernel) ---
    a1, a2 = attention(b1, b2, m1_add, m2_add)
    a_all = jnp.concatenate([a1, a2], axis=0)                     # (2B, T, 2H)

    # --- BiLSTM 2 with combine() fused into the input projection ---
    p2 = params["bilstm2"]
    xp2 = combine_proj(b_all.reshape(B2 * T, -1), a_all.reshape(B2 * T, -1),
                       p2["w_xs"], p2["w_as"], p2["w_m"], p2["b"])
    o_all = run_bilstm_from_xp(xp2, B2, T, hidden, p2["whh"])     # (2B, T, 2H)
    o1, o2 = o_all[:B], o_all[B:]

    # --- fused pooling + FC head (dropouts are identity in eval mode) ---
    return pool_mlp(o1, o2, params["fc"])


# ------------------------------ parameters ------------------------------

def _uniform(key, shape, bound):
    return jax.random.uniform(key, shape, jnp.float32, -bound, bound)


def _init_lstm_dir(key, in_dim, hidden):
    """Raw PyTorch-layout LSTM params for one direction."""
    k = jax.random.split(key, 4)
    bound = 1.0 / (hidden ** 0.5)
    w_ih = _uniform(k[0], (4 * hidden, in_dim), bound)   # rows: [i,f,g,o]
    w_hh = _uniform(k[1], (4 * hidden, hidden), bound)
    b = (_uniform(k[2], (4 * hidden,), bound)
         + _uniform(k[3], (4 * hidden,), bound))          # b_ih + b_hh folded
    return w_ih, w_hh, b


def _prep_whh(w_hh_f, w_hh_b, hidden):
    """Per-gate block-diagonal recurrent weights: (4, 2H, 2H) bf16."""
    H = hidden
    wf = w_hh_f.T                                         # (H, 4H), cols [i,f,g,o]
    wb = w_hh_b.T
    z = jnp.zeros((H, H), jnp.float32)
    gates = []
    for g in range(4):
        a = wf[:, g * H:(g + 1) * H]
        b = wb[:, g * H:(g + 1) * H]
        gates.append(jnp.concatenate(
            [jnp.concatenate([a, z], axis=1),
             jnp.concatenate([z, b], axis=1)], axis=0))   # (2H, 2H)
    return jnp.stack(gates).astype(jnp.bfloat16)


def init_params(key, vocab, emb_dim, hidden, class_num):
    ks = jax.random.split(key, 11)
    H = hidden

    # bilstm1: fused fwd+bwd input projection (E, 8H), block-diag W_hh.
    wif, whf, bf_ = _init_lstm_dir(ks[1], emb_dim, H)
    wib, whb, bb_ = _init_lstm_dir(ks[2], emb_dim, H)
    bilstm1 = {
        "w_ih": jnp.concatenate([wif.T, wib.T], axis=1).astype(jnp.bfloat16),
        "b": jnp.concatenate([bf_, bb_])[None, :],
        "whh": _prep_whh(whf, whb, H),
    }

    # bilstm2: input is cat([x, a, x-a, x*a]) (8H wide); fold the combine.
    wif2, whf2, bf2 = _init_lstm_dir(ks[3], 8 * H, H)
    wib2, whb2, bb2 = _init_lstm_dir(ks[4], 8 * H, H)
    w2 = jnp.concatenate([wif2.T, wib2.T], axis=1)        # (8H_in, 8H_out)
    wx, wa, wsub, wmul = w2[:2 * H], w2[2 * H:4 * H], w2[4 * H:6 * H], w2[6 * H:]
    bilstm2 = {
        "w_xs": (wx + wsub).astype(jnp.bfloat16),
        "w_as": (wa - wsub).astype(jnp.bfloat16),
        "w_m": wmul.astype(jnp.bfloat16),
        "b": jnp.concatenate([bf2, bb2])[None, :],
        "whh": _prep_whh(whf2, whb2, H),
    }

    def lin(kw, kb, in_dim, out_dim):   # pre-transposed (K, N) bf16 weights
        bound = 1.0 / (in_dim ** 0.5)
        return (_uniform(kw, (in_dim, out_dim), bound).astype(jnp.bfloat16),
                _uniform(kb, (1, out_dim), bound))

    w1, b1 = lin(ks[5], ks[6], 8 * H, H)
    w2f, b2f = lin(ks[7], ks[8], H, H)
    w3, b3 = lin(ks[9], ks[10], H, class_num)

    return {
        "embedding": jax.random.normal(ks[0], (vocab, emb_dim), jnp.float32),
        "bilstm1": bilstm1,
        "bilstm2": bilstm2,
        "fc": {"w1": w1, "b1": b1, "w2": w2f, "b2": b2f, "w3": w3, "b3": b3},
    }


# --------------------------------- main ---------------------------------

if __name__ == "__main__":
    VOCAB, EMB, HIDDEN, CLASSES = 50, 32, 32, 3
    B, L = 2, 8

    key = jax.random.PRNGKey(0)
    kp, k1, k2 = jax.random.split(key, 3)
    params = init_params(kp, VOCAB, EMB, HIDDEN, CLASSES)

    # ids in [1, VOCAB) -> no padding tokens (avoids the reference's NaN mask bug)
    sen1_ids = jax.random.randint(k1, (B, L), 1, VOCAB, dtype=jnp.int32)
    sen2_ids = jax.random.randint(k2, (B, L), 1, VOCAB, dtype=jnp.int32)

    fwd = jax.jit(functools.partial(esim_forward, hidden=HIDDEN))
    out = fwd(params, sen1_ids, sen2_ids)
    out = jax.block_until_ready(out)

    assert out.shape == (B, CLASSES)
    assert bool(jnp.all(jnp.isfinite(out)))
    print("KERNEL_OK")
</pallas_src>

<mosaic_0001>
module attributes {stable_mosaic.version = 11 : i64} {
  func.func @_linear_kernel(%arg0: i32, %arg1: memref<32x32xf32, #tpu.memory_space<vmem>>, %arg2: memref<32x256xbf16, #tpu.memory_space<vmem>>, %arg3: memref<1x256xf32, #tpu.memory_space<vmem>>, %arg4: memref<32x256xf32, #tpu.memory_space<vmem>>) attributes {dimension_semantics = [#tpu.dimension_semantics<parallel>], iteration_bounds = array<i64: 1>, scalar_prefetch = 0 : i64, scratch_operands = 0 : i64, tpu.core_type = #tpu.core_type<tc>, window_params = [{transform_indices = @transform_0, window_bounds = array<i64: 32, 32>}, {pipeline_mode = #tpu.pipeline_mode<synchronous>, transform_indices = @transform_1, window_bounds = array<i64: 32, 256>}, {pipeline_mode = #tpu.pipeline_mode<synchronous>, transform_indices = @transform_2, window_bounds = array<i64: 1, 256>}, {transform_indices = @transform_3, window_bounds = array<i64: 32, 256>}]} {
    %c0 = arith.constant 0 : index
    %c0_0 = arith.constant 0 : index
    %0 = vector.load %arg1[%c0, %c0_0] : memref<32x32xf32, #tpu.memory_space<vmem>>, vector<32x32xf32>
    %1 = arith.truncf %0 : vector<32x32xf32> to vector<32x32xbf16>
    %c0_1 = arith.constant 0 : index
    %c0_2 = arith.constant 0 : index
    %2 = vector.load %arg2[%c0_1, %c0_2] : memref<32x256xbf16, #tpu.memory_space<vmem>>, vector<32x256xbf16>
    %cst = arith.constant dense<0.000000e+00> : vector<32x256xf32>
    %3 = tpu.matmul %1, %2, %cst {dimension_numbers = #tpu.dot_dimension_numbers<[1], [0], [0], [1], [0, 0, 1, 1], [], []>} : vector<32x32xbf16>, vector<32x256xbf16>, vector<32x256xf32> -> vector<32x256xf32>
    %c0_3 = arith.constant 0 : index
    %c0_4 = arith.constant 0 : index
    %4 = vector.load %arg3[%c0_3, %c0_4] : memref<1x256xf32, #tpu.memory_space<vmem>>, vector<1x256xf32>
    %5 = vector.broadcast %4 : vector<1x256xf32> to vector<32x256xf32>
    %6 = arith.addf %3, %5 : vector<32x256xf32>
    %c0_5 = arith.constant 0 : index
    %c0_6 = arith.constant 0 : index
    %7 = vector.load %arg4[%c0_5, %c0_6] : memref<32x256xf32, #tpu.memory_space<vmem>>, vector<32x256xf32>
    tpu.vector_store %arg4[%c0_5, %c0_6], %6 {strides = array<i32>} : memref<32x256xf32, #tpu.memory_space<vmem>>, vector<32x256xf32>,
    return
  }
  func.func @transform_0(%arg0: i32) -> (i32, i32) {
    %c0_i32 = arith.constant 0 : i32
    %c0_i32_0 = arith.constant 0 : i32
    return %arg0, %c0_i32 : i32, i32
  }
  func.func @transform_1(%arg0: i32) -> (i32, i32) {
    %c0_i32 = arith.constant 0 : i32
    %c0_i32_0 = arith.constant 0 : i32
    %c0_i32_1 = arith.constant 0 : i32
    return %c0_i32, %c0_i32_0 : i32, i32
  }
  func.func @transform_2(%arg0: i32) -> (i32, i32) {
    %c0_i32 = arith.constant 0 : i32
    %c0_i32_0 = arith.constant 0 : i32
    %c0_i32_1 = arith.constant 0 : i32
    return %c0_i32, %c0_i32_0 : i32, i32
  }
  func.func @transform_3(%arg0: i32) -> (i32, i32) {
    %c0_i32 = arith.constant 0 : i32
    %c0_i32_0 = arith.constant 0 : i32
    return %arg0, %c0_i32 : i32, i32
  }
}

module attributes {stable_mosaic.version = 11 : i64} {
  func.func @_lstm_kernel(%arg0: memref<8x4x64xf32, #tpu.memory_space<vmem>>, %arg1: memref<8x4x64xf32, #tpu.memory_space<vmem>>, %arg2: memref<8x4x64xf32, #tpu.memory_space<vmem>>, %arg3: memref<8x4x64xf32, #tpu.memory_space<vmem>>, %arg4: memref<4x64x64xbf16, #tpu.memory_space<vmem>>, %arg5: memref<8x4x64xf32, #tpu.memory_space<vmem>>) attributes {dimension_semantics = [], scalar_prefetch = 0 : i64, scratch_operands = 0 : i64, tpu.core_type = #tpu.core_type<tc>} {
    %c0 = arith.constant 0 : index
    %c0_0 = arith.constant 0 : index
    %c0_1 = arith.constant 0 : index
    %0 = vector.load %arg4[%c0, %c0_0, %c0_1] : memref<4x64x64xbf16, #tpu.memory_space<vmem>>, vector<1x64x64xbf16>
    %1 = vector.shape_cast %0 : vector<1x64x64xbf16> to vector<64x64xbf16>
    %c1 = arith.constant 1 : index
    %c0_2 = arith.constant 0 : index
    %c0_3 = arith.constant 0 : index
    %2 = vector.load %arg4[%c1, %c0_2, %c0_3] : memref<4x64x64xbf16, #tpu.memory_space<vmem>>, vector<1x64x64xbf16>
    %3 = vector.shape_cast %2 : vector<1x64x64xbf16> to vector<64x64xbf16>
    %c2 = arith.constant 2 : index
    %c0_4 = arith.constant 0 : index
    %c0_5 = arith.constant 0 : index
    %4 = vector.load %arg4[%c2, %c0_4, %c0_5] : memref<4x64x64xbf16, #tpu.memory_space<vmem>>, vector<1x64x64xbf16>
    %5 = vector.shape_cast %4 : vector<1x64x64xbf16> to vector<64x64xbf16>
    %c3 = arith.constant 3 : index
    %c0_6 = arith.constant 0 : index
    %c0_7 = arith.constant 0 : index
    %6 = vector.load %arg4[%c3, %c0_6, %c0_7] : memref<4x64x64xbf16, #tpu.memory_space<vmem>>, vector<1x64x64xbf16>
    %7 = vector.shape_cast %6 : vector<1x64x64xbf16> to vector<64x64xbf16>
    %cst = arith.constant 0.000000e+00 : f32
    %8 = vector.broadcast %cst : f32 to vector<4x64xf32>
    %cst_8 = arith.constant 0.000000e+00 : f32
    %9 = vector.broadcast %cst_8 : f32 to vector<4x64xf32>
    %c0_i32 = arith.constant 0 : i32
    %10 = arith.truncf %8 : vector<4x64xf32> to vector<4x64xbf16>
    %11 = arith.index_cast %c0_i32 : i32 to index
    %c0_9 = arith.constant 0 : index
    %c0_10 = arith.constant 0 : index
    %12 = vector.load %arg0[%11, %c0_9, %c0_10] : memref<8x4x64xf32, #tpu.memory_space<vmem>>, vector<1x4x64xf32>
    %13 = vector.shape_cast %12 : vector<1x4x64xf32> to vector<4x64xf32>
    %cst_11 = arith.constant dense<0.000000e+00> : vector<4x64xf32>
    %14 = tpu.matmul %10, %1, %cst_11 {dimension_numbers = #tpu.dot_dimension_numbers<[1], [0], [0], [1], [0, 0, 1, 1], [], []>} : vector<4x64xbf16>, vector<64x64xbf16>, vector<4x64xf32> -> vector<4x64xf32>
    %15 = arith.addf %13, %14 : vector<4x64xf32>
    %16 = arith.index_cast %c0_i32 : i32 to index
    %c0_12 = arith.constant 0 : index
    %c0_13 = arith.constant 0 : index
    %17 = vector.load %arg1[%16, %c0_12, %c0_13] : memref<8x4x64xf32, #tpu.memory_space<vmem>>, vector<1x4x64xf32>
    %18 = vector.shape_cast %17 : vector<1x4x64xf32> to vector<4x64xf32>
    %cst_14 = arith.constant dense<0.000000e+00> : vector<4x64xf32>
    %19 = tpu.matmul %10, %3, %cst_14 {dimension_numbers = #tpu.dot_dimension_numbers<[1], [0], [0], [1], [0, 0, 1, 1], [], []>} : vector<4x64xbf16>, vector<64x64xbf16>, vector<4x64xf32> -> vector<4x64xf32>
    %20 = arith.addf %18, %19 : vector<4x64xf32>
    %21 = arith.index_cast %c0_i32 : i32 to index
    %c0_15 = arith.constant 0 : index
    %c0_16 = arith.constant 0 : index
    %22 = vector.load %arg2[%21, %c0_15, %c0_16] : memref<8x4x64xf32, #tpu.memory_space<vmem>>, vector<1x4x64xf32>
    %23 = vector.shape_cast %22 : vector<1x4x64xf32> to vector<4x64xf32>
    %cst_17 = arith.constant dense<0.000000e+00> : vector<4x64xf32>
    %24 = tpu.matmul %10, %5, %cst_17 {dimension_numbers = #tpu.dot_dimension_numbers<[1], [0], [0], [1], [0, 0, 1, 1], [], []>} : vector<4x64xbf16>, vector<64x64xbf16>, vector<4x64xf32> -> vector<4x64xf32>
    %25 = arith.addf %23, %24 : vector<4x64xf32>
    %26 = arith.index_cast %c0_i32 : i32 to index
    %c0_18 = arith.constant 0 : index
    %c0_19 = arith.constant 0 : index
    %27 = vector.load %arg3[%26, %c0_18, %c0_19] : memref<8x4x64xf32, #tpu.memory_space<vmem>>, vector<1x4x64xf32>
    %28 = vector.shape_cast %27 : vector<1x4x64xf32> to vector<4x64xf32>
    %cst_20 = arith.constant dense<0.000000e+00> : vector<4x64xf32>
    %29 = tpu.matmul %10, %7, %cst_20 {dimension_numbers = #tpu.dot_dimension_numbers<[1], [0], [0], [1], [0, 0, 1, 1], [], []>} : vector<4x64xbf16>, vector<64x64xbf16>, vector<4x64xf32> -> vector<4x64xf32>
    %30 = arith.addf %28, %29 : vector<4x64xf32>
    %31 = arith.negf %20 : vector<4x64xf32>
    %32 = math.exp %31 : vector<4x64xf32>
    %cst_21 = arith.constant 1.000000e+00 : f32
    %33 = vector.broadcast %cst_21 : f32 to vector<4x64xf32>
    %34 = arith.addf %33, %32 : vector<4x64xf32>
    %35 = arith.divf %33, %34 : vector<4x64xf32>
    %36 = arith.mulf %35, %9 : vector<4x64xf32>
    %37 = arith.negf %15 : vector<4x64xf32>
    %38 = math.exp %37 : vector<4x64xf32>
    %cst_22 = arith.constant 1.000000e+00 : f32
    %39 = vector.broadcast %cst_22 : f32 to vector<4x64xf32>
    %40 = arith.addf %39, %38 : vector<4x64xf32>
    %41 = arith.divf %39, %40 : vector<4x64xf32>
    %42 = math.tanh %25 : vector<4x64xf32>
    %43 = arith.mulf %41, %42 : vector<4x64xf32>
    %44 = arith.addf %36, %43 : vector<4x64xf32>
    %45 = arith.negf %30 : vector<4x64xf32>
    %46 = math.exp %45 : vector<4x64xf32>
    %cst_23 = arith.constant 1.000000e+00 : f32
    %47 = vector.broadcast %cst_23 : f32 to vector<4x64xf32>
    %48 = arith.addf %47, %46 : vector<4x64xf32>
    %49 = arith.divf %47, %48 : vector<4x64xf32>
    %50 = math.tanh %44 : vector<4x64xf32>
    %51 = arith.mulf %49, %50 : vector<4x64xf32>
    %52 = arith.index_cast %c0_i32 : i32 to index
    %c0_24 = arith.constant 0 : index
    %c0_25 = arith.constant 0 : index
    %53 = vector.load %arg5[%52, %c0_24, %c0_25] : memref<8x4x64xf32, #tpu.memory_space<vmem>>, vector<1x4x64xf32>
    %54 = vector.shape_cast %53 : vector<1x4x64xf32> to vector<4x64xf32>
    %55 = vector.shape_cast %51 : vector<4x64xf32> to vector<1x4x64xf32>
    tpu.vector_store %arg5[%52, %c0_24, %c0_25], %55 {strides = array<i32>} : memref<8x4x64xf32, #tpu.memory_space<vmem>>, vector<1x4x64xf32>,
    %c1_i32 = arith.constant 1 : i32
    %56 = arith.truncf %51 : vector<4x64xf32> to vector<4x64xbf16>
    %57 = arith.index_cast %c1_i32 : i32 to index
    %c0_26 = arith.constant 0 : index
    %c0_27 = arith.constant 0 : index
    %58 = vector.load %arg0[%57, %c0_26, %c0_27] : memref<8x4x64xf32, #tpu.memory_space<vmem>>, vector<1x4x64xf32>
    %59 = vector.shape_cast %58 : vector<1x4x64xf32> to vector<4x64xf32>
    %cst_28 = arith.constant dense<0.000000e+00> : vector<4x64xf32>
    %60 = tpu.matmul %56, %1, %cst_28 {dimension_numbers = #tpu.dot_dimension_numbers<[1], [0], [0], [1], [0, 0, 1, 1], [], []>} : vector<4x64xbf16>, vector<64x64xbf16>, vector<4x64xf32> -> vector<4x64xf32>
    %61 = arith.addf %59, %60 : vector<4x64xf32>
    %62 = arith.index_cast %c1_i32 : i32 to index
    %c0_29 = arith.constant 0 : index
    %c0_30 = arith.constant 0 : index
    %63 = vector.load %arg1[%62, %c0_29, %c0_30] : memref<8x4x64xf32, #tpu.memory_space<vmem>>, vector<1x4x64xf32>
    %64 = vector.shape_cast %63 : vector<1x4x64xf32> to vector<4x64xf32>
    %cst_31 = arith.constant dense<0.000000e+00> : vector<4x64xf32>
    %65 = tpu.matmul %56, %3, %cst_31 {dimension_numbers = #tpu.dot_dimension_numbers<[1], [0], [0], [1], [0, 0, 1, 1], [], []>} : vector<4x64xbf16>, vector<64x64xbf16>, vector<4x64xf32> -> vector<4x64xf32>
    %66 = arith.addf %64, %65 : vector<4x64xf32>
    %67 = arith.index_cast %c1_i32 : i32 to index
    %c0_32 = arith.constant 0 : index
    %c0_33 = arith.constant 0 : index
    %68 = vector.load %arg2[%67, %c0_32, %c0_33] : memref<8x4x64xf32, #tpu.memory_space<vmem>>, vector<1x4x64xf32>
    %69 = vector.shape_cast %68 : vector<1x4x64xf32> to vector<4x64xf32>
    %cst_34 = arith.constant dense<0.000000e+00> : vector<4x64xf32>
    %70 = tpu.matmul %56, %5, %cst_34 {dimension_numbers = #tpu.dot_dimension_numbers<[1], [0], [0], [1], [0, 0, 1, 1], [], []>} : vector<4x64xbf16>, vector<64x64xbf16>, vector<4x64xf32> -> vector<4x64xf32>
    %71 = arith.addf %69, %70 : vector<4x64xf32>
    %72 = arith.index_cast %c1_i32 : i32 to index
    %c0_35 = arith.constant 0 : index
    %c0_36 = arith.constant 0 : index
    %73 = vector.load %arg3[%72, %c0_35, %c0_36] : memref<8x4x64xf32, #tpu.memory_space<vmem>>, vector<1x4x64xf32>
    %74 = vector.shape_cast %73 : vector<1x4x64xf32> to vector<4x64xf32>
    %cst_37 = arith.constant dense<0.000000e+00> : vector<4x64xf32>
    %75 = tpu.matmul %56, %7, %cst_37 {dimension_numbers = #tpu.dot_dimension_numbers<[1], [0], [0], [1], [0, 0, 1, 1], [], []>} : vector<4x64xbf16>, vector<64x64xbf16>, vector<4x64xf32> -> vector<4x64xf32>
    %76 = arith.addf %74, %75 : vector<4x64xf32>
    %77 = arith.negf %66 : vector<4x64xf32>
    %78 = math.exp %77 : vector<4x64xf32>
    %cst_38 = arith.constant 1.000000e+00 : f32
    %79 = vector.broadcast %cst_38 : f32 to vector<4x64xf32>
    %80 = arith.addf %79, %78 : vector<4x64xf32>
    %81 = arith.divf %79, %80 : vector<4x64xf32>
    %82 = arith.mulf %81, %44 : vector<4x64xf32>
    %83 = arith.negf %61 : vector<4x64xf32>
    %84 = math.exp %83 : vector<4x64xf32>
    %cst_39 = arith.constant 1.000000e+00 : f32
    %85 = vector.broadcast %cst_39 : f32 to vector<4x64xf32>
    %86 = arith.addf %85, %84 : vector<4x64xf32>
    %87 = arith.divf %85, %86 : vector<4x64xf32>
    %88 = math.tanh %71 : vector<4x64xf32>
    %89 = arith.mulf %87, %88 : vector<4x64xf32>
    %90 = arith.addf %82, %89 : vector<4x64xf32>
    %91 = arith.negf %76 : vector<4x64xf32>
    %92 = math.exp %91 : vector<4x64xf32>
    %cst_40 = arith.constant 1.000000e+00 : f32
    %93 = vector.broadcast %cst_40 : f32 to vector<4x64xf32>
    %94 = arith.addf %93, %92 : vector<4x64xf32>
    %95 = arith.divf %93, %94 : vector<4x64xf32>
    %96 = math.tanh %90 : vector<4x64xf32>
    %97 = arith.mulf %95, %96 : vector<4x64xf32>
    %98 = arith.index_cast %c1_i32 : i32 to index
    %c0_41 = arith.constant 0 : index
    %c0_42 = arith.constant 0 : index
    %99 = vector.load %arg5[%98, %c0_41, %c0_42] : memref<8x4x64xf32, #tpu.memory_space<vmem>>, vector<1x4x64xf32>
    %100 = vector.shape_cast %99 : vector<1x4x64xf32> to vector<4x64xf32>
    %101 = vector.shape_cast %97 : vector<4x64xf32> to vector<1x4x64xf32>
    tpu.vector_store %arg5[%98, %c0_41, %c0_42], %101 {strides = array<i32>} : memref<8x4x64xf32, #tpu.memory_space<vmem>>, vector<1x4x64xf32>,
    %c2_i32 = arith.constant 2 : i32
    %102 = arith.truncf %97 : vector<4x64xf32> to vector<4x64xbf16>
    %103 = arith.index_cast %c2_i32 : i32 to index
    %c0_43 = arith.constant 0 : index
    %c0_44 = arith.constant 0 : index
    %104 = vector.load %arg0[%103, %c0_43, %c0_44] : memref<8x4x64xf32, #tpu.memory_space<vmem>>, vector<1x4x64xf32>
    %105 = vector.shape_cast %104 : vector<1x4x64xf32> to vector<4x64xf32>
    %cst_45 = arith.constant dense<0.000000e+00> : vector<4x64xf32>
    %106 = tpu.matmul %102, %1, %cst_45 {dimension_numbers = #tpu.dot_dimension_numbers<[1], [0], [0], [1], [0, 0, 1, 1], [], []>} : vector<4x64xbf16>, vector<64x64xbf16>, vector<4x64xf32> -> vector<4x64xf32>
    %107 = arith.addf %105, %106 : vector<4x64xf32>
    %108 = arith.index_cast %c2_i32 : i32 to index
    %c0_46 = arith.constant 0 : index
    %c0_47 = arith.constant 0 : index
    %109 = vector.load %arg1[%108, %c0_46, %c0_47] : memref<8x4x64xf32, #tpu.memory_space<vmem>>, vector<1x4x64xf32>
    %110 = vector.shape_cast %109 : vector<1x4x64xf32> to vector<4x64xf32>
    %cst_48 = arith.constant dense<0.000000e+00> : vector<4x64xf32>
    %111 = tpu.matmul %102, %3, %cst_48 {dimension_numbers = #tpu.dot_dimension_numbers<[1], [0], [0], [1], [0, 0, 1, 1], [], []>} : vector<4x64xbf16>, vector<64x64xbf16>, vector<4x64xf32> -> vector<4x64xf32>
    %112 = arith.addf %110, %111 : vector<4x64xf32>
    %113 = arith.index_cast %c2_i32 : i32 to index
    %c0_49 = arith.constant 0 : index
    %c0_50 = arith.constant 0 : index
    %114 = vector.load %arg2[%113, %c0_49, %c0_50] : memref<8x4x64xf32, #tpu.memory_space<vmem>>, vector<1x4x64xf32>
    %115 = vector.shape_cast %114 : vector<1x4x64xf32> to vector<4x64xf32>
    %cst_51 = arith.constant dense<0.000000e+00> : vector<4x64xf32>
    %116 = tpu.matmul %102, %5, %cst_51 {dimension_numbers = #tpu.dot_dimension_numbers<[1], [0], [0], [1], [0, 0, 1, 1], [], []>} : vector<4x64xbf16>, vector<64x64xbf16>, vector<4x64xf32> -> vector<4x64xf32>
    %117 = arith.addf %115, %116 : vector<4x64xf32>
    %118 = arith.index_cast %c2_i32 : i32 to index
    %c0_52 = arith.constant 0 : index
    %c0_53 = arith.constant 0 : index
    %119 = vector.load %arg3[%118, %c0_52, %c0_53] : memref<8x4x64xf32, #tpu.memory_space<vmem>>, vector<1x4x64xf32>
    %120 = vector.shape_cast %119 : vector<1x4x64xf32> to vector<4x64xf32>
    %cst_54 = arith.constant dense<0.000000e+00> : vector<4x64xf32>
    %121 = tpu.matmul %102, %7, %cst_54 {dimension_numbers = #tpu.dot_dimension_numbers<[1], [0], [0], [1], [0, 0, 1, 1], [], []>} : vector<4x64xbf16>, vector<64x64xbf16>, vector<4x64xf32> -> vector<4x64xf32>
    %122 = arith.addf %120, %121 : vector<4x64xf32>
    %123 = arith.negf %112 : vector<4x64xf32>
    %124 = math.exp %123 : vector<4x64xf32>
    %cst_55 = arith.constant 1.000000e+00 : f32
    %125 = vector.broadcast %cst_55 : f32 to vector<4x64xf32>
    %126 = arith.addf %125, %124 : vector<4x64xf32>
    %127 = arith.divf %125, %126 : vector<4x64xf32>
    %128 = arith.mulf %127, %90 : vector<4x64xf32>
    %129 = arith.negf %107 : vector<4x64xf32>
    %130 = math.exp %129 : vector<4x64xf32>
    %cst_56 = arith.constant 1.000000e+00 : f32
    %131 = vector.broadcast %cst_56 : f32 to vector<4x64xf32>
    %132 = arith.addf %131, %130 : vector<4x64xf32>
    %133 = arith.divf %131, %132 : vector<4x64xf32>
    %134 = math.tanh %117 : vector<4x64xf32>
    %135 = arith.mulf %133, %134 : vector<4x64xf32>
    %136 = arith.addf %128, %135 : vector<4x64xf32>
    %137 = arith.negf %122 : vector<4x64xf32>
    %138 = math.exp %137 : vector<4x64xf32>
    %cst_57 = arith.constant 1.000000e+00 : f32
    %139 = vector.broadcast %cst_57 : f32 to vector<4x64xf32>
    %140 = arith.addf %139, %138 : vector<4x64xf32>
    %141 = arith.divf %139, %140 : vector<4x64xf32>
    %142 = math.tanh %136 : vector<4x64xf32>
    %143 = arith.mulf %141, %142 : vector<4x64xf32>
    %144 = arith.index_cast %c2_i32 : i32 to index
    %c0_58 = arith.constant 0 : index
    %c0_59 = arith.constant 0 : index
    %145 = vector.load %arg5[%144, %c0_58, %c0_59] : memref<8x4x64xf32, #tpu.memory_space<vmem>>, vector<1x4x64xf32>
    %146 = vector.shape_cast %145 : vector<1x4x64xf32> to vector<4x64xf32>
    %147 = vector.shape_cast %143 : vector<4x64xf32> to vector<1x4x64xf32>
    tpu.vector_store %arg5[%144, %c0_58, %c0_59], %147 {strides = array<i32>} : memref<8x4x64xf32, #tpu.memory_space<vmem>>, vector<1x4x64xf32>,
    %c3_i32 = arith.constant 3 : i32
    %148 = arith.truncf %143 : vector<4x64xf32> to vector<4x64xbf16>
    %149 = arith.index_cast %c3_i32 : i32 to index
    %c0_60 = arith.constant 0 : index
    %c0_61 = arith.constant 0 : index
    %150 = vector.load %arg0[%149, %c0_60, %c0_61] : memref<8x4x64xf32, #tpu.memory_space<vmem>>, vector<1x4x64xf32>
    %151 = vector.shape_cast %150 : vector<1x4x64xf32> to vector<4x64xf32>
    %cst_62 = arith.constant dense<0.000000e+00> : vector<4x64xf32>
    %152 = tpu.matmul %148, %1, %cst_62 {dimension_numbers = #tpu.dot_dimension_numbers<[1], [0], [0], [1], [0, 0, 1, 1], [], []>} : vector<4x64xbf16>, vector<64x64xbf16>, vector<4x64xf32> -> vector<4x64xf32>
    %153 = arith.addf %151, %152 : vector<4x64xf32>
    %154 = arith.index_cast %c3_i32 : i32 to index
    %c0_63 = arith.constant 0 : index
    %c0_64 = arith.constant 0 : index
    %155 = vector.load %arg1[%154, %c0_63, %c0_64] : memref<8x4x64xf32, #tpu.memory_space<vmem>>, vector<1x4x64xf32>
    %156 = vector.shape_cast %155 : vector<1x4x64xf32> to vector<4x64xf32>
    %cst_65 = arith.constant dense<0.000000e+00> : vector<4x64xf32>
    %157 = tpu.matmul %148, %3, %cst_65 {dimension_numbers = #tpu.dot_dimension_numbers<[1], [0], [0], [1], [0, 0, 1, 1], [], []>} : vector<4x64xbf16>, vector<64x64xbf16>, vector<4x64xf32> -> vector<4x64xf32>
    %158 = arith.addf %156, %157 : vector<4x64xf32>
    %159 = arith.index_cast %c3_i32 : i32 to index
    %c0_66 = arith.constant 0 : index
    %c0_67 = arith.constant 0 : index
    %160 = vector.load %arg2[%159, %c0_66, %c0_67] : memref<8x4x64xf32, #tpu.memory_space<vmem>>, vector<1x4x64xf32>
    %161 = vector.shape_cast %160 : vector<1x4x64xf32> to vector<4x64xf32>
    %cst_68 = arith.constant dense<0.000000e+00> : vector<4x64xf32>
    %162 = tpu.matmul %148, %5, %cst_68 {dimension_numbers = #tpu.dot_dimension_numbers<[1], [0], [0], [1], [0, 0, 1, 1], [], []>} : vector<4x64xbf16>, vector<64x64xbf16>, vector<4x64xf32> -> vector<4x64xf32>
    %163 = arith.addf %161, %162 : vector<4x64xf32>
    %164 = arith.index_cast %c3_i32 : i32 to index
    %c0_69 = arith.constant 0 : index
    %c0_70 = arith.constant 0 : index
    %165 = vector.load %arg3[%164, %c0_69, %c0_70] : memref<8x4x64xf32, #tpu.memory_space<vmem>>, vector<1x4x64xf32>
    %166 = vector.shape_cast %165 : vector<1x4x64xf32> to vector<4x64xf32>
    %cst_71 = arith.constant dense<0.000000e+00> : vector<4x64xf32>
    %167 = tpu.matmul %148, %7, %cst_71 {dimension_numbers = #tpu.dot_dimension_numbers<[1], [0], [0], [1], [0, 0, 1, 1], [], []>} : vector<4x64xbf16>, vector<64x64xbf16>, vector<4x64xf32> -> vector<4x64xf32>
    %168 = arith.addf %166, %167 : vector<4x64xf32>
    %169 = arith.negf %158 : vector<4x64xf32>
    %170 = math.exp %169 : vector<4x64xf32>
    %cst_72 = arith.constant 1.000000e+00 : f32
    %171 = vector.broadcast %cst_72 : f32 to vector<4x64xf32>
    %172 = arith.addf %171, %170 : vector<4x64xf32>
    %173 = arith.divf %171, %172 : vector<4x64xf32>
    %174 = arith.mulf %173, %136 : vector<4x64xf32>
    %175 = arith.negf %153 : vector<4x64xf32>
    %176 = math.exp %175 : vector<4x64xf32>
    %cst_73 = arith.constant 1.000000e+00 : f32
    %177 = vector.broadcast %cst_73 : f32 to vector<4x64xf32>
    %178 = arith.addf %177, %176 : vector<4x64xf32>
    %179 = arith.divf %177, %178 : vector<4x64xf32>
    %180 = math.tanh %163 : vector<4x64xf32>
    %181 = arith.mulf %179, %180 : vector<4x64xf32>
    %182 = arith.addf %174, %181 : vector<4x64xf32>
    %183 = arith.negf %168 : vector<4x64xf32>
    %184 = math.exp %183 : vector<4x64xf32>
    %cst_74 = arith.constant 1.000000e+00 : f32
    %185 = vector.broadcast %cst_74 : f32 to vector<4x64xf32>
    %186 = arith.addf %185, %184 : vector<4x64xf32>
    %187 = arith.divf %185, %186 : vector<4x64xf32>
    %188 = math.tanh %182 : vector<4x64xf32>
    %189 = arith.mulf %187, %188 : vector<4x64xf32>
    %190 = arith.index_cast %c3_i32 : i32 to index
    %c0_75 = arith.constant 0 : index
    %c0_76 = arith.constant 0 : index
    %191 = vector.load %arg5[%190, %c0_75, %c0_76] : memref<8x4x64xf32, #tpu.memory_space<vmem>>, vector<1x4x64xf32>
    %192 = vector.shape_cast %191 : vector<1x4x64xf32> to vector<4x64xf32>
    %193 = vector.shape_cast %189 : vector<4x64xf32> to vector<1x4x64xf32>
    tpu.vector_store %arg5[%190, %c0_75, %c0_76], %193 {strides = array<i32>} : memref<8x4x64xf32, #tpu.memory_space<vmem>>, vector<1x4x64xf32>,
    %c4_i32 = arith.constant 4 : i32
    %194 = arith.truncf %189 : vector<4x64xf32> to vector<4x64xbf16>
    %195 = arith.index_cast %c4_i32 : i32 to index
    %c0_77 = arith.constant 0 : index
    %c0_78 = arith.constant 0 : index
    %196 = vector.load %arg0[%195, %c0_77, %c0_78] : memref<8x4x64xf32, #tpu.memory_space<vmem>>, vector<1x4x64xf32>
    %197 = vector.shape_cast %196 : vector<1x4x64xf32> to vector<4x64xf32>
    %cst_79 = arith.constant dense<0.000000e+00> : vector<4x64xf32>
    %198 = tpu.matmul %194, %1, %cst_79 {dimension_numbers = #tpu.dot_dimension_numbers<[1], [0], [0], [1], [0, 0, 1, 1], [], []>} : vector<4x64xbf16>, vector<64x64xbf16>, vector<4x64xf32> -> vector<4x64xf32>
    %199 = arith.addf %197, %198 : vector<4x64xf32>
    %200 = arith.index_cast %c4_i32 : i32 to index
    %c0_80 = arith.constant 0 : index
    %c0_81 = arith.constant 0 : index
    %201 = vector.load %arg1[%200, %c0_80, %c0_81] : memref<8x4x64xf32, #tpu.memory_space<vmem>>, vector<1x4x64xf32>
    %202 = vector.shape_cast %201 : vector<1x4x64xf32> to vector<4x64xf32>
    %cst_82 = arith.constant dense<0.000000e+00> : vector<4x64xf32>
    %203 = tpu.matmul %194, %3, %cst_82 {dimension_numbers = #tpu.dot_dimension_numbers<[1], [0], [0], [1], [0, 0, 1, 1], [], []>} : vector<4x64xbf16>, vector<64x64xbf16>, vector<4x64xf32> -> vector<4x64xf32>
    %204 = arith.addf %202, %203 : vector<4x64xf32>
    %205 = arith.index_cast %c4_i32 : i32 to index
    %c0_83 = arith.constant 0 : index
    %c0_84 = arith.constant 0 : index
    %206 = vector.load %arg2[%205, %c0_83, %c0_84] : memref<8x4x64xf32, #tpu.memory_space<vmem>>, vector<1x4x64xf32>
    %207 = vector.shape_cast %206 : vector<1x4x64xf32> to vector<4x64xf32>
    %cst_85 = arith.constant dense<0.000000e+00> : vector<4x64xf32>
    %208 = tpu.matmul %194, %5, %cst_85 {dimension_numbers = #tpu.dot_dimension_numbers<[1], [0], [0], [1], [0, 0, 1, 1], [], []>} : vector<4x64xbf16>, vector<64x64xbf16>, vector<4x64xf32> -> vector<4x64xf32>
    %209 = arith.addf %207, %208 : vector<4x64xf32>
    %210 = arith.index_cast %c4_i32 : i32 to index
    %c0_86 = arith.constant 0 : index
    %c0_87 = arith.constant 0 : index
    %211 = vector.load %arg3[%210, %c0_86, %c0_87] : memref<8x4x64xf32, #tpu.memory_space<vmem>>, vector<1x4x64xf32>
    %212 = vector.shape_cast %211 : vector<1x4x64xf32> to vector<4x64xf32>
    %cst_88 = arith.constant dense<0.000000e+00> : vector<4x64xf32>
    %213 = tpu.matmul %194, %7, %cst_88 {dimension_numbers = #tpu.dot_dimension_numbers<[1], [0], [0], [1], [0, 0, 1, 1], [], []>} : vector<4x64xbf16>, vector<64x64xbf16>, vector<4x64xf32> -> vector<4x64xf32>
    %214 = arith.addf %212, %213 : vector<4x64xf32>
    %215 = arith.negf %204 : vector<4x64xf32>
    %216 = math.exp %215 : vector<4x64xf32>
    %cst_89 = arith.constant 1.000000e+00 : f32
    %217 = vector.broadcast %cst_89 : f32 to vector<4x64xf32>
    %218 = arith.addf %217, %216 : vector<4x64xf32>
    %219 = arith.divf %217, %218 : vector<4x64xf32>
    %220 = arith.mulf %219, %182 : vector<4x64xf32>
    %221 = arith.negf %199 : vector<4x64xf32>
    %222 = math.exp %221 : vector<4x64xf32>
    %cst_90 = arith.constant 1.000000e+00 : f32
    %223 = vector.broadcast %cst_90 : f32 to vector<4x64xf32>
    %224 = arith.addf %223, %222 : vector<4x64xf32>
    %225 = arith.divf %223, %224 : vector<4x64xf32>
    %226 = math.tanh %209 : vector<4x64xf32>
    %227 = arith.mulf %225, %226 : vector<4x64xf32>
    %228 = arith.addf %220, %227 : vector<4x64xf32>
    %229 = arith.negf %214 : vector<4x64xf32>
    %230 = math.exp %229 : vector<4x64xf32>
    %cst_91 = arith.constant 1.000000e+00 : f32
    %231 = vector.broadcast %cst_91 : f32 to vector<4x64xf32>
    %232 = arith.addf %231, %230 : vector<4x64xf32>
    %233 = arith.divf %231, %232 : vector<4x64xf32>
    %234 = math.tanh %228 : vector<4x64xf32>
    %235 = arith.mulf %233, %234 : vector<4x64xf32>
    %236 = arith.index_cast %c4_i32 : i32 to index
    %c0_92 = arith.constant 0 : index
    %c0_93 = arith.constant 0 : index
    %237 = vector.load %arg5[%236, %c0_92, %c0_93] : memref<8x4x64xf32, #tpu.memory_space<vmem>>, vector<1x4x64xf32>
    %238 = vector.shape_cast %237 : vector<1x4x64xf32> to vector<4x64xf32>
    %239 = vector.shape_cast %235 : vector<4x64xf32> to vector<1x4x64xf32>
    tpu.vector_store %arg5[%236, %c0_92, %c0_93], %239 {strides = array<i32>} : memref<8x4x64xf32, #tpu.memory_space<vmem>>, vector<1x4x64xf32>,
    %c5_i32 = arith.constant 5 : i32
    %240 = arith.truncf %235 : vector<4x64xf32> to vector<4x64xbf16>
    %241 = arith.index_cast %c5_i32 : i32 to index
    %c0_94 = arith.constant 0 : index
    %c0_95 = arith.constant 0 : index
    %242 = vector.load %arg0[%241, %c0_94, %c0_95] : memref<8x4x64xf32, #tpu.memory_space<vmem>>, vector<1x4x64xf32>
    %243 = vector.shape_cast %242 : vector<1x4x64xf32> to vector<4x64xf32>
    %cst_96 = arith.constant dense<0.000000e+00> : vector<4x64xf32>
    %244 = tpu.matmul %240, %1, %cst_96 {dimension_numbers = #tpu.dot_dimension_numbers<[1], [0], [0], [1], [0, 0, 1, 1], [], []>} : vector<4x64xbf16>, vector<64x64xbf16>, vector<4x64xf32> -> vector<4x64xf32>
    %245 = arith.addf %243, %244 : vector<4x64xf32>
    %246 = arith.index_cast %c5_i32 : i32 to index
    %c0_97 = arith.constant 0 : index
    %c0_98 = arith.constant 0 : index
    %247 = vector.load %arg1[%246, %c0_97, %c0_98] : memref<8x4x64xf32, #tpu.memory_space<vmem>>, vector<1x4x64xf32>
    %248 = vector.shape_cast %247 : vector<1x4x64xf32> to vector<4x64xf32>
    %cst_99 = arith.constant dense<0.000000e+00> : vector<4x64xf32>
    %249 = tpu.matmul %240, %3, %cst_99 {dimension_numbers = #tpu.dot_dimension_numbers<[1], [0], [0], [1], [0, 0, 1, 1], [], []>} : vector<4x64xbf16>, vector<64x64xbf16>, vector<4x64xf32> -> vector<4x64xf32>
    %250 = arith.addf %248, %249 : vector<4x64xf32>
    %251 = arith.index_cast %c5_i32 : i32 to index
    %c0_100 = arith.constant 0 : index
    %c0_101 = arith.constant 0 : index
    %252 = vector.load %arg2[%251, %c0_100, %c0_101] : memref<8x4x64xf32, #tpu.memory_space<vmem>>, vector<1x4x64xf32>
    %253 = vector.shape_cast %252 : vector<1x4x64xf32> to vector<4x64xf32>
    %cst_102 = arith.constant dense<0.000000e+00> : vector<4x64xf32>
    %254 = tpu.matmul %240, %5, %cst_102 {dimension_numbers = #tpu.dot_dimension_numbers<[1], [0], [0], [1], [0, 0, 1, 1], [], []>} : vector<4x64xbf16>, vector<64x64xbf16>, vector<4x64xf32> -> vector<4x64xf32>
    %255 = arith.addf %253, %254 : vector<4x64xf32>
    %256 = arith.index_cast %c5_i32 : i32 to index
    %c0_103 = arith.constant 0 : index
    %c0_104 = arith.constant 0 : index
    %257 = vector.load %arg3[%256, %c0_103, %c0_104] : memref<8x4x64xf32, #tpu.memory_space<vmem>>, vector<1x4x64xf32>
    %258 = vector.shape_cast %257 : vector<1x4x64xf32> to vector<4x64xf32>
    %cst_105 = arith.constant dense<0.000000e+00> : vector<4x64xf32>
    %259 = tpu.matmul %240, %7, %cst_105 {dimension_numbers = #tpu.dot_dimension_numbers<[1], [0], [0], [1], [0, 0, 1, 1], [], []>} : vector<4x64xbf16>, vector<64x64xbf16>, vector<4x64xf32> -> vector<4x64xf32>
    %260 = arith.addf %258, %259 : vector<4x64xf32>
    %261 = arith.negf %250 : vector<4x64xf32>
    %262 = math.exp %261 : vector<4x64xf32>
    %cst_106 = arith.constant 1.000000e+00 : f32
    %263 = vector.broadcast %cst_106 : f32 to vector<4x64xf32>
    %264 = arith.addf %263, %262 : vector<4x64xf32>
    %265 = arith.divf %263, %264 : vector<4x64xf32>
    %266 = arith.mulf %265, %228 : vector<4x64xf32>
    %267 = arith.negf %245 : vector<4x64xf32>
    %268 = math.exp %267 : vector<4x64xf32>
    %cst_107 = arith.constant 1.000000e+00 : f32
    %269 = vector.broadcast %cst_107 : f32 to vector<4x64xf32>
    %270 = arith.addf %269, %268 : vector<4x64xf32>
    %271 = arith.divf %269, %270 : vector<4x64xf32>
    %272 = math.tanh %255 : vector<4x64xf32>
    %273 = arith.mulf %271, %272 : vector<4x64xf32>
    %274 = arith.addf %266, %273 : vector<4x64xf32>
    %275 = arith.negf %260 : vector<4x64xf32>
    %276 = math.exp %275 : vector<4x64xf32>
    %cst_108 = arith.constant 1.000000e+00 : f32
    %277 = vector.broadcast %cst_108 : f32 to vector<4x64xf32>
    %278 = arith.addf %277, %276 : vector<4x64xf32>
    %279 = arith.divf %277, %278 : vector<4x64xf32>
    %280 = math.tanh %274 : vector<4x64xf32>
    %281 = arith.mulf %279, %280 : vector<4x64xf32>
    %282 = arith.index_cast %c5_i32 : i32 to index
    %c0_109 = arith.constant 0 : index
    %c0_110 = arith.constant 0 : index
    %283 = vector.load %arg5[%282, %c0_109, %c0_110] : memref<8x4x64xf32, #tpu.memory_space<vmem>>, vector<1x4x64xf32>
    %284 = vector.shape_cast %283 : vector<1x4x64xf32> to vector<4x64xf32>
    %285 = vector.shape_cast %281 : vector<4x64xf32> to vector<1x4x64xf32>
    tpu.vector_store %arg5[%282, %c0_109, %c0_110], %285 {strides = array<i32>} : memref<8x4x64xf32, #tpu.memory_space<vmem>>, vector<1x4x64xf32>,
    %c6_i32 = arith.constant 6 : i32
    %286 = arith.truncf %281 : vector<4x64xf32> to vector<4x64xbf16>
    %287 = arith.index_cast %c6_i32 : i32 to index
    %c0_111 = arith.constant 0 : index
    %c0_112 = arith.constant 0 : index
    %288 = vector.load %arg0[%287, %c0_111, %c0_112] : memref<8x4x64xf32, #tpu.memory_space<vmem>>, vector<1x4x64xf32>
    %289 = vector.shape_cast %288 : vector<1x4x64xf32> to vector<4x64xf32>
    %cst_113 = arith.constant dense<0.000000e+00> : vector<4x64xf32>
    %290 = tpu.matmul %286, %1, %cst_113 {dimension_numbers = #tpu.dot_dimension_numbers<[1], [0], [0], [1], [0, 0, 1, 1], [], []>} : vector<4x64xbf16>, vector<64x64xbf16>, vector<4x64xf32> -> vector<4x64xf32>
    %291 = arith.addf %289, %290 : vector<4x64xf32>
    %292 = arith.index_cast %c6_i32 : i32 to index
    %c0_114 = arith.constant 0 : index
    %c0_115 = arith.constant 0 : index
    %293 = vector.load %arg1[%292, %c0_114, %c0_115] : memref<8x4x64xf32, #tpu.memory_space<vmem>>, vector<1x4x64xf32>
    %294 = vector.shape_cast %293 : vector<1x4x64xf32> to vector<4x64xf32>
    %cst_116 = arith.constant dense<0.000000e+00> : vector<4x64xf32>
    %295 = tpu.matmul %286, %3, %cst_116 {dimension_numbers = #tpu.dot_dimension_numbers<[1], [0], [0], [1], [0, 0, 1, 1], [], []>} : vector<4x64xbf16>, vector<64x64xbf16>, vector<4x64xf32> -> vector<4x64xf32>
    %296 = arith.addf %294, %295 : vector<4x64xf32>
    %297 = arith.index_cast %c6_i32 : i32 to index
    %c0_117 = arith.constant 0 : index
    %c0_118 = arith.constant 0 : index
    %298 = vector.load %arg2[%297, %c0_117, %c0_118] : memref<8x4x64xf32, #tpu.memory_space<vmem>>, vector<1x4x64xf32>
    %299 = vector.shape_cast %298 : vector<1x4x64xf32> to vector<4x64xf32>
    %cst_119 = arith.constant dense<0.000000e+00> : vector<4x64xf32>
    %300 = tpu.matmul %286, %5, %cst_119 {dimension_numbers = #tpu.dot_dimension_numbers<[1], [0], [0], [1], [0, 0, 1, 1], [], []>} : vector<4x64xbf16>, vector<64x64xbf16>, vector<4x64xf32> -> vector<4x64xf32>
    %301 = arith.addf %299, %300 : vector<4x64xf32>
    %302 = arith.index_cast %c6_i32 : i32 to index
    %c0_120 = arith.constant 0 : index
    %c0_121 = arith.constant 0 : index
    %303 = vector.load %arg3[%302, %c0_120, %c0_121] : memref<8x4x64xf32, #tpu.memory_space<vmem>>, vector<1x4x64xf32>
    %304 = vector.shape_cast %303 : vector<1x4x64xf32> to vector<4x64xf32>
    %cst_122 = arith.constant dense<0.000000e+00> : vector<4x64xf32>
    %305 = tpu.matmul %286, %7, %cst_122 {dimension_numbers = #tpu.dot_dimension_numbers<[1], [0], [0], [1], [0, 0, 1, 1], [], []>} : vector<4x64xbf16>, vector<64x64xbf16>, vector<4x64xf32> -> vector<4x64xf32>
    %306 = arith.addf %304, %305 : vector<4x64xf32>
    %307 = arith.negf %296 : vector<4x64xf32>
    %308 = math.exp %307 : vector<4x64xf32>
    %cst_123 = arith.constant 1.000000e+00 : f32
    %309 = vector.broadcast %cst_123 : f32 to vector<4x64xf32>
    %310 = arith.addf %309, %308 : vector<4x64xf32>
    %311 = arith.divf %309, %310 : vector<4x64xf32>
    %312 = arith.mulf %311, %274 : vector<4x64xf32>
    %313 = arith.negf %291 : vector<4x64xf32>
    %314 = math.exp %313 : vector<4x64xf32>
    %cst_124 = arith.constant 1.000000e+00 : f32
    %315 = vector.broadcast %cst_124 : f32 to vector<4x64xf32>
    %316 = arith.addf %315, %314 : vector<4x64xf32>
    %317 = arith.divf %315, %316 : vector<4x64xf32>
    %318 = math.tanh %301 : vector<4x64xf32>
    %319 = arith.mulf %317, %318 : vector<4x64xf32>
    %320 = arith.addf %312, %319 : vector<4x64xf32>
    %321 = arith.negf %306 : vector<4x64xf32>
    %322 = math.exp %321 : vector<4x64xf32>
    %cst_125 = arith.constant 1.000000e+00 : f32
    %323 = vector.broadcast %cst_125 : f32 to vector<4x64xf32>
    %324 = arith.addf %323, %322 : vector<4x64xf32>
    %325 = arith.divf %323, %324 : vector<4x64xf32>
    %326 = math.tanh %320 : vector<4x64xf32>
    %327 = arith.mulf %325, %326 : vector<4x64xf32>
    %328 = arith.index_cast %c6_i32 : i32 to index
    %c0_126 = arith.constant 0 : index
    %c0_127 = arith.constant 0 : index
    %329 = vector.load %arg5[%328, %c0_126, %c0_127] : memref<8x4x64xf32, #tpu.memory_space<vmem>>, vector<1x4x64xf32>
    %330 = vector.shape_cast %329 : vector<1x4x64xf32> to vector<4x64xf32>
    %331 = vector.shape_cast %327 : vector<4x64xf32> to vector<1x4x64xf32>
    tpu.vector_store %arg5[%328, %c0_126, %c0_127], %331 {strides = array<i32>} : memref<8x4x64xf32, #tpu.memory_space<vmem>>, vector<1x4x64xf32>,
    %c7_i32 = arith.constant 7 : i32
    %332 = arith.truncf %327 : vector<4x64xf32> to vector<4x64xbf16>
    %333 = arith.index_cast %c7_i32 : i32 to index
    %c0_128 = arith.constant 0 : index
    %c0_129 = arith.constant 0 : index
    %334 = vector.load %arg0[%333, %c0_128, %c0_129] : memref<8x4x64xf32, #tpu.memory_space<vmem>>, vector<1x4x64xf32>
    %335 = vector.shape_cast %334 : vector<1x4x64xf32> to vector<4x64xf32>
    %cst_130 = arith.constant dense<0.000000e+00> : vector<4x64xf32>
    %336 = tpu.matmul %332, %1, %cst_130 {dimension_numbers = #tpu.dot_dimension_numbers<[1], [0], [0], [1], [0, 0, 1, 1], [], []>} : vector<4x64xbf16>, vector<64x64xbf16>, vector<4x64xf32> -> vector<4x64xf32>
    %337 = arith.addf %335, %336 : vector<4x64xf32>
    %338 = arith.index_cast %c7_i32 : i32 to index
    %c0_131 = arith.constant 0 : index
    %c0_132 = arith.constant 0 : index
    %339 = vector.load %arg1[%338, %c0_131, %c0_132] : memref<8x4x64xf32, #tpu.memory_space<vmem>>, vector<1x4x64xf32>
    %340 = vector.shape_cast %339 : vector<1x4x64xf32> to vector<4x64xf32>
    %cst_133 = arith.constant dense<0.000000e+00> : vector<4x64xf32>
    %341 = tpu.matmul %332, %3, %cst_133 {dimension_numbers = #tpu.dot_dimension_numbers<[1], [0], [0], [1], [0, 0, 1, 1], [], []>} : vector<4x64xbf16>, vector<64x64xbf16>, vector<4x64xf32> -> vector<4x64xf32>
    %342 = arith.addf %340, %341 : vector<4x64xf32>
    %343 = arith.index_cast %c7_i32 : i32 to index
    %c0_134 = arith.constant 0 : index
    %c0_135 = arith.constant 0 : index
    %344 = vector.load %arg2[%343, %c0_134, %c0_135] : memref<8x4x64xf32, #tpu.memory_space<vmem>>, vector<1x4x64xf32>
    %345 = vector.shape_cast %344 : vector<1x4x64xf32> to vector<4x64xf32>
    %cst_136 = arith.constant dense<0.000000e+00> : vector<4x64xf32>
    %346 = tpu.matmul %332, %5, %cst_136 {dimension_numbers = #tpu.dot_dimension_numbers<[1], [0], [0], [1], [0, 0, 1, 1], [], []>} : vector<4x64xbf16>, vector<64x64xbf16>, vector<4x64xf32> -> vector<4x64xf32>
    %347 = arith.addf %345, %346 : vector<4x64xf32>
    %348 = arith.index_cast %c7_i32 : i32 to index
    %c0_137 = arith.constant 0 : index
    %c0_138 = arith.constant 0 : index
    %349 = vector.load %arg3[%348, %c0_137, %c0_138] : memref<8x4x64xf32, #tpu.memory_space<vmem>>, vector<1x4x64xf32>
    %350 = vector.shape_cast %349 : vector<1x4x64xf32> to vector<4x64xf32>
    %cst_139 = arith.constant dense<0.000000e+00> : vector<4x64xf32>
    %351 = tpu.matmul %332, %7, %cst_139 {dimension_numbers = #tpu.dot_dimension_numbers<[1], [0], [0], [1], [0, 0, 1, 1], [], []>} : vector<4x64xbf16>, vector<64x64xbf16>, vector<4x64xf32> -> vector<4x64xf32>
    %352 = arith.addf %350, %351 : vector<4x64xf32>
    %353 = arith.negf %342 : vector<4x64xf32>
    %354 = math.exp %353 : vector<4x64xf32>
    %cst_140 = arith.constant 1.000000e+00 : f32
    %355 = vector.broadcast %cst_140 : f32 to vector<4x64xf32>
    %356 = arith.addf %355, %354 : vector<4x64xf32>
    %357 = arith.divf %355, %356 : vector<4x64xf32>
    %358 = arith.mulf %357, %320 : vector<4x64xf32>
    %359 = arith.negf %337 : vector<4x64xf32>
    %360 = math.exp %359 : vector<4x64xf32>
    %cst_141 = arith.constant 1.000000e+00 : f32
    %361 = vector.broadcast %cst_141 : f32 to vector<4x64xf32>
    %362 = arith.addf %361, %360 : vector<4x64xf32>
    %363 = arith.divf %361, %362 : vector<4x64xf32>
    %364 = math.tanh %347 : vector<4x64xf32>
    %365 = arith.mulf %363, %364 : vector<4x64xf32>
    %366 = arith.addf %358, %365 : vector<4x64xf32>
    %367 = arith.negf %352 : vector<4x64xf32>
    %368 = math.exp %367 : vector<4x64xf32>
    %cst_142 = arith.constant 1.000000e+00 : f32
    %369 = vector.broadcast %cst_142 : f32 to vector<4x64xf32>
    %370 = arith.addf %369, %368 : vector<4x64xf32>
    %371 = arith.divf %369, %370 : vector<4x64xf32>
    %372 = math.tanh %366 : vector<4x64xf32>
    %373 = arith.mulf %371, %372 : vector<4x64xf32>
    %374 = arith.index_cast %c7_i32 : i32 to index
    %c0_143 = arith.constant 0 : index
    %c0_144 = arith.constant 0 : index
    %375 = vector.load %arg5[%374, %c0_143, %c0_144] : memref<8x4x64xf32, #tpu.memory_space<vmem>>, vector<1x4x64xf32>
    %376 = vector.shape_cast %375 : vector<1x4x64xf32> to vector<4x64xf32>
    %377 = vector.shape_cast %373 : vector<4x64xf32> to vector<1x4x64xf32>
    tpu.vector_store %arg5[%374, %c0_143, %c0_144], %377 {strides = array<i32>} : memref<8x4x64xf32, #tpu.memory_space<vmem>>, vector<1x4x64xf32>,
    %c8_i32 = arith.constant 8 : i32
    return
  }
}

module attributes {stable_mosaic.version = 11 : i64} {
  func.func @_attention_kernel(%arg0: memref<2x8x64xf32, #tpu.memory_space<vmem>>, %arg1: memref<2x8x64xf32, #tpu.memory_space<vmem>>, %arg2: memref<2x8x1xf32, #tpu.memory_space<vmem>>, %arg3: memref<2x1x8xf32, #tpu.memory_space<vmem>>, %arg4: memref<2x8x64xf32, #tpu.memory_space<vmem>>, %arg5: memref<2x8x64xf32, #tpu.memory_space<vmem>>) attributes {dimension_semantics = [], scalar_prefetch = 0 : i64, scratch_operands = 0 : i64, tpu.core_type = #tpu.core_type<tc>} {
    %c0 = arith.constant 0 : index
    %c0_0 = arith.constant 0 : index
    %c0_1 = arith.constant 0 : index
    %0 = vector.load %arg0[%c0, %c0_0, %c0_1] : memref<2x8x64xf32, #tpu.memory_space<vmem>>, vector<2x8x64xf32>
    %1 = arith.truncf %0 : vector<2x8x64xf32> to vector<2x8x64xbf16>
    %c0_2 = arith.constant 0 : index
    %c0_3 = arith.constant 0 : index
    %c0_4 = arith.constant 0 : index
    %2 = vector.load %arg1[%c0_2, %c0_3, %c0_4] : memref<2x8x64xf32, #tpu.memory_space<vmem>>, vector<2x8x64xf32>
    %3 = arith.truncf %2 : vector<2x8x64xf32> to vector<2x8x64xbf16>
    %c0_5 = arith.constant 0 : index
    %c0_6 = arith.constant 0 : index
    %c0_7 = arith.constant 0 : index
    %4 = vector.load %arg2[%c0_5, %c0_6, %c0_7] : memref<2x8x1xf32, #tpu.memory_space<vmem>>, vector<2x8x1xf32>
    %c0_8 = arith.constant 0 : index
    %c0_9 = arith.constant 0 : index
    %c0_10 = arith.constant 0 : index
    %5 = vector.load %arg3[%c0_8, %c0_9, %c0_10] : memref<2x1x8xf32, #tpu.memory_space<vmem>>, vector<2x1x8xf32>
    %cst = arith.constant dense<0.000000e+00> : vector<2x8x8xf32>
    %6 = tpu.matmul %1, %3, %cst {dimension_numbers = #tpu.dot_dimension_numbers<[2], [2], [1], [1], [0, 0, 0, 1, 1, 1], [0], [0]>} : vector<2x8x64xbf16>, vector<2x8x64xbf16>, vector<2x8x8xf32> -> vector<2x8x8xf32>
    %cst_11 = arith.constant 2.000000e+00 : f32
    %7 = vector.broadcast %cst_11 : f32 to vector<2x8x8xf32>
    %8 = arith.mulf %7, %6 : vector<2x8x8xf32>
    %9 = vector.broadcast %5 : vector<2x1x8xf32> to vector<2x8x8xf32>
    %10 = arith.addf %8, %9 : vector<2x8x8xf32>
    %cst_12 = arith.constant dense<0xFF800000> : vector<2x8xf32>
    %11 = vector.multi_reduction <maximumf>, %10, %cst_12 [2] : vector<2x8x8xf32> to vector<2x8xf32>
    %cst_13 = arith.constant 0xFF800000 : f32
    %12 = vector.broadcast %cst_13 : f32 to vector<2x8xf32>
    %13 = arith.maximumf %12, %11 : vector<2x8xf32>
    %14 = vector.shape_cast %13 : vector<2x8xf32> to vector<2x8x1xf32>
    %15 = vector.broadcast %14 : vector<2x8x1xf32> to vector<2x8x8xf32>
    %16 = arith.subf %10, %15 : vector<2x8x8xf32>
    %17 = math.exp %16 : vector<2x8x8xf32>
    %cst_14 = arith.constant dense<0.000000e+00> : vector<2x8xf32>
    %18 = vector.multi_reduction <add>, %17, %cst_14 [2] : vector<2x8x8xf32> to vector<2x8xf32>
    %19 = vector.shape_cast %18 : vector<2x8xf32> to vector<2x8x1xf32>
    %20 = vector.broadcast %19 : vector<2x8x1xf32> to vector<2x8x8xf32>
    %21 = arith.divf %17, %20 : vector<2x8x8xf32>
    %22 = vector.broadcast %4 : vector<2x8x1xf32> to vector<2x8x8xf32>
    %23 = arith.addf %6, %22 : vector<2x8x8xf32>
    %cst_15 = arith.constant dense<0xFF800000> : vector<2x8xf32>
    %24 = vector.multi_reduction <maximumf>, %23, %cst_15 [1] : vector<2x8x8xf32> to vector<2x8xf32>
    %cst_16 = arith.constant 0xFF800000 : f32
    %25 = vector.broadcast %cst_16 : f32 to vector<2x8xf32>
    %26 = arith.maximumf %25, %24 : vector<2x8xf32>
    %27 = vector.shape_cast %26 : vector<2x8xf32> to vector<2x1x8xf32>
    %28 = vector.broadcast %27 : vector<2x1x8xf32> to vector<2x8x8xf32>
    %29 = arith.subf %23, %28 : vector<2x8x8xf32>
    %30 = math.exp %29 : vector<2x8x8xf32>
    %cst_17 = arith.constant dense<0.000000e+00> : vector<2x8xf32>
    %31 = vector.multi_reduction <add>, %30, %cst_17 [1] : vector<2x8x8xf32> to vector<2x8xf32>
    %32 = vector.shape_cast %31 : vector<2x8xf32> to vector<2x1x8xf32>
    %33 = vector.broadcast %32 : vector<2x1x8xf32> to vector<2x8x8xf32>
    %34 = arith.divf %30, %33 : vector<2x8x8xf32>
    %35 = arith.truncf %21 : vector<2x8x8xf32> to vector<2x8x8xbf16>
    %cst_18 = arith.constant dense<0.000000e+00> : vector<2x8x64xf32>
    %36 = tpu.matmul %35, %3, %cst_18 {dimension_numbers = #tpu.dot_dimension_numbers<[2], [1], [1], [2], [0, 0, 0, 1, 1, 2], [0], [0]>} : vector<2x8x8xbf16>, vector<2x8x64xbf16>, vector<2x8x64xf32> -> vector<2x8x64xf32>
    %c0_19 = arith.constant 0 : index
    %c0_20 = arith.constant 0 : index
    %c0_21 = arith.constant 0 : index
    %37 = vector.load %arg4[%c0_19, %c0_20, %c0_21] : memref<2x8x64xf32, #tpu.memory_space<vmem>>, vector<2x8x64xf32>
    tpu.vector_store %arg4[%c0_19, %c0_20, %c0_21], %36 {strides = array<i32>} : memref<2x8x64xf32, #tpu.memory_space<vmem>>, vector<2x8x64xf32>,
    %38 = arith.truncf %34 : vector<2x8x8xf32> to vector<2x8x8xbf16>
    %cst_22 = arith.constant dense<0.000000e+00> : vector<2x8x64xf32>
    %39 = tpu.matmul %38, %1, %cst_22 {dimension_numbers = #tpu.dot_dimension_numbers<[1], [1], [2], [2], [0, 0, 0, 2, 1, 2], [0], [0]>} : vector<2x8x8xbf16>, vector<2x8x64xbf16>, vector<2x8x64xf32> -> vector<2x8x64xf32>
    %c0_23 = arith.constant 0 : index
    %c0_24 = arith.constant 0 : index
    %c0_25 = arith.constant 0 : index
    %40 = vector.load %arg5[%c0_23, %c0_24, %c0_25] : memref<2x8x64xf32, #tpu.memory_space<vmem>>, vector<2x8x64xf32>
    tpu.vector_store %arg5[%c0_23, %c0_24, %c0_25], %39 {strides = array<i32>} : memref<2x8x64xf32, #tpu.memory_space<vmem>>, vector<2x8x64xf32>,
    return
  }
}

module attributes {stable_mosaic.version = 11 : i64} {
  func.func @_combine_proj_kernel(%arg0: i32, %arg1: memref<32x64xf32, #tpu.memory_space<vmem>>, %arg2: memref<32x64xf32, #tpu.memory_space<vmem>>, %arg3: memref<64x256xbf16, #tpu.memory_space<vmem>>, %arg4: memref<64x256xbf16, #tpu.memory_space<vmem>>, %arg5: memref<64x256xbf16, #tpu.memory_space<vmem>>, %arg6: memref<1x256xf32, #tpu.memory_space<vmem>>, %arg7: memref<32x256xf32, #tpu.memory_space<vmem>>) attributes {dimension_semantics = [#tpu.dimension_semantics<parallel>], iteration_bounds = array<i64: 1>, scalar_prefetch = 0 : i64, scratch_operands = 0 : i64, tpu.core_type = #tpu.core_type<tc>, window_params = [{transform_indices = @transform_0, window_bounds = array<i64: 32, 64>}, {transform_indices = @transform_1, window_bounds = array<i64: 32, 64>}, {pipeline_mode = #tpu.pipeline_mode<synchronous>, transform_indices = @transform_2, window_bounds = array<i64: 64, 256>}, {pipeline_mode = #tpu.pipeline_mode<synchronous>, transform_indices = @transform_3, window_bounds = array<i64: 64, 256>}, {pipeline_mode = #tpu.pipeline_mode<synchronous>, transform_indices = @transform_4, window_bounds = array<i64: 64, 256>}, {pipeline_mode = #tpu.pipeline_mode<synchronous>, transform_indices = @transform_5, window_bounds = array<i64: 1, 256>}, {transform_indices = @transform_6, window_bounds = array<i64: 32, 256>}]} {
    %c0 = arith.constant 0 : index
    %c0_0 = arith.constant 0 : index
    %0 = vector.load %arg1[%c0, %c0_0] : memref<32x64xf32, #tpu.memory_space<vmem>>, vector<32x64xf32>
    %c0_1 = arith.constant 0 : index
    %c0_2 = arith.constant 0 : index
    %1 = vector.load %arg2[%c0_1, %c0_2] : memref<32x64xf32, #tpu.memory_space<vmem>>, vector<32x64xf32>
    %2 = arith.truncf %0 : vector<32x64xf32> to vector<32x64xbf16>
    %3 = arith.truncf %1 : vector<32x64xf32> to vector<32x64xbf16>
    %4 = arith.mulf %0, %1 : vector<32x64xf32>
    %5 = arith.truncf %4 : vector<32x64xf32> to vector<32x64xbf16>
    %c0_3 = arith.constant 0 : index
    %c0_4 = arith.constant 0 : index
    %6 = vector.load %arg3[%c0_3, %c0_4] : memref<64x256xbf16, #tpu.memory_space<vmem>>, vector<64x256xbf16>
    %cst = arith.constant dense<0.000000e+00> : vector<32x256xf32>
    %7 = tpu.matmul %2, %6, %cst {dimension_numbers = #tpu.dot_dimension_numbers<[1], [0], [0], [1], [0, 0, 1, 1], [], []>} : vector<32x64xbf16>, vector<64x256xbf16>, vector<32x256xf32> -> vector<32x256xf32>
    %c0_5 = arith.constant 0 : index
    %c0_6 = arith.constant 0 : index
    %8 = vector.load %arg4[%c0_5, %c0_6] : memref<64x256xbf16, #tpu.memory_space<vmem>>, vector<64x256xbf16>
    %cst_7 = arith.constant dense<0.000000e+00> : vector<32x256xf32>
    %9 = tpu.matmul %3, %8, %cst_7 {dimension_numbers = #tpu.dot_dimension_numbers<[1], [0], [0], [1], [0, 0, 1, 1], [], []>} : vector<32x64xbf16>, vector<64x256xbf16>, vector<32x256xf32> -> vector<32x256xf32>
    %10 = arith.addf %7, %9 : vector<32x256xf32>
    %c0_8 = arith.constant 0 : index
    %c0_9 = arith.constant 0 : index
    %11 = vector.load %arg5[%c0_8, %c0_9] : memref<64x256xbf16, #tpu.memory_space<vmem>>, vector<64x256xbf16>
    %cst_10 = arith.constant dense<0.000000e+00> : vector<32x256xf32>
    %12 = tpu.matmul %5, %11, %cst_10 {dimension_numbers = #tpu.dot_dimension_numbers<[1], [0], [0], [1], [0, 0, 1, 1], [], []>} : vector<32x64xbf16>, vector<64x256xbf16>, vector<32x256xf32> -> vector<32x256xf32>
    %13 = arith.addf %10, %12 : vector<32x256xf32>
    %c0_11 = arith.constant 0 : index
    %c0_12 = arith.constant 0 : index
    %14 = vector.load %arg6[%c0_11, %c0_12] : memref<1x256xf32, #tpu.memory_space<vmem>>, vector<1x256xf32>
    %15 = vector.broadcast %14 : vector<1x256xf32> to vector<32x256xf32>
    %16 = arith.addf %13, %15 : vector<32x256xf32>
    %c0_13 = arith.constant 0 : index
    %c0_14 = arith.constant 0 : index
    %17 = vector.load %arg7[%c0_13, %c0_14] : memref<32x256xf32, #tpu.memory_space<vmem>>, vector<32x256xf32>
    tpu.vector_store %arg7[%c0_13, %c0_14], %16 {strides = array<i32>} : memref<32x256xf32, #tpu.memory_space<vmem>>, vector<32x256xf32>,
    return
  }
  func.func @transform_0(%arg0: i32) -> (i32, i32) {
    %c0_i32 = arith.constant 0 : i32
    %c0_i32_0 = arith.constant 0 : i32
    return %arg0, %c0_i32 : i32, i32
  }
  func.func @transform_1(%arg0: i32) -> (i32, i32) {
    %c0_i32 = arith.constant 0 : i32
    %c0_i32_0 = arith.constant 0 : i32
    return %arg0, %c0_i32 : i32, i32
  }
  func.func @transform_2(%arg0: i32) -> (i32, i32) {
    %c0_i32 = arith.constant 0 : i32
    %c0_i32_0 = arith.constant 0 : i32
    %c0_i32_1 = arith.constant 0 : i32
    return %c0_i32, %c0_i32_0 : i32, i32
  }
  func.func @transform_3(%arg0: i32) -> (i32, i32) {
    %c0_i32 = arith.constant 0 : i32
    %c0_i32_0 = arith.constant 0 : i32
    %c0_i32_1 = arith.constant 0 : i32
    return %c0_i32, %c0_i32_0 : i32, i32
  }
  func.func @transform_4(%arg0: i32) -> (i32, i32) {
    %c0_i32 = arith.constant 0 : i32
    %c0_i32_0 = arith.constant 0 : i32
    %c0_i32_1 = arith.constant 0 : i32
    return %c0_i32, %c0_i32_0 : i32, i32
  }
  func.func @transform_5(%arg0: i32) -> (i32, i32) {
    %c0_i32 = arith.constant 0 : i32
    %c0_i32_0 = arith.constant 0 : i32
    %c0_i32_1 = arith.constant 0 : i32
    return %c0_i32, %c0_i32_0 : i32, i32
  }
  func.func @transform_6(%arg0: i32) -> (i32, i32) {
    %c0_i32 = arith.constant 0 : i32
    %c0_i32_0 = arith.constant 0 : i32
    return %arg0, %c0_i32 : i32, i32
  }
}

module attributes {stable_mosaic.version = 11 : i64} {
  func.func @_pool_mlp_kernel(%arg0: memref<2x8x64xf32, #tpu.memory_space<vmem>>, %arg1: memref<2x8x64xf32, #tpu.memory_space<vmem>>, %arg2: memref<256x32xbf16, #tpu.memory_space<vmem>>, %arg3: memref<1x32xf32, #tpu.memory_space<vmem>>, %arg4: memref<32x32xbf16, #tpu.memory_space<vmem>>, %arg5: memref<1x32xf32, #tpu.memory_space<vmem>>, %arg6: memref<32x3xbf16, #tpu.memory_space<vmem>>, %arg7: memref<1x3xf32, #tpu.memory_space<vmem>>, %arg8: memref<2x3xf32, #tpu.memory_space<vmem>>) attributes {dimension_semantics = [], scalar_prefetch = 0 : i64, scratch_operands = 0 : i64, tpu.core_type = #tpu.core_type<tc>} {
    %c0 = arith.constant 0 : index
    %c0_0 = arith.constant 0 : index
    %c0_1 = arith.constant 0 : index
    %0 = vector.load %arg0[%c0, %c0_0, %c0_1] : memref<2x8x64xf32, #tpu.memory_space<vmem>>, vector<2x8x64xf32>
    %cst = arith.constant dense<0.000000e+00> : vector<2x64xf32>
    %1 = vector.multi_reduction <add>, %0, %cst [1] : vector<2x8x64xf32> to vector<2x64xf32>
    %cst_2 = arith.constant 8.000000e+00 : f32
    %2 = vector.broadcast %cst_2 : f32 to vector<2x64xf32>
    %3 = arith.divf %1, %2 : vector<2x64xf32>
    %cst_3 = arith.constant dense<0xFF800000> : vector<2x64xf32>
    %4 = vector.multi_reduction <maximumf>, %0, %cst_3 [1] : vector<2x8x64xf32> to vector<2x64xf32>
    %5 = tpu.concatenate %3, %4 in 1 : vector<2x64xf32>, vector<2x64xf32> -> vector<2x128xf32>
    %c0_4 = arith.constant 0 : index
    %c0_5 = arith.constant 0 : index
    %c0_6 = arith.constant 0 : index
    %6 = vector.load %arg1[%c0_4, %c0_5, %c0_6] : memref<2x8x64xf32, #tpu.memory_space<vmem>>, vector<2x8x64xf32>
    %cst_7 = arith.constant dense<0.000000e+00> : vector<2x64xf32>
    %7 = vector.multi_reduction <add>, %6, %cst_7 [1] : vector<2x8x64xf32> to vector<2x64xf32>
    %cst_8 = arith.constant 8.000000e+00 : f32
    %8 = vector.broadcast %cst_8 : f32 to vector<2x64xf32>
    %9 = arith.divf %7, %8 : vector<2x64xf32>
    %cst_9 = arith.constant dense<0xFF800000> : vector<2x64xf32>
    %10 = vector.multi_reduction <maximumf>, %6, %cst_9 [1] : vector<2x8x64xf32> to vector<2x64xf32>
    %11 = tpu.concatenate %9, %10 in 1 : vector<2x64xf32>, vector<2x64xf32> -> vector<2x128xf32>
    %12 = tpu.concatenate %5, %11 in 1 : vector<2x128xf32>, vector<2x128xf32> -> vector<2x256xf32>
    %13 = arith.truncf %12 : vector<2x256xf32> to vector<2x256xbf16>
    %c0_10 = arith.constant 0 : index
    %c0_11 = arith.constant 0 : index
    %14 = vector.load %arg2[%c0_10, %c0_11] : memref<256x32xbf16, #tpu.memory_space<vmem>>, vector<256x32xbf16>
    %cst_12 = arith.constant dense<0.000000e+00> : vector<2x32xf32>
    %15 = tpu.matmul %13, %14, %cst_12 {dimension_numbers = #tpu.dot_dimension_numbers<[1], [0], [0], [1], [0, 0, 1, 1], [], []>} : vector<2x256xbf16>, vector<256x32xbf16>, vector<2x32xf32> -> vector<2x32xf32>
    %c0_13 = arith.constant 0 : index
    %c0_14 = arith.constant 0 : index
    %16 = vector.load %arg3[%c0_13, %c0_14] : memref<1x32xf32, #tpu.memory_space<vmem>>, vector<1x32xf32>
    %17 = vector.broadcast %16 : vector<1x32xf32> to vector<2x32xf32>
    %18 = arith.addf %15, %17 : vector<2x32xf32>
    %cst_15 = arith.constant 0.000000e+00 : f32
    %19 = vector.broadcast %cst_15 : f32 to vector<2x32xf32>
    %20 = arith.maximumf %18, %19 : vector<2x32xf32>
    %21 = arith.truncf %20 : vector<2x32xf32> to vector<2x32xbf16>
    %c0_16 = arith.constant 0 : index
    %c0_17 = arith.constant 0 : index
    %22 = vector.load %arg4[%c0_16, %c0_17] : memref<32x32xbf16, #tpu.memory_space<vmem>>, vector<32x32xbf16>
    %cst_18 = arith.constant dense<0.000000e+00> : vector<2x32xf32>
    %23 = tpu.matmul %21, %22, %cst_18 {dimension_numbers = #tpu.dot_dimension_numbers<[1], [0], [0], [1], [0, 0, 1, 1], [], []>} : vector<2x32xbf16>, vector<32x32xbf16>, vector<2x32xf32> -> vector<2x32xf32>
    %c0_19 = arith.constant 0 : index
    %c0_20 = arith.constant 0 : index
    %24 = vector.load %arg5[%c0_19, %c0_20] : memref<1x32xf32, #tpu.memory_space<vmem>>, vector<1x32xf32>
    %25 = vector.broadcast %24 : vector<1x32xf32> to vector<2x32xf32>
    %26 = arith.addf %23, %25 : vector<2x32xf32>
    %cst_21 = arith.constant 0.000000e+00 : f32
    %27 = vector.broadcast %cst_21 : f32 to vector<2x32xf32>
    %28 = arith.maximumf %26, %27 : vector<2x32xf32>
    %29 = arith.truncf %28 : vector<2x32xf32> to vector<2x32xbf16>
    %c0_22 = arith.constant 0 : index
    %c0_23 = arith.constant 0 : index
    %30 = vector.load %arg6[%c0_22, %c0_23] : memref<32x3xbf16, #tpu.memory_space<vmem>>, vector<32x3xbf16>
    %cst_24 = arith.constant dense<0.000000e+00> : vector<2x3xf32>
    %31 = tpu.matmul %29, %30, %cst_24 {dimension_numbers = #tpu.dot_dimension_numbers<[1], [0], [0], [1], [0, 0, 1, 1], [], []>} : vector<2x32xbf16>, vector<32x3xbf16>, vector<2x3xf32> -> vector<2x3xf32>
    %c0_25 = arith.constant 0 : index
    %c0_26 = arith.constant 0 : index
    %32 = vector.load %arg7[%c0_25, %c0_26] : memref<1x3xf32, #tpu.memory_space<vmem>>, vector<1x3xf32>
    %33 = vector.broadcast %32 : vector<1x3xf32> to vector<2x3xf32>
    %34 = arith.addf %31, %33 : vector<2x3xf32>
    %c0_27 = arith.constant 0 : index
    %c0_28 = arith.constant 0 : index
    %35 = vector.load %arg8[%c0_27, %c0_28] : memref<2x3xf32, #tpu.memory_space<vmem>>, vector<2x3xf32>
    tpu.vector_store %arg8[%c0_27, %c0_28], %34 {strides = array<i32>} : memref<2x3xf32, #tpu.memory_space<vmem>>, vector<2x3xf32>,
    return
  }
}

</mosaic_0001>

<bundles_post_ra>
// kernel: esim_forward.6
= control target key start
LH: loop header
LB: loop body
LE: loop exit
PB: predicated region body
PF: predicated region fallthrough
CT: control target
= control target key end

     0   :  { %v146_v1 = vmov 0   ;;  %vm57_vm0 = vcmask 261120   ;;  %v27_v11 = vlaneseq  ;;  %s218_s1 = inlined_call_operand.vmem [shape: bf16[32,256], index: 1, kind: input, shape index: {}]   ;;  %s219_s0 = inlined_call_operand.vmem [shape: f32[32,32], index: 0, kind: input, shape index: {}]   ;;  %s220_s2 = inlined_call_operand.vmem [shape: f32[1,256], index: 2, kind: input, shape index: {}]   ;;  %s221_s3 = inlined_call_operand.vmem [shape: f32[32,256], index: 3, kind: output, shape index: {}]  }
   0x1   :  { %v140_v0 = vld [vmem:[%s218_s1 + $0x4] ss:$8 sps:$4 sm:$0xff]   ;;  %96 = vmatprep.mubr.bf16.mxu0 %v146_v1  ;;  %106 = vmatprep.mubr.bf16.mxu1 %v146_v1  ;;  %v142_v2 = vld [vmem:[%s218_s1] ss:$8 sps:$4 sm:$0xff]   ;;  %v143_v3 = vld [vmem:[%s218_s1 + $0x14] ss:$8 sps:$4 sm:$0xff]  }
   0x2   :  { %64 = vmatprep.subr.bf16.mxu0 %v140_v0  ;;  %135 = vmatprep.subr.bf16.mxu1 %v140_v0  ;;  %v145_v4 = vld [vmem:[%s218_s1 + $0x10] ss:$8 sps:$4 sm:$0xff]   ;;  %v15_v5 = vld [vmem:[%s219_s0] sm:$0xff]  ;;  %v16_v6 = vld [vmem:[%s219_s0 + $0x8] sm:$0xff]  ;;  %v28_v12 = vshrl.u32 %v27_v11, 7 }
   0x3   :  { %65 = vmatpush1.bf16.msra.mxu0 %v142_v2  ;;  %137 = vmatpush1.bf16.msra.mxu1 %v142_v2  ;;  %v17_v7 = vld [vmem:[%s219_s0 + $0x10] sm:$0xff]  ;;  %v18_v8 = vld [vmem:[%s219_s0 + $0x18] sm:$0xff]  ;;  %v19_v9 = vpack.c.bf16 %v16_v6, %v15_v5  ;;  %v25_v14 = vld [vmem:[%s220_s2] sm:$0x3] }
   0x4   :  { %66 = vmatprep.subr.bf16.mxu0 %v143_v3  ;;  %136 = vmatprep.subr.bf16.mxu1 %v143_v3  ;;  %v20_v10 = vpack.c.bf16 %v18_v8, %v17_v7  ;;  %v29_v13 = vsub.s32 0, %v28_v12  ;;  %v33_v15 = vsub.s32 1, %v28_v12 }
   0x6   :  { %v30_v16 = vrot.slane %v25_v14, %v29_v13  ;;  %v34_v17 = vrot.slane %v25_v14, %v33_v15 }
   0x7   :  { %67 = vmatpush1.bf16.msra.mxu0 %v145_v4  ;;  %138 = vmatpush1.bf16.msra.mxu1 %v145_v4 }
   0xa   :  { %133 = vmatmul.mubr.msk.bf16.vlgmr.msra.gmra.mrb[0].mxu0 %vm57_vm0, %v19_v9  ;;  %134 = vmatmul.mubr.msk.bf16.vlgmr.msra.gmra.mrb[0].mxu1 %vm57_vm0, %v20_v10 }
  0xdd   :  { %v98_v18 = vpop.f32.mrb[0].mxu0  ;;  %v108_v19 = vpop.f32.mrb[0].mxu1 }
  0xde   :  { %v99_v20 = vadd.f32 %v98_v18, %v30_v16  ;;  %v109_v21 = vadd.f32 %v108_v19, %v30_v16  ;;  %v100_v22 = vpop.f32.mrb[1].mxu0  ;;  %v110_v23 = vpop.f32.mrb[1].mxu1 }
  0xdf   :  { %v101_v24 = vadd.f32 %v100_v22, %v34_v17  ;;  %v111_v25 = vadd.f32 %v110_v23, %v34_v17  ;;  %v102_v26 = vpop.f32.mrb[2].mxu0  ;;  %v112_v27 = vpop.f32.mrb[2].mxu1 }
  0xe0   :  { %117 = vst [vmem:[%s221_s3] sm:$0xff] %v99_v20  ;;  %121 = vst [vmem:[%s221_s3 + $0x20] sm:$0xff] %v109_v21  ;;  %v103_v28 = vadd.f32 %v102_v26, %v30_v16  ;;  %v113_v29 = vadd.f32 %v112_v27, %v30_v16  ;;  %v104_v30 = vpop.f32.mrb[3].mxu0  ;;  %v114_v31 = vpop.f32.mrb[3].mxu1 }
  0xe1   :  { %118 = vst [vmem:[%s221_s3 + $0x8] sm:$0xff] %v101_v24  ;;  %122 = vst [vmem:[%s221_s3 + $0x28] sm:$0xff] %v111_v25  ;;  %v105_v32 = vadd.f32 %v104_v30, %v34_v17  ;;  %v115_v33 = vadd.f32 %v114_v31, %v34_v17 }
  0xe2   :  { %119 = vst [vmem:[%s221_s3 + $0x10] sm:$0xff] %v103_v28  ;;  %123 = vst [vmem:[%s221_s3 + $0x30] sm:$0xff] %v113_v29 }
  0xe3   :  { %120 = vst [vmem:[%s221_s3 + $0x18] sm:$0xff] %v105_v32  ;;  %124 = vst [vmem:[%s221_s3 + $0x38] sm:$0xff] %v115_v33 }

// kernel: esim_forward.8
= control target key start
LH: loop header
LB: loop body
LE: loop exit
PB: predicated region body
PF: predicated region fallthrough
CT: control target
= control target key end

     0   :  { %v520_v0 = vmov 0.0   ;;  %vm32_vm0 = vcmask 523264   ;;  %vm521_vm1 = vmmov 0   ;;  %v522_v6 = vmov 0   ;;  %s649_s1 = inlined_call_operand.vmem [shape: f32[2,8,64], index: 1, kind: input, shape index: {}]   ;;  %s650_s2 = inlined_call_operand.vmem [shape: f32[2,8,1], index: 2, kind: input, shape index: {}]   ;;  %s651_s0 = inlined_call_operand.vmem [shape: f32[2,8,64], index: 0, kind: input, shape index: {}]   ;;  %s652_s3 = inlined_call_operand.vmem [shape: f32[2,1,8], index: 3, kind: input, shape index: {}]   ;;  %s653_s4 = inlined_call_operand.vmem [shape: f32[2,8,64], index: 4, kind: output, shape index: {0}]   ;;  %s654_s5 = inlined_call_operand.vmem [shape: f32[2,8,64], index: 5, kind: output, shape index: {1}]  }
   0x1   :  { %463 = vmatprep.subr.bf16.mxu0 %v520_v0  ;;  %469 = vmatprep.subr.bf16.mxu1 %v520_v0  ;;  %v24_v1 = vld [vmem:[%s649_s1] sm:$0xff]  ;;  %v25_v2 = vld [vmem:[%s649_s1 + $0x8] sm:$0xff]  ;;  %vm141_vm2 = vcmask 64512   ;;  %vm219_vm3 = vcmask 1043456  }
   0x2   :  { %v561_v3 = vpack.c.bf16 %v24_v1, %v24_v1  ;;  %v563_v4 = vpack.c.bf16 %v25_v2, %v25_v2  ;;  %465 = vmatprep.mubr.msk.bf16.mxu0 %vm521_vm1, %v520_v0  ;;  %471 = vmatprep.mubr.msk.bf16.mxu1 %vm521_vm1, %v520_v0  ;;  %v28_v5 = vld [vmem:[%s650_s2] sm:$0xff]  ;;  %v21_v10 = vld [vmem:[%s651_s0 + $0x8] sm:$0xff] }
   0x3   :  { %502 = vset.pattern.permute.xlu1 %v522_v6  ;;  %v20_v9 = vld [vmem:[%s651_s0] sm:$0xff]  ;;  %v29_v11 = vld [vmem:[%s650_s2 + $0x8] sm:$0xff]  ;;  %v590_v13 = vpack.c.bf16 %v21_v10, %v21_v10 }
   0x4   :  { %v37_v7 = vsel %vm32_vm0, %v561_v3, 0  ;;  %v83_v8 = vsel %vm32_vm0, %v563_v4, 0  ;;  %166 = vperm.xlu1 %502, %v28_v5   ;;  %v588_v12 = vpack.c.bf16 %v20_v9, %v20_v9  ;;  %v445_v16 = vld [vmem:[%s652_s3] ss:$0 sm:$0xff]  ;;  %v446_v17 = vld [vmem:[%s652_s3 + $0x1] ss:$0 sm:$0xff] }
   0x5   :  { %464 = vmatpush3.bf16.xpose.msra.mxu0 %v37_v7  ;;  %470 = vmatpush3.bf16.xpose.msra.mxu1 %v83_v8 }
   0x6   :  { %475 = vmatprep.subr.bf16.mxu0 %v520_v0  ;;  %481 = vmatprep.subr.bf16.mxu1 %v520_v0 }
   0x8   :  { %171 = vperm.xlu1 %502, %v29_v11  }
   0xc   :  { %466 = vmatmul.mubr.msk.bf16.vlgmr.msra.gmra.mrb[0].mxu0 %vm32_vm0, %v588_v12  ;;  %472 = vmatmul.mubr.msk.bf16.vlgmr.msra.gmra.mrb[0].mxu1 %vm32_vm0, %v590_v13 }
   0xd   :  { %477 = vmatprep.mubr.msk.bf16.mxu0 %vm521_vm1, %v520_v0  ;;  %483 = vmatprep.mubr.msk.bf16.mxu1 %vm521_vm1, %v520_v0 }
  0x83   :  { %v167_v30 = vpop.permute.xlu1 %166 }
  0x87   :  { %v172_v32 = vpop.permute.xlu1 %171 }
  0xdf   :  { %v73_v14 = vpop.f32.mrb[0].mxu0  ;;  %v119_v15 = vpop.f32.mrb[0].mxu1 }
  0xe0   :  { %v125_v18 = vmul.f32 2.0, %v73_v14  ;;  %v126_v19 = vmul.f32 2.0, %v119_v15  ;;  %v467_v20 = vpop.f32.mrb[1].mxu0  ;;  %v473_v21 = vpop.f32.mrb[1].mxu1  ;;  %v174_v31 = vadd.f32 %v167_v30, %v73_v14  ;;  %v175_v34 = vadd.f32 %v172_v32, %v119_v15 }
  0xe1   :  { %v76_v22 = vpop.f32.mrb[2].mxu0  ;;  %v122_v23 = vpop.f32.mrb[2].mxu1  ;;  %v220_v20 = vsel %vm219_vm3, %v561_v3, 0  ;;  %v265_v21 = vsel %vm219_vm3, %v563_v4, 0 }
  0xe2   :  { %v468_v24 = vpop.f32.mrb[3].mxu0  ;;  %v474_v25 = vpop.f32.mrb[3].mxu1  ;;  %v139_v26 = vadd.f32 %v445_v16, %v125_v18  ;;  %v140_v27 = vadd.f32 %v446_v17, %v126_v19  ;;  %v176_v33 = vsel %vm141_vm2, %v174_v31, -inf  ;;  %v183_v36 = vsel %vm141_vm2, %v175_v34, -inf  ;;  %476 = vmatpush3.bf16.msra.mxu0 %v220_v20  ;;  %482 = vmatpush3.bf16.msra.mxu1 %v265_v21 }
  0xe3   :  { %v177_v35 = vrot.slane %v176_v33, 4  ;;  %v184_v38 = vrot.slane %v183_v36, 4  ;;  %487 = vmatprep.subr.bf16.mxu0 %v520_v0  ;;  %493 = vmatprep.subr.bf16.mxu1 %v520_v0 }
  0xe4   :  { %v142_v28 = vsel %vm141_vm2, %v139_v26, -inf  ;;  %v145_v29 = vsel %vm141_vm2, %v140_v27, -inf }
  0xe5   :  { %143 = vmax.xlane.f32.xlu0 %v142_v28  ;;  %v178_v37 = vmax.f32 %v176_v33, %v177_v35  ;;  %v185_v40 = vmax.f32 %v183_v36, %v184_v38 }
  0xe7   :  { %v179_v39 = vrot.slane %v178_v37, 2  ;;  %v186_v42 = vrot.slane %v185_v40, 2 }
  0xe9   :  { %146 = vmax.xlane.f32.xlu0 %v145_v29  ;;  %v180_v41 = vmax.f32 %v178_v37, %v179_v39  ;;  %v187_v44 = vmax.f32 %v185_v40, %v186_v42 }
  0xeb   :  { %v181_v43 = vrot.slane %v180_v41, 1  ;;  %v188_v46 = vrot.slane %v187_v44, 1 }
  0xed   :  { %v182_v45 = vmax.f32 %v180_v41, %v181_v43  ;;  %v189_v48 = vmax.f32 %v187_v44, %v188_v46 }
  0xef   :  { %v190_v47 = vsub.f32 %v174_v31, %v182_v45  ;;  %v191_v50 = vsub.f32 %v175_v34, %v189_v48  ;;  %v330_v31 = vsel %vm219_vm3, %v588_v12, 0 }
  0xf1   :  { %v192_v49 = vmul.f32 1.442695, %v190_v47  ;;  %v194_v53 = vmul.f32 1.442695, %v191_v50 }
  0xf3   :  { %504 = vpow2.f32 %v192_v49 }
  0xfd   :  { %v505_v58 = vpop.eup %504 }
  0xfe   :  { %v196_v60 = vsel %vm141_vm2, %v505_v58, 0.0 }
  0xff   :  { %v197_v1 = vrot.slane %v196_v60, 4 }
 0x101   :  { %v198_v7 = vadd.f32 %v197_v1, %v196_v60 }
 0x103   :  { %v199_v10 = vrot.slane %v198_v7, 2 }
 0x105   :  { %v200_v14 = vadd.f32 %v199_v10, %v198_v7 }
 0x107   :  { %v201_v15 = vrot.slane %v200_v14, 1 }
 0x109   :  { %v202_v17 = vadd.f32 %v201_v15, %v200_v14 }
 0x172   :  { %v144_v51 = vpop.xlane.xlu0 %143 }
 0x173   :  { %v148_v52 = vsub.f32 %v139_v26, %v144_v51 }
 0x175   :  { %v150_v54 = vmul.f32 1.442695, %v148_v52 }
 0x176   :  { %v147_v55 = vpop.xlane.xlu0 %146 }
 0x177   :  { %506 = vpow2.f32 %v150_v54  ;;  %v149_v56 = vsub.f32 %v140_v27, %v147_v55 }
 0x178   :  { %508 = vpow2.f32 %v194_v53 }
 0x179   :  { %v152_v57 = vmul.f32 1.442695, %v149_v56 }
 0x17b   :  { %510 = vpow2.f32 %v152_v57 }
 0x17c   :  { %512 = vrcp.f32 %v202_v17 }
 0x181   :  { %v507_v59 = vpop.eup %506 }
 0x182   :  { %v154_v61 = vsel %vm141_vm2, %v507_v59, 0.0  ;;  %v509_v62 = vpop.eup %508 }
 0x183   :  { %155 = vadd.xlane.f32.xlu0 %v154_v61  ;;  %v203_v2 = vsel %vm141_vm2, %v509_v62, 0.0 }
 0x184   :  { %v204_v8 = vrot.slane %v203_v2, 4 }
 0x185   :  { %v511_v63 = vpop.eup %510 }
 0x186   :  { %v157_v5 = vsel %vm141_vm2, %v511_v63, 0.0  ;;  %v205_v9 = vadd.f32 %v204_v8, %v203_v2  ;;  %v513_v22 = vpop.eup %512 }
 0x187   :  { %158 = vadd.xlane.f32.xlu1 %v157_v5  ;;  %v211_v23 = vmul.f32 %v513_v22, %v505_v58 }
 0x188   :  { %v206_v11 = vrot.slane %v205_v9, 2 }
 0x189   :  { %v309_v25 = vpack.c.bf16 %v211_v23, %v211_v23 }
 0x18a   :  { %v207_v16 = vadd.f32 %v206_v11, %v205_v9 }
 0x18c   :  { %v208_v18 = vrot.slane %v207_v16, 1 }
 0x18e   :  { %v209_v19 = vadd.f32 %v208_v18, %v207_v16 }
 0x190   :  { %514 = vrcp.f32 %v209_v19 }
 0x19a   :  { %v515_v24 = vpop.eup %514 }
 0x19b   :  { %v213_v26 = vmul.f32 %v515_v24, %v509_v62 }
 0x19d   :  { %v310_v27 = vpack.c.bf16 %v213_v26, %v213_v26 }
 0x1b0   :  { %311 = vxpose.xlu0.c.b16.start.end [1/1] (short) (narrow) %v309_v25, 16 }
 0x1b4   :  { %372 = vxpose.xlu1.c.b16.start.end [1/1] (short) (narrow) %v310_v27, 16 }
 0x1b9   :  { %503 = vset.pattern.permute.xlu0 %v522_v6  ;;  %v391_v6 = vsel %vm219_vm3, %v590_v13, 0 }
 0x210   :  { %v156_v3 = vpop.xlane.xlu0 %155 }
 0x211   :  { %516 = vrcp.f32 %v156_v3 }
 0x214   :  { %v159_v28 = vpop.xlane.xlu1 %158 }
 0x215   :  { %518 = vrcp.f32 %v159_v28 }
 0x216   :  { %v319_v35 = vpop.trf.xlu0 }
 0x21a   :  { %v380_v12 = vpop.trf.xlu1 }
 0x21b   :  { %v517_v29 = vpop.eup %516 }
 0x21c   :  { %v161_v4 = vmul.f32 %v517_v29, %v507_v59 }
 0x21e   :  { %v214_v30 = vpack.c.bf16 %v161_v4, %v161_v4 }
 0x21f   :  { %v519_v32 = vpop.eup %518 }
 0x220   :  { %v163_v33 = vmul.f32 %v519_v32, %v511_v63  ;;  %478 = vmatmul.mubr.msk.bf16.vlgmr.msra.gmra.mrb[4].mxu0 %vm141_vm2, %v214_v30 }
 0x221   :  { %488 = vmatpush3.bf16.msra.mxu0 %v330_v31  ;;  %489 = vmatprep.mubr.msk.bf16.mxu0 %vm521_vm1, %v520_v0 }
 0x222   :  { %v215_v34 = vpack.c.bf16 %v163_v33, %v163_v33 }
 0x224   :  { %484 = vmatmul.mubr.msk.bf16.vlgmr.msra.gmra.mrb[4].mxu1 %vm141_vm2, %v215_v34 }
 0x225   :  { %494 = vmatpush3.bf16.msra.mxu1 %v391_v6  ;;  %495 = vmatprep.mubr.msk.bf16.mxu1 %vm521_vm1, %v520_v0 }
 0x228   :  { %490 = vmatmul.mubr.msk.bf16.vlgmr.msra.gmra.mrb[8].mxu0 %vm141_vm2, %v319_v35 }
 0x22c   :  { %496 = vmatmul.mubr.msk.bf16.vlgmr.msra.gmra.mrb[8].mxu1 %vm141_vm2, %v380_v12 }
 0x2f3   :  { %v256_v36 = vpop.f32.mrb[4].mxu0 }
 0x2f4   :  { %307 = vst.msk [vmem:[%s653_s4] sm:$0xff] %vm32_vm0, %v256_v36  ;;  %v479_v37 = vpop.f32.mrb[5].mxu0 }
 0x2f5   :  { %v259_v13 = vpop.f32.mrb[6].mxu0 }
 0x2f6   :  { %v480_v38 = vpop.f32.mrb[7].mxu0 }
 0x2f7   :  { %v301_v39 = vpop.f32.mrb[4].mxu1 }
 0x2f8   :  { %308 = vst.msk [vmem:[%s653_s4 + $0x8] sm:$0xff] %vm32_vm0, %v301_v39  ;;  %v485_v0 = vpop.f32.mrb[5].mxu1 }
 0x2f9   :  { %v304_v40 = vpop.f32.mrb[6].mxu1 }
 0x2fa   :  { %v486_v41 = vpop.f32.mrb[7].mxu1 }
 0x2fb   :  { %v366_v42 = vpop.f32.mrb[8].mxu0 }
 0x2fc   :  { %433 = vst.msk [vmem:[%s654_s5] sm:$0xff] %vm32_vm0, %v366_v42  ;;  %v491_v43 = vpop.f32.mrb[9].mxu0 }
 0x2fd   :  { %v369_v44 = vpop.f32.mrb[10].mxu0 }
 0x2fe   :  { %v492_v45 = vpop.f32.mrb[11].mxu0 }
 0x2ff   :  { %v427_v46 = vpop.f32.mrb[8].mxu1 }
 0x300   :  { %434 = vst.msk [vmem:[%s654_s5 + $0x8] sm:$0xff] %vm32_vm0, %v427_v46  ;;  %v497_v47 = vpop.f32.mrb[9].mxu1 }
 0x301   :  { %v430_v48 = vpop.f32.mrb[10].mxu1 }
 0x302   :  { %v498_v49 = vpop.f32.mrb[11].mxu1 }

// kernel: esim_forward.9
= control target key start
LH: loop header
LB: loop body
LE: loop exit
PB: predicated region body
PF: predicated region fallthrough
CT: control target
= control target key end

     0   :  { %v495_v1 = vmov 0   ;;  %vm98_vm0 = vcmask 523264   ;;  %v374_v47 = vlaneseq  ;;  %s666_s3 = inlined_call_operand.vmem [shape: bf16[64,256], index: 3, kind: input, shape index: {}]   ;;  %s667_s2 = inlined_call_operand.vmem [shape: bf16[64,256], index: 2, kind: input, shape index: {}]   ;;  %s668_s1 = inlined_call_operand.vmem [shape: f32[32,64], index: 1, kind: input, shape index: {}]   ;;  %s669_s0 = inlined_call_operand.vmem [shape: f32[32,64], index: 0, kind: input, shape index: {}]   ;;  %s670_s4 = inlined_call_operand.vmem [shape: bf16[64,256], index: 4, kind: input, shape index: {}]   ;;  %s671_s5 = inlined_call_operand.vmem [shape: f32[1,256], index: 5, kind: input, shape index: {}]   ;;  %s672_s6 = inlined_call_operand.vmem [shape: f32[32,256], index: 6, kind: output, shape index: {}]  }
   0x1   :  { %v459_v0 = vld [vmem:[%s666_s3 + $0x4] ss:$8 sps:$4 sm:$0xff]   ;;  %137 = vmatprep.mubr.bf16.mxu1 %v495_v1  ;;  %236 = vmatprep.mubr.bf16.mxu0 %v495_v1  ;;  %v463_v3 = vld [vmem:[%s666_s3] ss:$8 sps:$4 sm:$0xff]   ;;  %v465_v5 = vld [vmem:[%s666_s3 + $0x14] ss:$8 sps:$4 sm:$0xff]  }
   0x2   :  { %v461_v2 = vld [vmem:[%s667_s2 + $0x4] ss:$8 sps:$4 sm:$0xff]   ;;  %105 = vmatprep.subr.bf16.mxu1 %v459_v0  ;;  %v464_v4 = vld [vmem:[%s667_s2] ss:$8 sps:$4 sm:$0xff]   ;;  %v467_v6 = vld [vmem:[%s667_s2 + $0x14] ss:$8 sps:$4 sm:$0xff]  }
   0x3   :  { %204 = vmatprep.subr.bf16.mxu0 %v461_v2  ;;  %106 = vmatpush1.bf16.msra.mxu1 %v463_v3  ;;  %v469_v7 = vld [vmem:[%s666_s3 + $0x10] ss:$8 sps:$4 sm:$0xff]   ;;  %v471_v9 = vld [vmem:[%s666_s3 + $0x24] ss:$8 sps:$4 sm:$0xff]   ;;  %v475_v11 = vld [vmem:[%s666_s3 + $0x20] ss:$8 sps:$4 sm:$0xff]  }
   0x4   :  { %205 = vmatpush1.bf16.msra.mxu0 %v464_v4  ;;  %107 = vmatprep.subr.bf16.mxu1 %v465_v5  ;;  %v470_v8 = vld [vmem:[%s667_s2 + $0x10] ss:$8 sps:$4 sm:$0xff]   ;;  %v473_v10 = vld [vmem:[%s667_s2 + $0x24] ss:$8 sps:$4 sm:$0xff]   ;;  %v476_v12 = vld [vmem:[%s667_s2 + $0x20] ss:$8 sps:$4 sm:$0xff]  }
   0x5   :  { %206 = vmatprep.subr.bf16.mxu0 %v467_v6  ;;  %v477_v13 = vld [vmem:[%s666_s3 + $0x34] ss:$8 sps:$4 sm:$0xff]   ;;  %v481_v15 = vld [vmem:[%s666_s3 + $0x30] ss:$8 sps:$4 sm:$0xff]   ;;  %v28_v17 = vld [vmem:[%s668_s1] sm:$0xff]  ;;  %v375_v48 = vshrl.u32 %v374_v47, 7 }
   0x6   :  { %v479_v14 = vld [vmem:[%s667_s2 + $0x34] ss:$8 sps:$4 sm:$0xff]   ;;  %v482_v16 = vld [vmem:[%s667_s2 + $0x30] ss:$8 sps:$4 sm:$0xff]   ;;  %v29_v18 = vld [vmem:[%s668_s1 + $0x8] sm:$0xff] }
   0x7   :  { %108 = vmatpush1.bf16.msra.mxu1 %v469_v7  ;;  %v24_v19 = vld [vmem:[%s669_s0] sm:$0xff]  ;;  %v25_v20 = vld [vmem:[%s669_s0 + $0x8] sm:$0xff]  ;;  %v34_v22 = vpack.c.bf16 %v29_v18, %v28_v17  ;;  %v488_v25 = vld [vmem:[%s670_s4 + $0x14] ss:$8 sps:$4 sm:$0xff]   ;;  %v376_v60 = vsub.s32 0, %v375_v48  ;;  %v380_v63 = vsub.s32 1, %v375_v48 }
   0x8   :  { %207 = vmatpush1.bf16.msra.mxu0 %v470_v8  ;;  %109 = vmatprep.subr.bf16.mxu1 %v471_v9  ;;  %v485_v21 = vld [vmem:[%s670_s4 + $0x4] ss:$8 sps:$4 sm:$0xff]   ;;  %v32_v23 = vpack.c.bf16 %v25_v20, %v24_v19  ;;  %v483_v24 = vld [vmem:[%s670_s4] ss:$8 sps:$4 sm:$0xff]   ;;  %v486_v26 = vld [vmem:[%s670_s4 + $0x10] ss:$8 sps:$4 sm:$0xff]   ;;  %v36_v36 = vmul.f32 %v28_v17, %v24_v19  ;;  %v37_v37 = vmul.f32 %v29_v18, %v25_v20 }
   0x9   :  { %208 = vmatprep.subr.bf16.mxu0 %v473_v10  ;;  %v30_v27 = vld [vmem:[%s668_s1 + $0x10] sm:$0xff]  ;;  %v31_v28 = vld [vmem:[%s668_s1 + $0x18] sm:$0xff]  ;;  %v491_v31 = vld [vmem:[%s670_s4 + $0x24] ss:$8 sps:$4 sm:$0xff]  }
   0xa   :  { %v26_v29 = vld [vmem:[%s669_s0 + $0x10] sm:$0xff]  ;;  %v27_v30 = vld [vmem:[%s669_s0 + $0x18] sm:$0xff]  ;;  %v35_v32 = vpack.c.bf16 %v31_v28, %v30_v27  ;;  %v489_v34 = vld [vmem:[%s670_s4 + $0x20] ss:$8 sps:$4 sm:$0xff]   ;;  %v40_v41 = vpack.c.bf16 %v37_v37, %v36_v36 }
   0xb   :  { %110 = vmatpush1.bf16.msra.mxu1 %v475_v11  ;;  %v33_v33 = vpack.c.bf16 %v27_v30, %v26_v29  ;;  %v494_v35 = vld [vmem:[%s670_s4 + $0x34] ss:$8 sps:$4 sm:$0xff]   ;;  %v38_v38 = vmul.f32 %v30_v27, %v26_v29  ;;  %v39_v39 = vmul.f32 %v31_v28, %v27_v30  ;;  %v492_v40 = vld [vmem:[%s670_s4 + $0x30] ss:$8 sps:$4 sm:$0xff]   ;;  %v372_v62 = vld [vmem:[%s671_s5] sm:$0x3] }
   0xc   :  { %209 = vmatpush1.bf16.msra.mxu0 %v476_v12  ;;  %111 = vmatprep.subr.bf16.mxu1 %v477_v13  ;;  %v377_v0 = vrot.slane %v372_v62, %v376_v60  ;;  %v381_v3 = vrot.slane %v372_v62, %v380_v63 }
   0xd   :  { %210 = vmatprep.subr.bf16.mxu0 %v479_v14  ;;  %v41_v42 = vpack.c.bf16 %v39_v39, %v38_v38 }
   0xf   :  { %112 = vmatpush1.bf16.msra.mxu1 %v481_v15 }
  0x10   :  { %211 = vmatpush1.bf16.msra.mxu0 %v482_v16  ;;  %434 = vmatprep.subr.bf16.mxu1 %v485_v21 }
  0x11   :  { %311 = vmatprep.subr.bf16.mxu0 %v485_v21 }
  0x12   :  { %412 = vmatmul.mubr.msk.bf16.vlgmr.msra.gmra.mrb[0].mxu1 %vm98_vm0, %v34_v22 }
  0x13   :  { %422 = vmatmul.mubr.msk.bf16.vlgmr.msra.gmra.mrb[0].mxu0 %vm98_vm0, %v32_v23  ;;  %438 = vmatpush1.bf16.msra.mxu1 %v483_v24 }
  0x14   :  { %312 = vmatpush1.bf16.msra.mxu0 %v483_v24  ;;  %435 = vmatprep.subr.bf16.mxu1 %v488_v25 }
  0x15   :  { %313 = vmatprep.subr.bf16.mxu0 %v488_v25  ;;  %147 = vmatprep.mubr.bf16.mxu1 %v495_v1 }
  0x16   :  { %246 = vmatprep.mubr.bf16.mxu0 %v495_v1 }
  0x17   :  { %439 = vmatpush1.bf16.msra.mxu1 %v486_v26 }
  0x18   :  { %314 = vmatpush1.bf16.msra.mxu0 %v486_v26  ;;  %436 = vmatprep.subr.bf16.mxu1 %v491_v31 }
  0x19   :  { %315 = vmatprep.subr.bf16.mxu0 %v491_v31 }
  0x1a   :  { %413 = vmatmul.mubr.msk.bf16.gmra.mrb[4].mxu1 %vm98_vm0, %v35_v32 }
  0x1b   :  { %423 = vmatmul.mubr.msk.bf16.gmra.mrb[4].mxu0 %vm98_vm0, %v33_v33  ;;  %440 = vmatpush1.bf16.msra.mxu1 %v489_v34 }
  0x1c   :  { %316 = vmatpush1.bf16.msra.mxu0 %v489_v34  ;;  %437 = vmatprep.subr.bf16.mxu1 %v494_v35 }
  0x1d   :  { %317 = vmatprep.subr.bf16.mxu0 %v494_v35  ;;  %343 = vmatprep.mubr.bf16.mxu0 %v495_v1 }
  0x1e   :  { %353 = vmatprep.mubr.bf16.mxu1 %v495_v1 }
  0x1f   :  { %441 = vmatpush1.bf16.msra.mxu1 %v492_v40 }
  0x20   :  { %318 = vmatpush1.bf16.msra.mxu0 %v492_v40 }
  0x22   :  { %433 = vmatmul.mubr.msk.bf16.vlgmr.msra.gmra.mrb[8].mxu1 %vm98_vm0, %v41_v42 }
  0x23   :  { %432 = vmatmul.mubr.msk.bf16.vlgmr.msra.gmra.mrb[0].mxu0 %vm98_vm0, %v40_v41 }
  0xe5   :  { %v139_v43 = vpop.f32.mrb[0].mxu1 }
  0xe6   :  { %v141_v44 = vpop.f32.mrb[1].mxu1 }
  0xe7   :  { %v143_v45 = vpop.f32.mrb[2].mxu1 }
  0xe8   :  { %v145_v46 = vpop.f32.mrb[3].mxu1 }
  0xed   :  { %v149_v49 = vpop.f32.mrb[4].mxu1 }
  0xee   :  { %v248_v50 = vpop.f32.mrb[4].mxu0  ;;  %v151_v52 = vpop.f32.mrb[5].mxu1 }
  0xef   :  { %v249_v51 = vadd.f32 %v248_v50, %v149_v49  ;;  %v250_v53 = vpop.f32.mrb[5].mxu0  ;;  %v153_v55 = vpop.f32.mrb[6].mxu1 }
  0xf0   :  { %v251_v54 = vadd.f32 %v250_v53, %v151_v52  ;;  %v252_v56 = vpop.f32.mrb[6].mxu0  ;;  %v155_v58 = vpop.f32.mrb[7].mxu1 }
  0xf1   :  { %v253_v57 = vadd.f32 %v252_v56, %v153_v55  ;;  %v254_v59 = vpop.f32.mrb[7].mxu0 }
  0xf2   :  { %v255_v61 = vadd.f32 %v254_v59, %v155_v58 }
  0xf5   :  { %v355_v2 = vpop.f32.mrb[8].mxu1 }
  0xf6   :  { %v345_v1 = vpop.f32.mrb[0].mxu0  ;;  %v368_v5 = vadd.f32 %v355_v2, %v249_v51  ;;  %v357_v7 = vpop.f32.mrb[9].mxu1 }
  0xf7   :  { %v442_v4 = vadd.f32 %v345_v1, %v139_v43  ;;  %v347_v6 = vpop.f32.mrb[1].mxu0  ;;  %v369_v9 = vadd.f32 %v357_v7, %v251_v54  ;;  %v359_v11 = vpop.f32.mrb[10].mxu1 }
  0xf8   :  { %v443_v8 = vadd.f32 %v347_v6, %v141_v44  ;;  %v349_v10 = vpop.f32.mrb[2].mxu0  ;;  %v388_v13 = vadd.f32 %v377_v0, %v368_v5  ;;  %v370_v15 = vadd.f32 %v359_v11, %v253_v57  ;;  %v361_v17 = vpop.f32.mrb[11].mxu1 }
  0xf9   :  { %v384_v12 = vadd.f32 %v442_v4, %v377_v0  ;;  %v444_v14 = vadd.f32 %v349_v10, %v143_v45  ;;  %v351_v16 = vpop.f32.mrb[3].mxu0  ;;  %v389_v19 = vadd.f32 %v381_v3, %v369_v9  ;;  %v371_v21 = vadd.f32 %v361_v17, %v255_v61 }
  0xfa   :  { %v385_v18 = vadd.f32 %v443_v8, %v381_v3  ;;  %v445_v20 = vadd.f32 %v351_v16, %v145_v46  ;;  %396 = vst [vmem:[%s672_s6 + $0x20] sm:$0xff] %v388_v13  ;;  %v390_v23 = vadd.f32 %v377_v0, %v370_v15 }
  0xfb   :  { %392 = vst [vmem:[%s672_s6] sm:$0xff] %v384_v12  ;;  %v386_v22 = vadd.f32 %v444_v14, %v377_v0  ;;  %397 = vst [vmem:[%s672_s6 + $0x28] sm:$0xff] %v389_v19  ;;  %v391_v25 = vadd.f32 %v381_v3, %v371_v21 }
  0xfc   :  { %393 = vst [vmem:[%s672_s6 + $0x8] sm:$0xff] %v385_v18  ;;  %v387_v24 = vadd.f32 %v445_v20, %v381_v3  ;;  %398 = vst [vmem:[%s672_s6 + $0x30] sm:$0xff] %v390_v23 }
  0xfd   :  { %394 = vst [vmem:[%s672_s6 + $0x10] sm:$0xff] %v386_v22  ;;  %399 = vst [vmem:[%s672_s6 + $0x38] sm:$0xff] %v391_v25 }
  0xfe   :  { %395 = vst [vmem:[%s672_s6 + $0x18] sm:$0xff] %v387_v24 }

// kernel: esim_forward.7
= control target key start
LH: loop header
LB: loop body
LE: loop exit
PB: predicated region body
PF: predicated region fallthrough
CT: control target
= control target key end

     0   :  { %v2602_v0 = vmov 0.0   ;;  %vm2603_vm0 = vmmov 0   ;;  %v2604_v11 = vmov 0   ;;  %vm348_vm1 = vcmask 519168   ;;  %s3299_s4 = inlined_call_operand.vmem [shape: bf16[4,64,64], index: 4, kind: input, shape index: {}]   ;;  %s3300_s0 = inlined_call_operand.vmem [shape: f32[8,4,64], index: 0, kind: input, shape index: {}]   ;;  %s3301_s1 = inlined_call_operand.vmem [shape: f32[8,4,64], index: 1, kind: input, shape index: {}]   ;;  %s3302_s2 = inlined_call_operand.vmem [shape: f32[8,4,64], index: 2, kind: input, shape index: {}]   ;;  %s3303_s3 = inlined_call_operand.vmem [shape: f32[8,4,64], index: 3, kind: input, shape index: {}]   ;;  %s3304_s5 = inlined_call_operand.vmem [shape: f32[8,4,64], index: 5, kind: output, shape index: {}]  }
   0x1   :  { %2055 = vmatprep.subr.bf16.mxu0 %v2602_v0  ;;  %2067 = vmatprep.subr.bf16.mxu1 %v2602_v0  ;;  %v2640_v1 = vld [vmem:[%s3299_s4] sm:$0xff]   ;;  %v2655_v3 = vld [vmem:[%s3299_s4 + $0x8] sm:$0xff]   ;;  %v2669_v5 = vld [vmem:[%s3299_s4 + $0x10] sm:$0xff]   ;;  %vm81_vm2 = vcmask 523264  }
   0x2   :  { %v2645_v2 = vld [vmem:[%s3299_s4 + $0x20] sm:$0xff]   ;;  %2063 = vmatprep.mubr.msk.bf16.mxu0 %vm2603_vm0, %v2602_v0  ;;  %2075 = vmatprep.mubr.msk.bf16.mxu1 %vm2603_vm0, %v2602_v0  ;;  %v2662_v4 = vld [vmem:[%s3299_s4 + $0x28] sm:$0xff]   ;;  %v2676_v6 = vld [vmem:[%s3299_s4 + $0x30] sm:$0xff]  }
   0x3   :  { %2056 = vmatpush3.bf16.msra.mxu0 %v2640_v1  ;;  %2068 = vmatpush3.bf16.msra.mxu1 %v2645_v2  ;;  %v2683_v7 = vld [vmem:[%s3299_s4 + $0x18] sm:$0xff]   ;;  %v2697_v9 = vld [vmem:[%s3299_s4 + $0x40] sm:$0xff]   ;;  %v2711_v12 = vld [vmem:[%s3299_s4 + $0x48] sm:$0xff]  }
   0x4   :  { %2057 = vmatprep.subr.bf16.mxu0 %v2602_v0  ;;  %2069 = vmatprep.subr.bf16.mxu1 %v2602_v0  ;;  %v2690_v8 = vld [vmem:[%s3299_s4 + $0x38] sm:$0xff]   ;;  %v2704_v10 = vld [vmem:[%s3299_s4 + $0x60] sm:$0xff]   ;;  %v2718_v13 = vld [vmem:[%s3299_s4 + $0x68] sm:$0xff]  }
   0x5   :  { %v2729_v14 = vld [vmem:[%s3299_s4 + $0x50] sm:$0xff]   ;;  %v2743_v16 = vld [vmem:[%s3299_s4 + $0x58] sm:$0xff]   ;;  %v56_v18 = vld [vmem:[%s3300_s0] sm:$0xf] }
   0x6   :  { %v2736_v15 = vld [vmem:[%s3299_s4 + $0x70] sm:$0xff]   ;;  %v2750_v17 = vld [vmem:[%s3299_s4 + $0x78] sm:$0xff]   ;;  %v126_v19 = vld [vmem:[%s3301_s1] sm:$0xf] }
   0x7   :  { %2058 = vmatpush3.bf16.msra.mxu0 %v2655_v3  ;;  %2070 = vmatpush3.bf16.msra.mxu1 %v2662_v4  ;;  %v192_v32 = vld [vmem:[%s3302_s2] sm:$0xf]  ;;  %v1811_v61 = vld [vmem:[%s3300_s0 + $0x4] sm:$0xf] }
   0x8   :  { %2059 = vmatprep.subr.bf16.mxu0 %v2602_v0  ;;  %2071 = vmatprep.subr.bf16.mxu1 %v2602_v0  ;;  %v258_v34 = vld [vmem:[%s3303_s3] sm:$0xf]  ;;  %v1813_v62 = vld [vmem:[%s3301_s1 + $0x4] sm:$0xf] }
   0xb   :  { %2060 = vmatpush3.bf16.msra.mxu0 %v2669_v5  ;;  %2072 = vmatpush3.bf16.msra.mxu1 %v2676_v6 }
   0xc   :  { %2061 = vmatprep.subr.bf16.mxu0 %v2602_v0  ;;  %2073 = vmatprep.subr.bf16.mxu1 %v2602_v0 }
   0xf   :  { %2062 = vmatpush3.bf16.msra.mxu0 %v2683_v7  ;;  %2074 = vmatpush3.bf16.msra.mxu1 %v2690_v8 }
  0x10   :  { %2079 = vmatprep.subr.bf16.mxu0 %v2602_v0  ;;  %2091 = vmatprep.subr.bf16.mxu1 %v2602_v0 }
  0x12   :  { %2064 = vmatmul.mubr.bf16.vlgmr.msra.gmra.mrb[0].mxu0 %v2604_v11  ;;  %2076 = vmatmul.mubr.bf16.vlgmr.msra.gmra.mrb[0].mxu1 %v2604_v11 }
  0x13   :  { %2080 = vmatpush3.bf16.msra.mxu0 %v2697_v9  ;;  %2092 = vmatpush3.bf16.msra.mxu1 %v2704_v10 }
  0x14   :  { %2081 = vmatprep.subr.bf16.mxu0 %v2602_v0  ;;  %2093 = vmatprep.subr.bf16.mxu1 %v2602_v0 }
  0x15   :  { %2087 = vmatprep.mubr.msk.bf16.mxu0 %vm2603_vm0, %v2602_v0  ;;  %2099 = vmatprep.mubr.msk.bf16.mxu1 %vm2603_vm0, %v2602_v0 }
  0x17   :  { %2082 = vmatpush3.bf16.msra.mxu0 %v2711_v12  ;;  %2094 = vmatpush3.bf16.msra.mxu1 %v2718_v13 }
  0x18   :  { %2083 = vmatprep.subr.bf16.mxu0 %v2602_v0  ;;  %2095 = vmatprep.subr.bf16.mxu1 %v2602_v0 }
  0x1b   :  { %2084 = vmatpush3.bf16.msra.mxu0 %v2729_v14  ;;  %2096 = vmatpush3.bf16.msra.mxu1 %v2736_v15 }
  0x1c   :  { %2085 = vmatprep.subr.bf16.mxu0 %v2602_v0  ;;  %2097 = vmatprep.subr.bf16.mxu1 %v2602_v0 }
  0x1f   :  { %2086 = vmatpush3.bf16.msra.mxu0 %v2743_v16  ;;  %2098 = vmatpush3.bf16.msra.mxu1 %v2750_v17 }
  0x20   :  { %2103 = vmatprep.subr.bf16.mxu0 %v2602_v0  ;;  %2115 = vmatprep.subr.bf16.mxu1 %v2602_v0 }
  0x22   :  { %2088 = vmatmul.mubr.bf16.vlgmr.msra.gmra.mrb[4].mxu0 %v2604_v11  ;;  %2100 = vmatmul.mubr.bf16.vlgmr.msra.gmra.mrb[4].mxu1 %v2604_v11 }
  0x23   :  { %2104 = vmatpush3.bf16.msra.mxu0 %v2640_v1  ;;  %2116 = vmatpush3.bf16.msra.mxu1 %v2645_v2 }
  0x24   :  { %2105 = vmatprep.subr.bf16.mxu0 %v2602_v0  ;;  %2117 = vmatprep.subr.bf16.mxu1 %v2602_v0 }
  0x25   :  { %2111 = vmatprep.mubr.msk.bf16.mxu0 %vm2603_vm0, %v2602_v0  ;;  %2123 = vmatprep.mubr.msk.bf16.mxu1 %vm2603_vm0, %v2602_v0 }
  0x27   :  { %2106 = vmatpush3.bf16.msra.mxu0 %v2655_v3  ;;  %2118 = vmatpush3.bf16.msra.mxu1 %v2662_v4 }
  0x28   :  { %2107 = vmatprep.subr.bf16.mxu0 %v2602_v0  ;;  %2119 = vmatprep.subr.bf16.mxu1 %v2602_v0 }
  0x2b   :  { %2108 = vmatpush3.bf16.msra.mxu0 %v2669_v5  ;;  %2120 = vmatpush3.bf16.msra.mxu1 %v2676_v6 }
  0x2c   :  { %2109 = vmatprep.subr.bf16.mxu0 %v2602_v0  ;;  %2121 = vmatprep.subr.bf16.mxu1 %v2602_v0 }
  0x2f   :  { %2110 = vmatpush3.bf16.msra.mxu0 %v2683_v7  ;;  %2122 = vmatpush3.bf16.msra.mxu1 %v2690_v8 }
  0x30   :  { %2127 = vmatprep.subr.bf16.mxu0 %v2602_v0  ;;  %2139 = vmatprep.subr.bf16.mxu1 %v2602_v0 }
  0xe5   :  { %v119_v20 = vpop.f32.mrb[0].mxu0  ;;  %v185_v22 = vpop.f32.mrb[0].mxu1 }
  0xe6   :  { %v125_v21 = vadd.f32 %v119_v20, %v56_v18  ;;  %v2065_v23 = vpop.f32.mrb[1].mxu0  ;;  %v191_v24 = vadd.f32 %v185_v22, %v126_v19  ;;  %v2077_v25 = vpop.f32.mrb[1].mxu1 }
  0xe7   :  { %v122_v26 = vpop.f32.mrb[2].mxu0  ;;  %v188_v28 = vpop.f32.mrb[2].mxu1 }
  0xe8   :  { %v1809_v27 = vmul.f32 -1.442695, %v125_v21  ;;  %v2066_v29 = vpop.f32.mrb[3].mxu0  ;;  %v1808_v30 = vmul.f32 -1.442695, %v191_v24  ;;  %v2078_v31 = vpop.f32.mrb[3].mxu1 }
  0xe9   :  { %v1815_v28 = vld [vmem:[%s3302_s2 + $0x4] sm:$0xf] }
  0xea   :  { %2458 = vpow2.f32 %v1809_v27  ;;  %v1817_v29 = vld [vmem:[%s3303_s3 + $0x4] sm:$0xf] }
  0xeb   :  { %2460 = vpow2.f32 %v1808_v30 }
  0xf4   :  { %v2459_v33 = vpop.eup %2458 }
  0xf5   :  { %v2461_v35 = vpop.eup %2460  ;;  %v334_v36 = vadd.f32 1.0, %v2459_v33  ;;  %v251_v37 = vpop.f32.mrb[4].mxu0 }
  0xf6   :  { %v327_v38 = vadd.f32 1.0, %v2461_v35  ;;  %v257_v39 = vadd.f32 %v251_v37, %v192_v32  ;;  %v317_v40 = vpop.f32.mrb[4].mxu1  ;;  %v2089_v41 = vpop.f32.mrb[5].mxu0 }
  0xf7   :  { %2462 = vrcp.f32 %v334_v36  ;;  %v323_v42 = vadd.f32 %v317_v40, %v258_v34  ;;  %v2101_v43 = vpop.f32.mrb[5].mxu1  ;;  %v254_v44 = vpop.f32.mrb[6].mxu0 }
  0xf8   :  { %2464 = vrcp.f32 %v327_v38  ;;  %v320_v45 = vpop.f32.mrb[6].mxu1  ;;  %v2090_v46 = vpop.f32.mrb[7].mxu0 }
  0xf9   :  { %2466 = vtanh.f32 %v257_v39  ;;  %v1810_v47 = vmul.f32 -1.442695, %v323_v42  ;;  %v2102_v48 = vpop.f32.mrb[7].mxu1 }
  0xfb   :  { %2468 = vpow2.f32 %v1810_v47 }
 0x101   :  { %v2463_v49 = vpop.eup %2462 }
 0x102   :  { %v2465_v50 = vpop.eup %2464 }
 0x103   :  { %v2467_v51 = vpop.eup %2466  ;;  %v330_v52 = vmul.f32 0.0, %v2465_v50 }
 0x104   :  { %v338_v53 = vmul.f32 %v2467_v51, %v2463_v49 }
 0x105   :  { %v2469_v54 = vpop.eup %2468 }
 0x106   :  { %v2789_v55 = vadd.f32 %v338_v53, %v330_v52  ;;  %v343_v56 = vadd.f32 1.0, %v2469_v54 }
 0x108   :  { %2470 = vtanh.f32 %v2789_v55 }
 0x109   :  { %2472 = vrcp.f32 %v343_v56 }
 0x112   :  { %v2471_v57 = vpop.eup %2470 }
 0x113   :  { %v2473_v58 = vpop.eup %2472 }
 0x114   :  { %v347_v59 = vmul.f32 %v2473_v58, %v2471_v57  ;;  %v1825_v58 = vld [vmem:[%s3301_s1 + $0x8] sm:$0xf] }
 0x116   :  { %349 = vst.msk [vmem:[%s3304_s5] sm:$0xf] %vm348_vm1, %v347_v59  ;;  %v350_v60 = vpack.c.bf16 %v347_v59, %v347_v59 }
 0x118   :  { %2112 = vmatmul.mubr.msk.bf16.vlgmr.msra.gmra.mrb[8].mxu0 %vm81_vm2, %v350_v60  ;;  %2124 = vmatmul.mubr.msk.bf16.vlgmr.msra.gmra.mrb[8].mxu1 %vm81_vm2, %v350_v60 }
 0x119   :  { %2128 = vmatpush3.bf16.msra.mxu0 %v2697_v9  ;;  %2140 = vmatpush3.bf16.msra.mxu1 %v2704_v10 }
 0x11a   :  { %2129 = vmatprep.subr.bf16.mxu0 %v2602_v0  ;;  %2141 = vmatprep.subr.bf16.mxu1 %v2602_v0 }
 0x11b   :  { %2135 = vmatprep.mubr.msk.bf16.mxu0 %vm2603_vm0, %v2602_v0  ;;  %2147 = vmatprep.mubr.msk.bf16.mxu1 %vm2603_vm0, %v2602_v0 }
 0x11d   :  { %2130 = vmatpush3.bf16.msra.mxu0 %v2711_v12  ;;  %2142 = vmatpush3.bf16.msra.mxu1 %v2718_v13 }
 0x11e   :  { %2131 = vmatprep.subr.bf16.mxu0 %v2602_v0  ;;  %2143 = vmatprep.subr.bf16.mxu1 %v2602_v0 }
 0x121   :  { %2132 = vmatpush3.bf16.msra.mxu0 %v2729_v14  ;;  %2144 = vmatpush3.bf16.msra.mxu1 %v2736_v15 }
 0x122   :  { %2133 = vmatprep.subr.bf16.mxu0 %v2602_v0  ;;  %2145 = vmatprep.subr.bf16.mxu1 %v2602_v0 }
 0x125   :  { %2134 = vmatpush3.bf16.msra.mxu0 %v2743_v16  ;;  %2146 = vmatpush3.bf16.msra.mxu1 %v2750_v17 }
 0x126   :  { %2151 = vmatprep.subr.bf16.mxu0 %v2602_v0  ;;  %2163 = vmatprep.subr.bf16.mxu1 %v2602_v0 }
 0x128   :  { %2136 = vmatmul.mubr.msk.bf16.vlgmr.msra.gmra.mrb[12].mxu0 %vm81_vm2, %v350_v60  ;;  %2148 = vmatmul.mubr.msk.bf16.vlgmr.msra.gmra.mrb[12].mxu1 %vm81_vm2, %v350_v60 }
 0x129   :  { %2152 = vmatpush3.bf16.msra.mxu0 %v2640_v1  ;;  %2164 = vmatpush3.bf16.msra.mxu1 %v2645_v2 }
 0x12a   :  { %2153 = vmatprep.subr.bf16.mxu0 %v2602_v0  ;;  %2165 = vmatprep.subr.bf16.mxu1 %v2602_v0 }
 0x12b   :  { %2159 = vmatprep.mubr.msk.bf16.mxu0 %vm2603_vm0, %v2602_v0  ;;  %2171 = vmatprep.mubr.msk.bf16.mxu1 %vm2603_vm0, %v2602_v0 }
 0x12d   :  { %2154 = vmatpush3.bf16.msra.mxu0 %v2655_v3  ;;  %2166 = vmatpush3.bf16.msra.mxu1 %v2662_v4 }
 0x12e   :  { %2155 = vmatprep.subr.bf16.mxu0 %v2602_v0  ;;  %2167 = vmatprep.subr.bf16.mxu1 %v2602_v0 }
 0x131   :  { %2156 = vmatpush3.bf16.msra.mxu0 %v2669_v5  ;;  %2168 = vmatpush3.bf16.msra.mxu1 %v2676_v6 }
 0x132   :  { %2157 = vmatprep.subr.bf16.mxu0 %v2602_v0  ;;  %2169 = vmatprep.subr.bf16.mxu1 %v2602_v0 }
 0x135   :  { %2158 = vmatpush3.bf16.msra.mxu0 %v2683_v7  ;;  %2170 = vmatpush3.bf16.msra.mxu1 %v2690_v8 }
 0x136   :  { %2175 = vmatprep.subr.bf16.mxu0 %v2602_v0  ;;  %2187 = vmatprep.subr.bf16.mxu1 %v2602_v0 }
 0x1eb   :  { %v390_v63 = vpop.f32.mrb[8].mxu0  ;;  %v433_v11 = vpop.f32.mrb[8].mxu1 }
 0x1ec   :  { %v396_v18 = vadd.f32 %v1811_v61, %v390_v63  ;;  %v439_v19 = vadd.f32 %v1813_v62, %v433_v11  ;;  %v2113_v20 = vpop.f32.mrb[9].mxu0  ;;  %v2125_v21 = vpop.f32.mrb[9].mxu1 }
 0x1ed   :  { %v393_v22 = vpop.f32.mrb[10].mxu0  ;;  %v436_v23 = vpop.f32.mrb[10].mxu1 }
 0x1ee   :  { %v1820_v24 = vmul.f32 -1.442695, %v396_v18  ;;  %v1819_v25 = vmul.f32 -1.442695, %v439_v19  ;;  %v2114_v26 = vpop.f32.mrb[11].mxu0  ;;  %v2126_v27 = vpop.f32.mrb[11].mxu1 }
 0x1f0   :  { %2474 = vpow2.f32 %v1820_v24  ;;  %v1827_v24 = vld [vmem:[%s3302_s2 + $0x8] sm:$0xf] }
 0x1f1   :  { %2476 = vpow2.f32 %v1819_v25  ;;  %v1829_v25 = vld [vmem:[%s3303_s3 + $0x8] sm:$0xf] }
 0x1fa   :  { %v2475_v30 = vpop.eup %2474 }
 0x1fb   :  { %v2477_v31 = vpop.eup %2476  ;;  %v536_v32 = vadd.f32 1.0, %v2475_v30  ;;  %v476_v33 = vpop.f32.mrb[12].mxu0 }
 0x1fc   :  { %v519_v34 = vpop.f32.mrb[12].mxu1  ;;  %v529_v35 = vadd.f32 1.0, %v2477_v31  ;;  %v482_v36 = vadd.f32 %v1815_v28, %v476_v33  ;;  %v2137_v38 = vpop.f32.mrb[13].mxu0 }
 0x1fd   :  { %v525_v37 = vadd.f32 %v1817_v29, %v519_v34  ;;  %v2149_v39 = vpop.f32.mrb[13].mxu1  ;;  %2478 = vrcp.f32 %v536_v32  ;;  %v479_v40 = vpop.f32.mrb[14].mxu0 }
 0x1fe   :  { %v522_v41 = vpop.f32.mrb[14].mxu1  ;;  %2480 = vrcp.f32 %v529_v35  ;;  %v2138_v43 = vpop.f32.mrb[15].mxu0 }
 0x1ff   :  { %v1821_v42 = vmul.f32 -1.442695, %v525_v37  ;;  %v2150_v44 = vpop.f32.mrb[15].mxu1  ;;  %2482 = vtanh.f32 %v482_v36 }
 0x201   :  { %2484 = vpow2.f32 %v1821_v42 }
 0x207   :  { %v2479_v45 = vpop.eup %2478 }
 0x208   :  { %v2481_v46 = vpop.eup %2480 }
 0x209   :  { %v2483_v47 = vpop.eup %2482  ;;  %v532_v48 = vmul.f32 %v2481_v46, %v2789_v55  ;;  %v1823_v55 = vld [vmem:[%s3300_s0 + $0x8] sm:$0xf] }
 0x20a   :  { %v540_v50 = vmul.f32 %v2483_v47, %v2479_v45 }
 0x20b   :  { %v2485_v49 = vpop.eup %2484 }
 0x20c   :  { %v545_v51 = vadd.f32 1.0, %v2485_v49  ;;  %v2853_v52 = vadd.f32 %v540_v50, %v532_v48 }
 0x20e   :  { %2486 = vrcp.f32 %v545_v51 }
 0x20f   :  { %2488 = vtanh.f32 %v2853_v52 }
 0x218   :  { %v2487_v53 = vpop.eup %2486 }
 0x219   :  { %v2489_v54 = vpop.eup %2488 }
 0x21a   :  { %v549_v56 = vmul.f32 %v2489_v54, %v2487_v53  ;;  %v1837_v54 = vld [vmem:[%s3301_s1 + $0xc] sm:$0xf] }
 0x21c   :  { %1822 = vst.msk [vmem:[%s3304_s5 + $0x4] sm:$0xf] %vm348_vm1, %v549_v56  ;;  %v552_v57 = vpack.c.bf16 %v549_v56, %v549_v56 }
 0x21e   :  { %2160 = vmatmul.mubr.msk.bf16.vlgmr.msra.gmra.mrb[16].mxu0 %vm81_vm2, %v552_v57  ;;  %2172 = vmatmul.mubr.msk.bf16.vlgmr.msra.gmra.mrb[16].mxu1 %vm81_vm2, %v552_v57 }
 0x21f   :  { %2176 = vmatpush3.bf16.msra.mxu0 %v2697_v9  ;;  %2188 = vmatpush3.bf16.msra.mxu1 %v2704_v10 }
 0x220   :  { %2177 = vmatprep.subr.bf16.mxu0 %v2602_v0  ;;  %2189 = vmatprep.subr.bf16.mxu1 %v2602_v0 }
 0x221   :  { %2183 = vmatprep.mubr.msk.bf16.mxu0 %vm2603_vm0, %v2602_v0  ;;  %2195 = vmatprep.mubr.msk.bf16.mxu1 %vm2603_vm0, %v2602_v0 }
 0x223   :  { %2178 = vmatpush3.bf16.msra.mxu0 %v2711_v12  ;;  %2190 = vmatpush3.bf16.msra.mxu1 %v2718_v13 }
 0x224   :  { %2179 = vmatprep.subr.bf16.mxu0 %v2602_v0  ;;  %2191 = vmatprep.subr.bf16.mxu1 %v2602_v0 }
 0x227   :  { %2180 = vmatpush3.bf16.msra.mxu0 %v2729_v14  ;;  %2192 = vmatpush3.bf16.msra.mxu1 %v2736_v15 }
 0x228   :  { %2181 = vmatprep.subr.bf16.mxu0 %v2602_v0  ;;  %2193 = vmatprep.subr.bf16.mxu1 %v2602_v0 }
 0x22b   :  { %2182 = vmatpush3.bf16.msra.mxu0 %v2743_v16  ;;  %2194 = vmatpush3.bf16.msra.mxu1 %v2750_v17 }
 0x22c   :  { %2199 = vmatprep.subr.bf16.mxu0 %v2602_v0  ;;  %2211 = vmatprep.subr.bf16.mxu1 %v2602_v0 }
 0x22e   :  { %2184 = vmatmul.mubr.msk.bf16.vlgmr.msra.gmra.mrb[20].mxu0 %vm81_vm2, %v552_v57  ;;  %2196 = vmatmul.mubr.msk.bf16.vlgmr.msra.gmra.mrb[20].mxu1 %vm81_vm2, %v552_v57 }
 0x22f   :  { %2200 = vmatpush3.bf16.msra.mxu0 %v2640_v1  ;;  %2212 = vmatpush3.bf16.msra.mxu1 %v2645_v2 }
 0x230   :  { %2201 = vmatprep.subr.bf16.mxu0 %v2602_v0  ;;  %2213 = vmatprep.subr.bf16.mxu1 %v2602_v0 }
 0x231   :  { %2207 = vmatprep.mubr.msk.bf16.mxu0 %vm2603_vm0, %v2602_v0  ;;  %2219 = vmatprep.mubr.msk.bf16.mxu1 %vm2603_vm0, %v2602_v0 }
 0x233   :  { %2202 = vmatpush3.bf16.msra.mxu0 %v2655_v3  ;;  %2214 = vmatpush3.bf16.msra.mxu1 %v2662_v4 }
 0x234   :  { %2203 = vmatprep.subr.bf16.mxu0 %v2602_v0  ;;  %2215 = vmatprep.subr.bf16.mxu1 %v2602_v0 }
 0x237   :  { %2204 = vmatpush3.bf16.msra.mxu0 %v2669_v5  ;;  %2216 = vmatpush3.bf16.msra.mxu1 %v2676_v6 }
 0x238   :  { %2205 = vmatprep.subr.bf16.mxu0 %v2602_v0  ;;  %2217 = vmatprep.subr.bf16.mxu1 %v2602_v0 }
 0x23b   :  { %2206 = vmatpush3.bf16.msra.mxu0 %v2683_v7  ;;  %2218 = vmatpush3.bf16.msra.mxu1 %v2690_v8 }
 0x23c   :  { %2223 = vmatprep.subr.bf16.mxu0 %v2602_v0  ;;  %2235 = vmatprep.subr.bf16.mxu1 %v2602_v0 }
 0x2f1   :  { %v592_v59 = vpop.f32.mrb[16].mxu0  ;;  %v635_v60 = vpop.f32.mrb[16].mxu1 }
 0x2f2   :  { %v598_v61 = vadd.f32 %v1823_v55, %v592_v59  ;;  %v641_v62 = vadd.f32 %v1825_v58, %v635_v60  ;;  %v2161_v63 = vpop.f32.mrb[17].mxu0  ;;  %v2173_v11 = vpop.f32.mrb[17].mxu1 }
 0x2f3   :  { %v595_v18 = vpop.f32.mrb[18].mxu0  ;;  %v638_v19 = vpop.f32.mrb[18].mxu1 }
 0x2f4   :  { %v1832_v20 = vmul.f32 -1.442695, %v598_v61  ;;  %v1831_v21 = vmul.f32 -1.442695, %v641_v62  ;;  %v2162_v22 = vpop.f32.mrb[19].mxu0  ;;  %v2174_v23 = vpop.f32.mrb[19].mxu1 }
 0x2f6   :  { %2490 = vpow2.f32 %v1832_v20  ;;  %v1839_v20 = vld [vmem:[%s3302_s2 + $0xc] sm:$0xf] }
 0x2f7   :  { %2492 = vpow2.f32 %v1831_v21  ;;  %v1841_v21 = vld [vmem:[%s3303_s3 + $0xc] sm:$0xf] }
 0x300   :  { %v2491_v26 = vpop.eup %2490 }
 0x301   :  { %v2493_v27 = vpop.eup %2492  ;;  %v738_v28 = vadd.f32 1.0, %v2491_v26  ;;  %v678_v29 = vpop.f32.mrb[20].mxu0 }
 0x302   :  { %v721_v30 = vpop.f32.mrb[20].mxu1  ;;  %v731_v31 = vadd.f32 1.0, %v2493_v27  ;;  %v684_v32 = vadd.f32 %v1827_v24, %v678_v29  ;;  %v2185_v34 = vpop.f32.mrb[21].mxu0 }
 0x303   :  { %v727_v33 = vadd.f32 %v1829_v25, %v721_v30  ;;  %v2197_v35 = vpop.f32.mrb[21].mxu1  ;;  %2494 = vrcp.f32 %v738_v28  ;;  %v681_v36 = vpop.f32.mrb[22].mxu0 }
 0x304   :  { %v724_v37 = vpop.f32.mrb[22].mxu1  ;;  %2496 = vrcp.f32 %v731_v31  ;;  %v2186_v39 = vpop.f32.mrb[23].mxu0 }
 0x305   :  { %v1833_v38 = vmul.f32 -1.442695, %v727_v33  ;;  %v2198_v40 = vpop.f32.mrb[23].mxu1  ;;  %2498 = vtanh.f32 %v684_v32 }
 0x307   :  { %2500 = vpow2.f32 %v1833_v38 }
 0x30d   :  { %v2495_v41 = vpop.eup %2494 }
 0x30e   :  { %v2497_v42 = vpop.eup %2496 }
 0x30f   :  { %v2499_v43 = vpop.eup %2498  ;;  %v734_v44 = vmul.f32 %v2497_v42, %v2853_v52  ;;  %v1835_v52 = vld [vmem:[%s3300_s0 + $0xc] sm:$0xf] }
 0x310   :  { %v742_v46 = vmul.f32 %v2499_v43, %v2495_v41 }
 0x311   :  { %v2501_v45 = vpop.eup %2500 }
 0x312   :  { %v747_v47 = vadd.f32 1.0, %v2501_v45  ;;  %v2917_v48 = vadd.f32 %v742_v46, %v734_v44 }
 0x314   :  { %2502 = vrcp.f32 %v747_v47 }
 0x315   :  { %2504 = vtanh.f32 %v2917_v48 }
 0x31e   :  { %v2503_v49 = vpop.eup %2502 }
 0x31f   :  { %v2505_v50 = vpop.eup %2504 }
 0x320   :  { %v751_v51 = vmul.f32 %v2505_v50, %v2503_v49 }
 0x322   :  { %1834 = vst.msk [vmem:[%s3304_s5 + $0x8] sm:$0xf] %vm348_vm1, %v751_v51  ;;  %v754_v53 = vpack.c.bf16 %v751_v51, %v751_v51 }
 0x324   :  { %2208 = vmatmul.mubr.msk.bf16.vlgmr.msra.gmra.mrb[24].mxu0 %vm81_vm2, %v754_v53  ;;  %2220 = vmatmul.mubr.msk.bf16.vlgmr.msra.gmra.mrb[24].mxu1 %vm81_vm2, %v754_v53 }
 0x325   :  { %2224 = vmatpush3.bf16.msra.mxu0 %v2697_v9  ;;  %2236 = vmatpush3.bf16.msra.mxu1 %v2704_v10 }
 0x326   :  { %2225 = vmatprep.subr.bf16.mxu0 %v2602_v0  ;;  %2237 = vmatprep.subr.bf16.mxu1 %v2602_v0 }
 0x327   :  { %2231 = vmatprep.mubr.msk.bf16.mxu0 %vm2603_vm0, %v2602_v0  ;;  %2243 = vmatprep.mubr.msk.bf16.mxu1 %vm2603_vm0, %v2602_v0 }
 0x329   :  { %2226 = vmatpush3.bf16.msra.mxu0 %v2711_v12  ;;  %2238 = vmatpush3.bf16.msra.mxu1 %v2718_v13 }
 0x32a   :  { %2227 = vmatprep.subr.bf16.mxu0 %v2602_v0  ;;  %2239 = vmatprep.subr.bf16.mxu1 %v2602_v0 }
 0x32d   :  { %2228 = vmatpush3.bf16.msra.mxu0 %v2729_v14  ;;  %2240 = vmatpush3.bf16.msra.mxu1 %v2736_v15 }
 0x32e   :  { %2229 = vmatprep.subr.bf16.mxu0 %v2602_v0  ;;  %2241 = vmatprep.subr.bf16.mxu1 %v2602_v0 }
 0x331   :  { %2230 = vmatpush3.bf16.msra.mxu0 %v2743_v16  ;;  %2242 = vmatpush3.bf16.msra.mxu1 %v2750_v17 }
 0x332   :  { %2247 = vmatprep.subr.bf16.mxu0 %v2602_v0  ;;  %2259 = vmatprep.subr.bf16.mxu1 %v2602_v0 }
 0x334   :  { %2232 = vmatmul.mubr.msk.bf16.vlgmr.msra.gmra.mrb[28].mxu0 %vm81_vm2, %v754_v53  ;;  %2244 = vmatmul.mubr.msk.bf16.vlgmr.msra.gmra.mrb[28].mxu1 %vm81_vm2, %v754_v53 }
 0x335   :  { %2248 = vmatpush3.bf16.msra.mxu0 %v2640_v1  ;;  %2260 = vmatpush3.bf16.msra.mxu1 %v2645_v2 }
 0x336   :  { %2249 = vmatprep.subr.bf16.mxu0 %v2602_v0  ;;  %2261 = vmatprep.subr.bf16.mxu1 %v2602_v0 }
 0x337   :  { %2255 = vmatprep.mubr.msk.bf16.mxu0 %vm2603_vm0, %v2602_v0  ;;  %2267 = vmatprep.mubr.msk.bf16.mxu1 %vm2603_vm0, %v2602_v0 }
 0x339   :  { %2250 = vmatpush3.bf16.msra.mxu0 %v2655_v3  ;;  %2262 = vmatpush3.bf16.msra.mxu1 %v2662_v4 }
 0x33a   :  { %2251 = vmatprep.subr.bf16.mxu0 %v2602_v0  ;;  %2263 = vmatprep.subr.bf16.mxu1 %v2602_v0 }
 0x33d   :  { %2252 = vmatpush3.bf16.msra.mxu0 %v2669_v5  ;;  %2264 = vmatpush3.bf16.msra.mxu1 %v2676_v6 }
 0x33e   :  { %2253 = vmatprep.subr.bf16.mxu0 %v2602_v0  ;;  %2265 = vmatprep.subr.bf16.mxu1 %v2602_v0 }
 0x341   :  { %2254 = vmatpush3.bf16.msra.mxu0 %v2683_v7  ;;  %2266 = vmatpush3.bf16.msra.mxu1 %v2690_v8 }
 0x342   :  { %2271 = vmatprep.subr.bf16.mxu0 %v2602_v0  ;;  %2283 = vmatprep.subr.bf16.mxu1 %v2602_v0 }
 0x3f7   :  { %v794_v56 = vpop.f32.mrb[24].mxu0  ;;  %v837_v57 = vpop.f32.mrb[24].mxu1 }
 0x3f8   :  { %v800_v55 = vadd.f32 %v1835_v52, %v794_v56  ;;  %v843_v58 = vadd.f32 %v1837_v54, %v837_v57  ;;  %v2209_v59 = vpop.f32.mrb[25].mxu0  ;;  %v2221_v60 = vpop.f32.mrb[25].mxu1  ;;  %v1851_v56 = vld [vmem:[%s3302_s2 + $0x10] sm:$0xf] }
 0x3f9   :  { %v797_v61 = vpop.f32.mrb[26].mxu0  ;;  %v840_v62 = vpop.f32.mrb[26].mxu1  ;;  %v1853_v57 = vld [vmem:[%s3303_s3 + $0x10] sm:$0xf] }
 0x3fa   :  { %v1844_v63 = vmul.f32 -1.442695, %v800_v55  ;;  %v1843_v11 = vmul.f32 -1.442695, %v843_v58  ;;  %v2210_v18 = vpop.f32.mrb[27].mxu0  ;;  %v2222_v19 = vpop.f32.mrb[27].mxu1 }
 0x3fc   :  { %2506 = vpow2.f32 %v1844_v63 }
 0x3fd   :  { %2508 = vpow2.f32 %v1843_v11 }
 0x406   :  { %v2507_v22 = vpop.eup %2506 }
 0x407   :  { %v2509_v23 = vpop.eup %2508  ;;  %v940_v24 = vadd.f32 1.0, %v2507_v22  ;;  %v880_v25 = vpop.f32.mrb[28].mxu0 }
 0x408   :  { %v923_v26 = vpop.f32.mrb[28].mxu1  ;;  %v933_v27 = vadd.f32 1.0, %v2509_v23  ;;  %v886_v28 = vadd.f32 %v1839_v20, %v880_v25  ;;  %v2233_v30 = vpop.f32.mrb[29].mxu0 }
 0x409   :  { %v929_v29 = vadd.f32 %v1841_v21, %v923_v26  ;;  %v2245_v31 = vpop.f32.mrb[29].mxu1  ;;  %2510 = vrcp.f32 %v940_v24  ;;  %v883_v32 = vpop.f32.mrb[30].mxu0 }
 0x40a   :  { %v926_v33 = vpop.f32.mrb[30].mxu1  ;;  %2512 = vrcp.f32 %v933_v27  ;;  %v2234_v35 = vpop.f32.mrb[31].mxu0 }
 0x40b   :  { %v1845_v34 = vmul.f32 -1.442695, %v929_v29  ;;  %v2246_v36 = vpop.f32.mrb[31].mxu1  ;;  %2514 = vtanh.f32 %v886_v28 }
 0x40d   :  { %2516 = vpow2.f32 %v1845_v34 }
 0x413   :  { %v2511_v37 = vpop.eup %2510 }
 0x414   :  { %v2513_v38 = vpop.eup %2512 }
 0x415   :  { %v2515_v39 = vpop.eup %2514  ;;  %v936_v40 = vmul.f32 %v2513_v38, %v2917_v48  ;;  %v1861_v38 = vld [vmem:[%s3301_s1 + $0x14] sm:$0xf] }
 0x416   :  { %v944_v42 = vmul.f32 %v2515_v39, %v2511_v37  ;;  %v1859_v37 = vld [vmem:[%s3300_s0 + $0x14] sm:$0xf] }
 0x417   :  { %v2517_v41 = vpop.eup %2516 }
 0x418   :  { %v949_v43 = vadd.f32 1.0, %v2517_v41  ;;  %v2981_v44 = vadd.f32 %v944_v42, %v936_v40 }
 0x41a   :  { %2518 = vrcp.f32 %v949_v43 }
 0x41b   :  { %2520 = vtanh.f32 %v2981_v44 }
 0x424   :  { %v2519_v45 = vpop.eup %2518 }
 0x425   :  { %v2521_v46 = vpop.eup %2520 }
 0x426   :  { %v953_v47 = vmul.f32 %v2521_v46, %v2519_v45 }
 0x428   :  { %1846 = vst.msk [vmem:[%s3304_s5 + $0xc] sm:$0xf] %vm348_vm1, %v953_v47  ;;  %v956_v49 = vpack.c.bf16 %v953_v47, %v953_v47 }
 0x42a   :  { %2256 = vmatmul.mubr.msk.bf16.vlgmr.msra.gmra.mrb[32].mxu0 %vm81_vm2, %v956_v49  ;;  %2268 = vmatmul.mubr.msk.bf16.vlgmr.msra.gmra.mrb[32].mxu1 %vm81_vm2, %v956_v49 }
 0x42b   :  { %2272 = vmatpush3.bf16.msra.mxu0 %v2697_v9  ;;  %2284 = vmatpush3.bf16.msra.mxu1 %v2704_v10 }
 0x42c   :  { %2273 = vmatprep.subr.bf16.mxu0 %v2602_v0  ;;  %2285 = vmatprep.subr.bf16.mxu1 %v2602_v0 }
 0x42d   :  { %2279 = vmatprep.mubr.msk.bf16.mxu0 %vm2603_vm0, %v2602_v0  ;;  %2291 = vmatprep.mubr.msk.bf16.mxu1 %vm2603_vm0, %v2602_v0 }
 0x42f   :  { %2274 = vmatpush3.bf16.msra.mxu0 %v2711_v12  ;;  %2286 = vmatpush3.bf16.msra.mxu1 %v2718_v13 }
 0x430   :  { %2275 = vmatprep.subr.bf16.mxu0 %v2602_v0  ;;  %2287 = vmatprep.subr.bf16.mxu1 %v2602_v0 }
 0x433   :  { %2276 = vmatpush3.bf16.msra.mxu0 %v2729_v14  ;;  %2288 = vmatpush3.bf16.msra.mxu1 %v2736_v15 }
 0x434   :  { %2277 = vmatprep.subr.bf16.mxu0 %v2602_v0  ;;  %2289 = vmatprep.subr.bf16.mxu1 %v2602_v0 }
 0x437   :  { %2278 = vmatpush3.bf16.msra.mxu0 %v2743_v16  ;;  %2290 = vmatpush3.bf16.msra.mxu1 %v2750_v17 }
 0x438   :  { %2295 = vmatprep.subr.bf16.mxu0 %v2602_v0  ;;  %2307 = vmatprep.subr.bf16.mxu1 %v2602_v0 }
 0x43a   :  { %2280 = vmatmul.mubr.msk.bf16.vlgmr.msra.gmra.mrb[36].mxu0 %vm81_vm2, %v956_v49  ;;  %2292 = vmatmul.mubr.msk.bf16.vlgmr.msra.gmra.mrb[36].mxu1 %vm81_vm2, %v956_v49 }
 0x43b   :  { %2296 = vmatpush3.bf16.msra.mxu0 %v2640_v1  ;;  %2308 = vmatpush3.bf16.msra.mxu1 %v2645_v2  ;;  %v1847_v1 = vld [vmem:[%s3300_s0 + $0x10] sm:$0xf] }
 0x43c   :  { %2297 = vmatprep.subr.bf16.mxu0 %v2602_v0  ;;  %2309 = vmatprep.subr.bf16.mxu1 %v2602_v0  ;;  %v1849_v2 = vld [vmem:[%s3301_s1 + $0x10] sm:$0xf] }
 0x43d   :  { %2303 = vmatprep.mubr.msk.bf16.mxu0 %vm2603_vm0, %v2602_v0  ;;  %2315 = vmatprep.mubr.msk.bf16.mxu1 %vm2603_vm0, %v2602_v0 }
 0x43f   :  { %2298 = vmatpush3.bf16.msra.mxu0 %v2655_v3  ;;  %2310 = vmatpush3.bf16.msra.mxu1 %v2662_v4 }
 0x440   :  { %2299 = vmatprep.subr.bf16.mxu0 %v2602_v0  ;;  %2311 = vmatprep.subr.bf16.mxu1 %v2602_v0 }
 0x443   :  { %2300 = vmatpush3.bf16.msra.mxu0 %v2669_v5  ;;  %2312 = vmatpush3.bf16.msra.mxu1 %v2676_v6 }
 0x444   :  { %2301 = vmatprep.subr.bf16.mxu0 %v2602_v0  ;;  %2313 = vmatprep.subr.bf16.mxu1 %v2602_v0 }
 0x447   :  { %2302 = vmatpush3.bf16.msra.mxu0 %v2683_v7  ;;  %2314 = vmatpush3.bf16.msra.mxu1 %v2690_v8 }
 0x448   :  { %2319 = vmatprep.subr.bf16.mxu0 %v2602_v0  ;;  %2331 = vmatprep.subr.bf16.mxu1 %v2602_v0 }
 0x4fd   :  { %v996_v3 = vpop.f32.mrb[32].mxu0  ;;  %v1039_v4 = vpop.f32.mrb[32].mxu1 }
 0x4fe   :  { %v1002_v5 = vadd.f32 %v1847_v1, %v996_v3  ;;  %v1045_v6 = vadd.f32 %v1849_v2, %v1039_v4  ;;  %v2257_v48 = vpop.f32.mrb[33].mxu0  ;;  %v2269_v7 = vpop.f32.mrb[33].mxu1  ;;  %v1863_v3 = vld [vmem:[%s3302_s2 + $0x14] sm:$0xf] }
 0x4ff   :  { %v999_v50 = vpop.f32.mrb[34].mxu0  ;;  %v1042_v8 = vpop.f32.mrb[34].mxu1  ;;  %v1865_v4 = vld [vmem:[%s3303_s3 + $0x14] sm:$0xf] }
 0x500   :  { %v1856_v51 = vmul.f32 -1.442695, %v1002_v5  ;;  %v1855_v53 = vmul.f32 -1.442695, %v1045_v6  ;;  %v2258_v52 = vpop.f32.mrb[35].mxu0  ;;  %v2270_v54 = vpop.f32.mrb[35].mxu1 }
 0x502   :  { %2522 = vpow2.f32 %v1856_v51 }
 0x503   :  { %2524 = vpow2.f32 %v1855_v53 }
 0x50c   :  { %v2523_v55 = vpop.eup %2522 }
 0x50d   :  { %v2525_v58 = vpop.eup %2524  ;;  %v1142_v59 = vadd.f32 1.0, %v2523_v55  ;;  %v1082_v60 = vpop.f32.mrb[36].mxu0 }
 0x50e   :  { %v1125_v61 = vpop.f32.mrb[36].mxu1  ;;  %v1135_v62 = vadd.f32 1.0, %v2525_v58  ;;  %v1088_v63 = vadd.f32 %v1851_v56, %v1082_v60  ;;  %v2281_v18 = vpop.f32.mrb[37].mxu0 }
 0x50f   :  { %v1131_v11 = vadd.f32 %v1853_v57, %v1125_v61  ;;  %v2293_v19 = vpop.f32.mrb[37].mxu1  ;;  %2526 = vrcp.f32 %v1142_v59  ;;  %v1085_v20 = vpop.f32.mrb[38].mxu0 }
 0x510   :  { %v1128_v21 = vpop.f32.mrb[38].mxu1  ;;  %2528 = vrcp.f32 %v1135_v62  ;;  %v2282_v23 = vpop.f32.mrb[39].mxu0 }
 0x511   :  { %v1857_v22 = vmul.f32 -1.442695, %v1131_v11  ;;  %v2294_v24 = vpop.f32.mrb[39].mxu1  ;;  %2530 = vtanh.f32 %v1088_v63 }
 0x513   :  { %2532 = vpow2.f32 %v1857_v22 }
 0x519   :  { %v2527_v25 = vpop.eup %2526 }
 0x51a   :  { %v2529_v26 = vpop.eup %2528 }
 0x51b   :  { %v2531_v27 = vpop.eup %2530  ;;  %v1138_v28 = vmul.f32 %v2529_v26, %v2981_v44  ;;  %v3167_v26 = vld [vmem:[%s3299_s4 + $0x60] sm:$0xff]  }
 0x51c   :  { %v1146_v30 = vmul.f32 %v2531_v27, %v2527_v25  ;;  %v3161_v25 = vld [vmem:[%s3299_s4 + $0x40] sm:$0xff]   ;;  %v3179_v27 = vld [vmem:[%s3299_s4 + $0x48] sm:$0xff]  }
 0x51d   :  { %v2533_v29 = vpop.eup %2532 }
 0x51e   :  { %v1151_v31 = vadd.f32 1.0, %v2533_v29  ;;  %v3045_v32 = vadd.f32 %v1146_v30, %v1138_v28  ;;  %v3185_v28 = vld [vmem:[%s3299_s4 + $0x68] sm:$0xff]   ;;  %v3193_v29 = vld [vmem:[%s3299_s4 + $0x50] sm:$0xff]  }
 0x51f   :  { %v3199_v30 = vld [vmem:[%s3299_s4 + $0x70] sm:$0xff]  }
 0x520   :  { %2534 = vrcp.f32 %v1151_v31  ;;  %v3207_v31 = vld [vmem:[%s3299_s4 + $0x58] sm:$0xff]  }
 0x521   :  { %2536 = vtanh.f32 %v3045_v32 }
 0x52a   :  { %v2535_v33 = vpop.eup %2534 }
 0x52b   :  { %v2537_v34 = vpop.eup %2536 }
 0x52c   :  { %v1155_v35 = vmul.f32 %v2537_v34, %v2535_v33  ;;  %v1871_v33 = vld [vmem:[%s3300_s0 + $0x18] sm:$0xf] }
 0x52d   :  { %v1873_v34 = vld [vmem:[%s3301_s1 + $0x18] sm:$0xf] }
 0x52e   :  { %1858 = vst.msk [vmem:[%s3304_s5 + $0x10] sm:$0xf] %vm348_vm1, %v1155_v35  ;;  %v1158_v36 = vpack.c.bf16 %v1155_v35, %v1155_v35 }
 0x530   :  { %2304 = vmatmul.mubr.msk.bf16.vlgmr.msra.gmra.mrb[40].mxu0 %vm81_vm2, %v1158_v36  ;;  %2316 = vmatmul.mubr.msk.bf16.vlgmr.msra.gmra.mrb[40].mxu1 %vm81_vm2, %v1158_v36 }
 0x531   :  { %2320 = vmatpush3.bf16.msra.mxu0 %v2697_v9  ;;  %2332 = vmatpush3.bf16.msra.mxu1 %v2704_v10  ;;  %v3079_v9 = vld [vmem:[%s3299_s4] sm:$0xff]  }
 0x532   :  { %2321 = vmatprep.subr.bf16.mxu0 %v2602_v0  ;;  %2333 = vmatprep.subr.bf16.mxu1 %v2602_v0  ;;  %v3085_v10 = vld [vmem:[%s3299_s4 + $0x20] sm:$0xff]  }
 0x533   :  { %2327 = vmatprep.mubr.msk.bf16.mxu0 %vm2603_vm0, %v2602_v0  ;;  %2339 = vmatprep.mubr.msk.bf16.mxu1 %vm2603_vm0, %v2602_v0 }
 0x535   :  { %2322 = vmatpush3.bf16.msra.mxu0 %v2711_v12  ;;  %2334 = vmatpush3.bf16.msra.mxu1 %v2718_v13  ;;  %v3097_v12 = vld [vmem:[%s3299_s4 + $0x8] sm:$0xff]  }
 0x536   :  { %2323 = vmatprep.subr.bf16.mxu0 %v2602_v0  ;;  %2335 = vmatprep.subr.bf16.mxu1 %v2602_v0  ;;  %v3103_v13 = vld [vmem:[%s3299_s4 + $0x28] sm:$0xff]  }
 0x539   :  { %2324 = vmatpush3.bf16.msra.mxu0 %v2729_v14  ;;  %2336 = vmatpush3.bf16.msra.mxu1 %v2736_v15  ;;  %v3111_v14 = vld [vmem:[%s3299_s4 + $0x10] sm:$0xff]  }
 0x53a   :  { %2325 = vmatprep.subr.bf16.mxu0 %v2602_v0  ;;  %2337 = vmatprep.subr.bf16.mxu1 %v2602_v0  ;;  %v3117_v15 = vld [vmem:[%s3299_s4 + $0x30] sm:$0xff]  }
 0x53d   :  { %2326 = vmatpush3.bf16.msra.mxu0 %v2743_v16  ;;  %2338 = vmatpush3.bf16.msra.mxu1 %v2750_v17  ;;  %v3125_v16 = vld [vmem:[%s3299_s4 + $0x18] sm:$0xff]  }
 0x53e   :  { %2343 = vmatprep.subr.bf16.mxu0 %v2602_v0  ;;  %2355 = vmatprep.subr.bf16.mxu1 %v2602_v0  ;;  %v3131_v17 = vld [vmem:[%s3299_s4 + $0x38] sm:$0xff]  }
 0x540   :  { %2328 = vmatmul.mubr.msk.bf16.vlgmr.msra.gmra.mrb[44].mxu0 %vm81_vm2, %v1158_v36  ;;  %2340 = vmatmul.mubr.msk.bf16.vlgmr.msra.gmra.mrb[44].mxu1 %vm81_vm2, %v1158_v36 }
 0x541   :  { %2344 = vmatpush3.bf16.msra.mxu0 %v3079_v9  ;;  %2356 = vmatpush3.bf16.msra.mxu1 %v3085_v10 }
 0x542   :  { %2345 = vmatprep.subr.bf16.mxu0 %v2602_v0  ;;  %2357 = vmatprep.subr.bf16.mxu1 %v2602_v0 }
 0x543   :  { %2351 = vmatprep.mubr.msk.bf16.mxu0 %vm2603_vm0, %v2602_v0  ;;  %2363 = vmatprep.mubr.msk.bf16.mxu1 %vm2603_vm0, %v2602_v0 }
 0x545   :  { %2346 = vmatpush3.bf16.msra.mxu0 %v3097_v12  ;;  %2358 = vmatpush3.bf16.msra.mxu1 %v3103_v13 }
 0x546   :  { %2347 = vmatprep.subr.bf16.mxu0 %v2602_v0  ;;  %2359 = vmatprep.subr.bf16.mxu1 %v2602_v0 }
 0x549   :  { %2348 = vmatpush3.bf16.msra.mxu0 %v3111_v14  ;;  %2360 = vmatpush3.bf16.msra.mxu1 %v3117_v15 }
 0x54a   :  { %2349 = vmatprep.subr.bf16.mxu0 %v2602_v0  ;;  %2361 = vmatprep.subr.bf16.mxu1 %v2602_v0 }
 0x54d   :  { %2350 = vmatpush3.bf16.msra.mxu0 %v3125_v16  ;;  %2362 = vmatpush3.bf16.msra.mxu1 %v3131_v17 }
 0x54e   :  { %2367 = vmatprep.subr.bf16.mxu0 %v2602_v0  ;;  %2379 = vmatprep.subr.bf16.mxu1 %v2602_v0 }
 0x603   :  { %v1198_v39 = vpop.f32.mrb[40].mxu0  ;;  %v1241_v40 = vpop.f32.mrb[40].mxu1 }
 0x604   :  { %v1204_v41 = vadd.f32 %v1859_v37, %v1198_v39  ;;  %v1247_v42 = vadd.f32 %v1861_v38, %v1241_v40  ;;  %v2305_v43 = vpop.f32.mrb[41].mxu0  ;;  %v2317_v44 = vpop.f32.mrb[41].mxu1  ;;  %v1875_v39 = vld [vmem:[%s3302_s2 + $0x18] sm:$0xf] }
 0x605   :  { %v1201_v45 = vpop.f32.mrb[42].mxu0  ;;  %v1244_v46 = vpop.f32.mrb[42].mxu1  ;;  %v1877_v40 = vld [vmem:[%s3303_s3 + $0x18] sm:$0xf] }
 0x606   :  { %v1868_v47 = vmul.f32 -1.442695, %v1204_v41  ;;  %v1867_v49 = vmul.f32 -1.442695, %v1247_v42  ;;  %v2306_v1 = vpop.f32.mrb[43].mxu0  ;;  %v2318_v2 = vpop.f32.mrb[43].mxu1 }
 0x608   :  { %2538 = vpow2.f32 %v1868_v47 }
 0x609   :  { %2540 = vpow2.f32 %v1867_v49 }
 0x612   :  { %v2539_v5 = vpop.eup %2538 }
 0x613   :  { %v2541_v6 = vpop.eup %2540  ;;  %v1344_v48 = vadd.f32 1.0, %v2539_v5  ;;  %v1284_v7 = vpop.f32.mrb[44].mxu0 }
 0x614   :  { %v1327_v50 = vpop.f32.mrb[44].mxu1  ;;  %v1337_v8 = vadd.f32 1.0, %v2541_v6  ;;  %v1290_v51 = vadd.f32 %v1863_v3, %v1284_v7  ;;  %v2329_v52 = vpop.f32.mrb[45].mxu0 }
 0x615   :  { %v1333_v53 = vadd.f32 %v1865_v4, %v1327_v50  ;;  %v2341_v54 = vpop.f32.mrb[45].mxu1  ;;  %2542 = vrcp.f32 %v1344_v48  ;;  %v1287_v56 = vpop.f32.mrb[46].mxu0 }
 0x616   :  { %v1330_v57 = vpop.f32.mrb[46].mxu1  ;;  %2544 = vrcp.f32 %v1337_v8  ;;  %v2330_v58 = vpop.f32.mrb[47].mxu0 }
 0x617   :  { %v1869_v55 = vmul.f32 -1.442695, %v1333_v53  ;;  %v2342_v59 = vpop.f32.mrb[47].mxu1  ;;  %2546 = vtanh.f32 %v1290_v51 }
 0x619   :  { %2548 = vpow2.f32 %v1869_v55 }
 0x61f   :  { %v2543_v60 = vpop.eup %2542 }
 0x620   :  { %v2545_v61 = vpop.eup %2544 }
 0x621   :  { %v2547_v62 = vpop.eup %2546  ;;  %v1340_v63 = vmul.f32 %v2545_v61, %v3045_v32  ;;  %v3213_v32 = vld [vmem:[%s3299_s4 + $0x78] sm:$0xff]  }
 0x622   :  { %v1348_v18 = vmul.f32 %v2547_v62, %v2543_v60  ;;  %v1883_v60 = vld [vmem:[%s3300_s0 + $0x1c] sm:$0xf] }
 0x623   :  { %v2549_v11 = vpop.eup %2548  ;;  %v1885_v61 = vld [vmem:[%s3301_s1 + $0x1c] sm:$0xf] }
 0x624   :  { %v1353_v19 = vadd.f32 1.0, %v2549_v11  ;;  %v3149_v20 = vadd.f32 %v1348_v18, %v1340_v63 }
 0x626   :  { %2550 = vrcp.f32 %v1353_v19 }
 0x627   :  { %2552 = vtanh.f32 %v3149_v20 }
 0x630   :  { %v2551_v21 = vpop.eup %2550 }
 0x631   :  { %v2553_v22 = vpop.eup %2552 }
 0x632   :  { %v1357_v23 = vmul.f32 %v2553_v22, %v2551_v21 }
 0x634   :  { %1870 = vst.msk [vmem:[%s3304_s5 + $0x14] sm:$0xf] %vm348_vm1, %v1357_v23  ;;  %v1360_v24 = vpack.c.bf16 %v1357_v23, %v1357_v23 }
 0x636   :  { %2352 = vmatmul.mubr.msk.bf16.vlgmr.msra.gmra.mrb[48].mxu0 %vm81_vm2, %v1360_v24  ;;  %2364 = vmatmul.mubr.msk.bf16.vlgmr.msra.gmra.mrb[48].mxu1 %vm81_vm2, %v1360_v24 }
 0x637   :  { %2368 = vmatpush3.bf16.msra.mxu0 %v3161_v25  ;;  %2380 = vmatpush3.bf16.msra.mxu1 %v3167_v26 }
 0x638   :  { %2369 = vmatprep.subr.bf16.mxu0 %v2602_v0  ;;  %2381 = vmatprep.subr.bf16.mxu1 %v2602_v0 }
 0x639   :  { %2375 = vmatprep.mubr.msk.bf16.mxu0 %vm2603_vm0, %v2602_v0  ;;  %2387 = vmatprep.mubr.msk.bf16.mxu1 %vm2603_vm0, %v2602_v0 }
 0x63b   :  { %2370 = vmatpush3.bf16.msra.mxu0 %v3179_v27  ;;  %2382 = vmatpush3.bf16.msra.mxu1 %v3185_v28 }
 0x63c   :  { %2371 = vmatprep.subr.bf16.mxu0 %v2602_v0  ;;  %2383 = vmatprep.subr.bf16.mxu1 %v2602_v0 }
 0x63f   :  { %2372 = vmatpush3.bf16.msra.mxu0 %v3193_v29  ;;  %2384 = vmatpush3.bf16.msra.mxu1 %v3199_v30 }
 0x640   :  { %2373 = vmatprep.subr.bf16.mxu0 %v2602_v0  ;;  %2385 = vmatprep.subr.bf16.mxu1 %v2602_v0 }
 0x643   :  { %2374 = vmatpush3.bf16.msra.mxu0 %v3207_v31  ;;  %2386 = vmatpush3.bf16.msra.mxu1 %v3213_v32 }
 0x644   :  { %2391 = vmatprep.subr.bf16.mxu0 %v2602_v0  ;;  %2403 = vmatprep.subr.bf16.mxu1 %v2602_v0 }
 0x646   :  { %2376 = vmatmul.mubr.msk.bf16.vlgmr.msra.gmra.mrb[52].mxu0 %vm81_vm2, %v1360_v24  ;;  %2388 = vmatmul.mubr.msk.bf16.vlgmr.msra.gmra.mrb[52].mxu1 %vm81_vm2, %v1360_v24 }
 0x647   :  { %2392 = vmatpush3.bf16.msra.mxu0 %v3079_v9  ;;  %2404 = vmatpush3.bf16.msra.mxu1 %v3085_v10 }
 0x648   :  { %2393 = vmatprep.subr.bf16.mxu0 %v2602_v0  ;;  %2405 = vmatprep.subr.bf16.mxu1 %v2602_v0 }
 0x649   :  { %2399 = vmatprep.mubr.msk.bf16.mxu0 %vm2603_vm0, %v2602_v0  ;;  %2411 = vmatprep.mubr.msk.bf16.mxu1 %vm2603_vm0, %v2602_v0 }
 0x64b   :  { %2394 = vmatpush3.bf16.msra.mxu0 %v3097_v12  ;;  %2406 = vmatpush3.bf16.msra.mxu1 %v3103_v13 }
 0x64c   :  { %2395 = vmatprep.subr.bf16.mxu0 %v2602_v0  ;;  %2407 = vmatprep.subr.bf16.mxu1 %v2602_v0 }
 0x64f   :  { %2396 = vmatpush3.bf16.msra.mxu0 %v3111_v14  ;;  %2408 = vmatpush3.bf16.msra.mxu1 %v3117_v15 }
 0x650   :  { %2397 = vmatprep.subr.bf16.mxu0 %v2602_v0  ;;  %2409 = vmatprep.subr.bf16.mxu1 %v2602_v0 }
 0x653   :  { %2398 = vmatpush3.bf16.msra.mxu0 %v3125_v16  ;;  %2410 = vmatpush3.bf16.msra.mxu1 %v3131_v17 }
 0x654   :  { %2415 = vmatprep.subr.bf16.mxu0 %v2602_v0  ;;  %2427 = vmatprep.subr.bf16.mxu1 %v2602_v0 }
 0x709   :  { %v1400_v35 = vpop.f32.mrb[48].mxu0  ;;  %v1443_v36 = vpop.f32.mrb[48].mxu1 }
 0x70a   :  { %v1406_v9 = vadd.f32 %v1871_v33, %v1400_v35  ;;  %v1449_v10 = vadd.f32 %v1873_v34, %v1443_v36  ;;  %v2353_v12 = vpop.f32.mrb[49].mxu0  ;;  %v2365_v13 = vpop.f32.mrb[49].mxu1 }
 0x70b   :  { %v1403_v14 = vpop.f32.mrb[50].mxu0  ;;  %v1446_v15 = vpop.f32.mrb[50].mxu1 }
 0x70c   :  { %v1880_v16 = vmul.f32 -1.442695, %v1406_v9  ;;  %v1879_v17 = vmul.f32 -1.442695, %v1449_v10  ;;  %v2354_v37 = vpop.f32.mrb[51].mxu0  ;;  %v2366_v38 = vpop.f32.mrb[51].mxu1 }
 0x70e   :  { %2554 = vpow2.f32 %v1880_v16 }
 0x70f   :  { %2556 = vpow2.f32 %v1879_v17 }
 0x718   :  { %v2555_v41 = vpop.eup %2554 }
 0x719   :  { %v2557_v42 = vpop.eup %2556  ;;  %v1546_v43 = vadd.f32 1.0, %v2555_v41  ;;  %v1486_v44 = vpop.f32.mrb[52].mxu0 }
 0x71a   :  { %v1529_v45 = vpop.f32.mrb[52].mxu1  ;;  %v1539_v46 = vadd.f32 1.0, %v2557_v42  ;;  %v1492_v47 = vadd.f32 %v1875_v39, %v1486_v44  ;;  %v2377_v1 = vpop.f32.mrb[53].mxu0 }
 0x71b   :  { %v1535_v49 = vadd.f32 %v1877_v40, %v1529_v45  ;;  %v2389_v2 = vpop.f32.mrb[53].mxu1  ;;  %2558 = vrcp.f32 %v1546_v43  ;;  %v1489_v3 = vpop.f32.mrb[54].mxu0 }
 0x71c   :  { %v1532_v4 = vpop.f32.mrb[54].mxu1  ;;  %2560 = vrcp.f32 %v1539_v46  ;;  %v2378_v6 = vpop.f32.mrb[55].mxu0 }
 0x71d   :  { %v1881_v5 = vmul.f32 -1.442695, %v1535_v49  ;;  %v2390_v48 = vpop.f32.mrb[55].mxu1  ;;  %2562 = vtanh.f32 %v1492_v47 }
 0x71f   :  { %2564 = vpow2.f32 %v1881_v5 }
 0x725   :  { %v2559_v7 = vpop.eup %2558 }
 0x726   :  { %v2561_v50 = vpop.eup %2560 }
 0x727   :  { %v2563_v8 = vpop.eup %2562  ;;  %v1542_v51 = vmul.f32 %v2561_v50, %v3149_v20 }
 0x728   :  { %v1550_v52 = vmul.f32 %v2563_v8, %v2559_v7 }
 0x729   :  { %v2565_v53 = vpop.eup %2564 }
 0x72a   :  { %v1555_v54 = vadd.f32 1.0, %v2565_v53  ;;  %v3253_v56 = vadd.f32 %v1550_v52, %v1542_v51 }
 0x72c   :  { %2566 = vrcp.f32 %v1555_v54 }
 0x72d   :  { %2568 = vtanh.f32 %v3253_v56 }
 0x736   :  { %v2567_v57 = vpop.eup %2566 }
 0x737   :  { %v2569_v55 = vpop.eup %2568 }
 0x738   :  { %v1559_v58 = vmul.f32 %v2569_v55, %v2567_v57 }
 0x73a   :  { %1882 = vst.msk [vmem:[%s3304_s5 + $0x18] sm:$0xf] %vm348_vm1, %v1559_v58  ;;  %v1562_v59 = vpack.c.bf16 %v1559_v58, %v1559_v58 }
 0x73c   :  { %2400 = vmatmul.mubr.msk.bf16.vlgmr.msra.gmra.mrb[56].mxu0 %vm81_vm2, %v1562_v59  ;;  %2412 = vmatmul.mubr.msk.bf16.vlgmr.msra.gmra.mrb[56].mxu1 %vm81_vm2, %v1562_v59 }
 0x73d   :  { %2416 = vmatpush3.bf16.msra.mxu0 %v3161_v25  ;;  %2428 = vmatpush3.bf16.msra.mxu1 %v3167_v26  ;;  %v1887_v26 = vld [vmem:[%s3302_s2 + $0x1c] sm:$0xf] }
 0x73e   :  { %2417 = vmatprep.subr.bf16.mxu0 %v2602_v0  ;;  %2429 = vmatprep.subr.bf16.mxu1 %v2602_v0 }
 0x73f   :  { %2423 = vmatprep.mubr.msk.bf16.mxu0 %vm2603_vm0, %v2602_v0  ;;  %2435 = vmatprep.mubr.msk.bf16.mxu1 %vm2603_vm0, %v2602_v0 }
 0x741   :  { %2418 = vmatpush3.bf16.msra.mxu0 %v3179_v27  ;;  %2430 = vmatpush3.bf16.msra.mxu1 %v3185_v28  ;;  %v1889_v27 = vld [vmem:[%s3303_s3 + $0x1c] sm:$0xf] }
 0x742   :  { %2419 = vmatprep.subr.bf16.mxu0 %v2602_v0  ;;  %2431 = vmatprep.subr.bf16.mxu1 %v2602_v0 }
 0x745   :  { %2420 = vmatpush3.bf16.msra.mxu0 %v3193_v29  ;;  %2432 = vmatpush3.bf16.msra.mxu1 %v3199_v30 }
 0x746   :  { %2421 = vmatprep.subr.bf16.mxu0 %v2602_v0  ;;  %2433 = vmatprep.subr.bf16.mxu1 %v2602_v0 }
 0x749   :  { %2422 = vmatpush3.bf16.msra.mxu0 %v3207_v31  ;;  %2434 = vmatpush3.bf16.msra.mxu1 %v3213_v32 }
 0x74c   :  { %2424 = vmatmul.mubr.msk.bf16.vlgmr.msra.gmra.mrb[60].mxu0 %vm81_vm2, %v1562_v59  ;;  %2436 = vmatmul.mubr.msk.bf16.vlgmr.msra.gmra.mrb[60].mxu1 %vm81_vm2, %v1562_v59 }
 0x80f   :  { %v1602_v62 = vpop.f32.mrb[56].mxu0  ;;  %v1645_v63 = vpop.f32.mrb[56].mxu1 }
 0x810   :  { %v1608_v11 = vadd.f32 %v1883_v60, %v1602_v62  ;;  %v1651_v0 = vadd.f32 %v1885_v61, %v1645_v63  ;;  %v2401_v18 = vpop.f32.mrb[57].mxu0  ;;  %v2413_v19 = vpop.f32.mrb[57].mxu1 }
 0x811   :  { %v1605_v20 = vpop.f32.mrb[58].mxu0  ;;  %v1648_v21 = vpop.f32.mrb[58].mxu1 }
 0x812   :  { %v1892_v22 = vmul.f32 -1.442695, %v1608_v11  ;;  %v1891_v23 = vmul.f32 -1.442695, %v1651_v0  ;;  %v2402_v24 = vpop.f32.mrb[59].mxu0  ;;  %v2414_v25 = vpop.f32.mrb[59].mxu1 }
 0x814   :  { %2570 = vpow2.f32 %v1892_v22 }
 0x815   :  { %2572 = vpow2.f32 %v1891_v23 }
 0x81e   :  { %v2571_v28 = vpop.eup %2570 }
 0x81f   :  { %v2573_v29 = vpop.eup %2572  ;;  %v1748_v30 = vadd.f32 1.0, %v2571_v28  ;;  %v1688_v31 = vpop.f32.mrb[60].mxu0 }
 0x820   :  { %v1731_v32 = vpop.f32.mrb[60].mxu1  ;;  %v1741_v33 = vadd.f32 1.0, %v2573_v29  ;;  %v1694_v34 = vadd.f32 %v1887_v26, %v1688_v31  ;;  %v2425_v36 = vpop.f32.mrb[61].mxu0 }
 0x821   :  { %v1737_v35 = vadd.f32 %v1889_v27, %v1731_v32  ;;  %v2437_v9 = vpop.f32.mrb[61].mxu1  ;;  %2574 = vrcp.f32 %v1748_v30  ;;  %v1691_v10 = vpop.f32.mrb[62].mxu0 }
 0x822   :  { %v1734_v12 = vpop.f32.mrb[62].mxu1  ;;  %2576 = vrcp.f32 %v1741_v33  ;;  %v2426_v14 = vpop.f32.mrb[63].mxu0 }
 0x823   :  { %v1893_v13 = vmul.f32 -1.442695, %v1737_v35  ;;  %v2438_v15 = vpop.f32.mrb[63].mxu1  ;;  %2578 = vtanh.f32 %v1694_v34 }
 0x825   :  { %2580 = vpow2.f32 %v1893_v13 }
 0x82b   :  { %v2575_v16 = vpop.eup %2574 }
 0x82c   :  { %v2577_v17 = vpop.eup %2576 }
 0x82d   :  { %v2579_v37 = vpop.eup %2578  ;;  %v1744_v38 = vmul.f32 %v2577_v17, %v3253_v56 }
 0x82e   :  { %v1752_v40 = vmul.f32 %v2579_v37, %v2575_v16 }
 0x82f   :  { %v2581_v39 = vpop.eup %2580 }
 0x830   :  { %v1757_v41 = vadd.f32 1.0, %v2581_v39  ;;  %v1753_v42 = vadd.f32 %v1752_v40, %v1744_v38 }
 0x832   :  { %2582 = vrcp.f32 %v1757_v41 }
 0x833   :  { %2584 = vtanh.f32 %v1753_v42 }
 0x83c   :  { %v2583_v43 = vpop.eup %2582 }
 0x83d   :  { %v2585_v44 = vpop.eup %2584 }
 0x83e   :  { %v1761_v45 = vmul.f32 %v2585_v44, %v2583_v43 }
 0x840   :  { %1894 = vst.msk [vmem:[%s3304_s5 + $0x1c] sm:$0xf] %vm348_vm1, %v1761_v45 }

// kernel: esim_forward.11
= control target key start
LH: loop header
LB: loop body
LE: loop exit
PB: predicated region body
PF: predicated region fallthrough
CT: control target
= control target key end

     0   :  { %vm33_vm0 = vcmask 523264   ;;  %vm67_vm1 = vcmask 1041409   ;;  %s572_s11 = smov 64   ;;  %s730_s0 = inlined_call_operand.vmem [shape: f32[2,8,64], index: 0, kind: input, shape index: {}]   ;;  %s731_s1 = inlined_call_operand.vmem [shape: f32[2,8,64], index: 1, kind: input, shape index: {}]   ;;  %s732_s2 = inlined_call_operand.vmem [shape: bf16[256,32], index: 2, kind: input, shape index: {}]   ;;  %s733_s3 = inlined_call_operand.vmem [shape: f32[1,32], index: 3, kind: input, shape index: {}]   ;;  %s734_s4 = inlined_call_operand.vmem [shape: bf16[32,32], index: 4, kind: input, shape index: {}]   ;;  %s735_s5 = inlined_call_operand.vmem [shape: f32[1,32], index: 5, kind: input, shape index: {}]   ;;  %s736_s6 = inlined_call_operand.vmem [shape: bf16[32,3], index: 6, kind: input, shape index: {}]   ;;  %s737_s7 = inlined_call_operand.vmem [shape: f32[1,3], index: 7, kind: input, shape index: {}]   ;;  %s738_s8 = inlined_call_operand.hbm [shape: f32[2,3], index: 8, kind: output, shape index: {}]  }
   0x1   :  { %v31_v0 = vld [vmem:[%s730_s0] sm:$0xff]  ;;  %v32_v1 = vld [vmem:[%s730_s0 + $0x8] sm:$0xff]  ;;  %v532_v25 = vld [vmem:[%s732_s2 + $0x50] sm:$0xff]  }
   0x2   :  { %v77_v2 = vld [vmem:[%s731_s1] sm:$0xff]  ;;  %v41_v3 = vsel %vm33_vm0, %v32_v1, 0.0  ;;  %v51_v4 = vsel %vm33_vm0, %v31_v0, -inf  ;;  %v58_v5 = vsel %vm33_vm0, %v32_v1, -inf  ;;  %v78_v6 = vld [vmem:[%s731_s1 + $0x8] sm:$0xff]  ;;  %v34_v19 = vsel %vm33_vm0, %v31_v0, 0.0 }
   0x3   :  { %v95_v7 = vsel %vm33_vm0, %v77_v2, -inf  ;;  %v528_v8 = vld [vmem:[%s732_s2 + $0x40] sm:$0xff]   ;;  %v52_v9 = vrot.slane %v51_v4, 4  ;;  %v59_v10 = vrot.slane %v58_v5, 4  ;;  %v102_v12 = vsel %vm33_vm0, %v78_v6, -inf  ;;  %v530_v20 = vld [vmem:[%s732_s2 + $0x48] sm:$0xff]  }
   0x4   :  { %v96_v11 = vrot.slane %v95_v7, 4  ;;  %475 = vmatprep.subr.bf16.mxu0 %v528_v8  ;;  %v42_v13 = vrot.slane %v41_v3, 4  ;;  %v529_v17 = vld [vmem:[%s732_s2] sm:$0xff]   ;;  %v103_v18 = vrot.slane %v102_v12, 4  ;;  %v531_v21 = vld [vmem:[%s732_s2 + $0x8] sm:$0xff]   ;;  %v35_v30 = vrot.slane %v34_v19, 4 }
   0x5   :  { %v53_v14 = vmax.f32 %v51_v4, %v52_v9  ;;  %v60_v15 = vmax.f32 %v58_v5, %v59_v10  ;;  %476 = vmatpush3.bf16.msra.mxu0 %v529_v17  ;;  %v533_v31 = vld [vmem:[%s732_s2 + $0x10] sm:$0xff]   ;;  %v79_v33 = vsel %vm33_vm0, %v77_v2, 0.0  ;;  %v534_v37 = vld [vmem:[%s732_s2 + $0x58] sm:$0xff]   ;;  %v86_v48 = vsel %vm33_vm0, %v78_v6, 0.0  ;;  %v536_v51 = vld [vmem:[%s732_s2 + $0x60] sm:$0xff]  }
   0x6   :  { %v97_v16 = vmax.f32 %v95_v7, %v96_v11  ;;  %v104_v26 = vmax.f32 %v102_v12, %v103_v18  ;;  %477 = vmatprep.subr.bf16.mxu0 %v530_v20  ;;  %v80_v41 = vrot.slane %v79_v33, 4  ;;  %v36_v44 = vadd.f32 %v35_v30, %v34_v19  ;;  %v535_v46 = vld [vmem:[%s732_s2 + $0x18] sm:$0xff]   ;;  %v537_v58 = vld [vmem:[%s732_s2 + $0x20] sm:$0xff]   ;;  %v538_v61 = vld [vmem:[%s732_s2 + $0x68] sm:$0xff]  }
   0x7   :  { %v54_v22 = vrot.slane %v53_v14, 2  ;;  %v61_v23 = vrot.slane %v60_v15, 2  ;;  %v43_v45 = vadd.f32 %v42_v13, %v41_v3  ;;  %v87_v52 = vrot.slane %v86_v48, 4  ;;  %v539_v4 = vld [vmem:[%s732_s2 + $0x28] sm:$0xff]   ;;  %v540_v7 = vld [vmem:[%s732_s2 + $0x70] sm:$0xff]  }
   0x8   :  { %v98_v24 = vrot.slane %v97_v16, 2  ;;  %v105_v32 = vrot.slane %v104_v26, 2  ;;  %v81_v47 = vadd.f32 %v80_v41, %v79_v33  ;;  %v37_v56 = vrot.slane %v36_v44, 2 }
   0x9   :  { %v55_v27 = vmax.f32 %v53_v14, %v54_v22  ;;  %v62_v28 = vmax.f32 %v60_v15, %v61_v23  ;;  %478 = vmatpush3.bf16.msra.mxu0 %v531_v21  ;;  %v88_v55 = vadd.f32 %v87_v52, %v86_v48  ;;  %v44_v60 = vrot.slane %v43_v45, 2 }
   0xa   :  { %v99_v29 = vmax.f32 %v97_v16, %v98_v24  ;;  %v106_v38 = vmax.f32 %v104_v26, %v105_v32  ;;  %479 = vmatprep.subr.bf16.mxu0 %v532_v25  ;;  %v82_v53 = vrot.slane %v81_v47, 2  ;;  %v38_v63 = vadd.f32 %v37_v56, %v36_v44 }
   0xb   :  { %v56_v34 = vrot.slane %v55_v27, 1  ;;  %v63_v35 = vrot.slane %v62_v28, 1  ;;  %v89_v62 = vrot.slane %v88_v55, 2  ;;  %v45_v1 = vadd.f32 %v44_v60, %v43_v45 }
   0xc   :  { %v100_v36 = vrot.slane %v99_v29, 1  ;;  %v107_v43 = vrot.slane %v106_v38, 1  ;;  %v83_v59 = vadd.f32 %v82_v53, %v81_v47  ;;  %v39_v3 = vrot.slane %v38_v63, 1 }
   0xd   :  { %v57_v39 = vmax.f32 %v55_v27, %v56_v34  ;;  %v64_v40 = vmax.f32 %v62_v28, %v63_v35  ;;  %480 = vmatpush3.bf16.msra.mxu0 %v533_v31  ;;  %v90_v2 = vadd.f32 %v89_v62, %v88_v55  ;;  %v46_v6 = vrot.slane %v45_v1, 1 }
   0xe   :  { %v101_v42 = vmax.f32 %v99_v29, %v100_v36  ;;  %v108_v50 = vmax.f32 %v106_v38, %v107_v43  ;;  %481 = vmatprep.subr.bf16.mxu0 %v534_v37  ;;  %v84_v0 = vrot.slane %v83_v59, 1  ;;  %v40_v9 = vadd.f32 %v39_v3, %v38_v63 }
   0xf   :  { %v72_v49 = vsel %vm67_vm1, %v64_v40, %v57_v39  ;;  %v91_v8 = vrot.slane %v90_v2, 1 }
  0x10   :  { %v115_v54 = vsel %vm67_vm1, %v108_v50, %v101_v42  ;;  %v85_v5 = vadd.f32 %v84_v0, %v83_v59 }
  0x11   :  { %v523_v57 = vpack.i.bf16 %v72_v49, %v115_v54  ;;  %482 = vmatpush3.bf16.msra.mxu0 %v535_v46 }
  0x12   :  { %483 = vmatprep.subr.bf16.mxu0 %v536_v51 }
  0x13   :  { %524 = vrot.lane.b32.xlu0 %v523_v57, %s572_s11 }
  0x15   :  { %484 = vmatpush3.bf16.msra.mxu0 %v537_v58 }
  0x16   :  { %485 = vmatprep.subr.bf16.mxu0 %v538_v61 }
  0x17   :  { %13 = vsyncpa [#allocation3], 0  ;;  %v47_v10 = vadd.f32 %v46_v6, %v45_v1  ;;  %v92_v11 = vadd.f32 %v91_v8, %v90_v2  ;;  %v93_v12 = vmul.f32 0.125, %v85_v5  ;;  %v49_v13 = vmul.f32 0.125, %v40_v9  ;;  %v541_v14 = vld [vmem:[%s732_s2 + $0x30] sm:$0xff]   ;;  %v542_v16 = vld [vmem:[%s732_s2 + $0x78] sm:$0xff]  }
  0x18   :  { %v543_v20 = vld [vmem:[%s732_s2 + $0x38] sm:$0xff]   ;;  %v544_v28 = vld [vmem:[%s734_s4] sm:$0xff]   ;;  %v573_v29 = vmov 0.0   ;;  %v545_v30 = vld [vmem:[%s734_s4 + $0x8] sm:$0xff]   ;;  %vm574_vm2 = vmmov 0   ;;  %vm322_vm3 = vcmask 261120  }
  0x19   :  { %486 = vmatpush3.bf16.msra.mxu0 %v539_v4  ;;  %v50_v15 = vmul.f32 0.125, %v47_v10  ;;  %v94_v17 = vmul.f32 0.125, %v92_v11  ;;  %503 = vmatprep.subr.bf16.mxu1 %v573_v29  ;;  %v450_v32 = vld [vmem:[%s733_s3] ss:$0 sm:$0xff]  ;;  %v547_v41 = vld [vmem:[%s736_s6 + $0x8] sm:$0xff]   ;;  %s575_s9 = smov [#allocation2]  }
  0x1a   :  { %487 = vmatprep.subr.bf16.mxu0 %v540_v7  ;;  %504 = vmatpush3.bf16.msra.mxu1 %v544_v28  ;;  %v546_v39 = vld [vmem:[%s736_s6] sm:$0xff]   ;;  %s442_s6 = sshll.u32 %s575_s9, 4  ;;  %vm434_vm4 = vcmask 17408   ;;  %s443_s6 = int_to_ptr.vmem [resolvable:$true] %s442_s6 }
  0x1b   :  { %v68_v18 = vsel %vm67_vm1, %v50_v15, %v49_v13  ;;  %v111_v19 = vsel %vm67_vm1, %v94_v17, %v93_v12  ;;  %505 = vmatprep.subr.bf16.mxu1 %v573_v29  ;;  %507 = vmatprep.mubr.msk.bf16.mxu1 %vm574_vm2, %v573_v29  ;;  %v467_v42 = vld [vmem:[%s735_s5] ss:$0 sm:$0xff]  ;;  %s548_s5 = scalar_lea.vmem %s443_s6, 32  ;;  %p553_p1 = scmp.lt.s32.totalorder %s443_s6, %s443_s6 }
  0x1c   :  { %v471_v50 = vld [vmem:[%s737_s7] ss:$0 sm:$0xff]  ;;  %p549_p0 = scmp.ne.s32.totalorder %s443_s6, %s548_s5  ;;  %p554_p2 = scmp.lt.s32.totalorder %s548_s5, %s548_s5 }
  0x1d   :  { %488 = vmatpush3.bf16.msra.mxu0 %v541_v14 }
  0x1e   :  { %489 = vmatprep.subr.bf16.mxu0 %v542_v16  ;;  %506 = vmatpush3.bf16.msra.mxu1 %v545_v30  ;;  %p555_p3 = por %p554_p2, %p553_p1 }
  0x1f   :  { %511 = vmatprep.subr.bf16.mxu1 %v573_v29 }
  0x20   :  { %p556_p4 = pnand %p555_p3, %p549_p0 }
  0x21   :  { %490 = vmatpush3.bf16.msra.mxu0 %v543_v20 }
  0x85   :  { %v525_v21 = vpop.permute.xlu0 %524 }
  0x86   :  { %v527_v22 = vunpack.i.h.bf16 %v525_v21  ;;  %v526_v23 = vunpack.i.l.bf16 %v525_v21 }
  0x88   :  { %v119_v24 = vsel %vm33_vm0, %v111_v19, %v526_v23  ;;  %v76_v25 = vsel %vm33_vm0, %v68_v18, %v527_v22 }
  0x89   :  { %v121_v26 = vpack.c.bf16 %v119_v24, %v119_v24  ;;  %v120_v27 = vpack.c.bf16 %v76_v25, %v76_v25 }
  0x8b   :  { %289 = vmatprep.mubr.bf16.mxu0 %v121_v26 }
  0x8c   :  { %290 = vmatmul.mubr.bf16.vlgmr.msra.gmra.mrb[0].mxu0 %v120_v27 }
 0x15f   :  { %v491_v31 = vpop.f32.mrb[0].mxu0 }
 0x160   :  { %v492_v33 = vpop.f32.mrb[1].mxu0 }
 0x161   :  { %v493_v34 = vadd.f32 %v492_v33, %v491_v31  ;;  %v494_v35 = vpop.f32.mrb[2].mxu0 }
 0x162   :  { %v495_v36 = vpop.f32.mrb[3].mxu0 }
 0x163   :  { %v292_v37 = vadd.f32 %v493_v34, %v450_v32 }
 0x165   :  { %v297_v38 = vmax.f32 %v292_v37, 0.0 }
 0x167   :  { %v298_v40 = vpack.c.bf16 %v297_v38, %v297_v38 }
 0x169   :  { %508 = vmatmul.mubr.msk.bf16.vlgmr.msra.gmra.mrb[0].mxu1 %vm322_vm3, %v298_v40 }
 0x16a   :  { %512 = vmatpush3.bf16.msra.mxu1 %v546_v39  ;;  %515 = vmatprep.mubr.msk.bf16.mxu1 %vm574_vm2, %v573_v29 }
 0x16b   :  { %513 = vmatprep.subr.bf16.mxu1 %v573_v29 }
 0x16e   :  { %514 = vmatpush3.bf16.msra.mxu1 %v547_v41 }
 0x23c   :  { %v360_v43 = vpop.f32.mrb[0].mxu1 }
 0x23d   :  { %v361_v44 = vadd.f32 %v467_v42, %v360_v43  ;;  %v509_v45 = vpop.f32.mrb[1].mxu1 }
 0x23e   :  { %v363_v46 = vpop.f32.mrb[2].mxu1 }
 0x23f   :  { %v366_v47 = vmax.f32 %v361_v44, 0.0  ;;  %v510_v48 = vpop.f32.mrb[3].mxu1 }
 0x241   :  { %v367_v49 = vpack.c.bf16 %v366_v47, %v366_v47 }
 0x243   :  { %516 = vmatmul.mubr.msk.bf16.vlgmr.msra.gmra.mrb[4].mxu1 %vm322_vm3, %v367_v49 }
 0x316   :  { %v428_v51 = vpop.f32.mrb[4].mxu1 }
 0x317   :  { %v429_v52 = vadd.f32 %v471_v50, %v428_v51  ;;  %v517_v53 = vpop.f32.mrb[5].mxu1 }
 0x318   :  { %v431_v54 = vpop.f32.mrb[6].mxu1 }
 0x319   :  { %v518_v55 = vpop.f32.mrb[7].mxu1  ;;  %435 = vst.msk [vmem:[#allocation2] sm:$0x3] %vm434_vm4, %v429_v52 }
 0x31a   :  { %559 = shalt.err (!%p556_p4)
}
 0x31b   :  { %s560_s7 = scalar_lea.hbm %s738_s8, 32 }
 0x31c   :  { %p561_p5 = scmp.ne.s32.totalorder %s738_s8, %s560_s7  ;;  %p564_p6 = scmp.lt.u32.totalorder %s560_s7, %s738_s8 }
 0x31e   :  { %p566_p7 = pnand %p564_p6, %p561_p5 }
 0x320   :  { %569 = shalt.err (!%p566_p7)
}
 0x321   :  { %445 = dma.vmem_to_hbm [thread:$0]  %s443_s6, 32, %s738_s8, [#allocation3]  }
 0x322   :  { %570 = dma.done.wait [#allocation3], 32  }
 0x323   :  { %571 = vsyncadd [#allocation3], 4294967264 }
 0x324   :  { %449 = vsyncpa [#allocation3], 1 }

</bundles_post_ra>
